<compile_context>
chip_gen: v7x
topology: tpu7x:2x2x1
jax: 0.10.0
libtpu: 0.0.40
codegen_flags: <defaults>
</compile_context>

<pallas_src>
import functools

import jax
import jax.numpy as jnp
from jax import lax
from jax.experimental import pallas as pl
from jax.experimental.pallas import tpu as pltpu


def _basic_block_kernel(xpad_ref, res_ref, w1_ref, t1_ref, w2_ref, t2_ref,
                        out_ref, ypad_ref, *, H, W, TB):
    """Fused BasicBlock forward for one batch tile of TB samples.

    xpad_ref : (TB, H+2, W+2, Cin)  spatially pre-padded input (compute dtype)
    res_ref  : (TB*H*W, Cin)        residual = original x (f32)
    w1_ref   : (9*Cin, C)           conv1 im2col weights, BN1 scale folded in
    t1_ref   : (1, C)               folded BN1 shift (f32)
    w2_ref   : (9*C, C)             conv2 im2col weights, BN2 scale folded in
    t2_ref   : (1, C)               folded BN2 shift (f32)
    out_ref  : (TB*H*W, C)          output (f32)
    ypad_ref : (TB, H+2, W+2, C)    VMEM scratch for the padded intermediate
    """
    f32 = jnp.float32
    Cin = xpad_ref.shape[-1]
    C = out_ref.shape[-1]
    M = TB * H * W

    def conv3x3(src_ref, w_ref, cin):
        # im2col: 9 shifted windows concatenated along channels -> a single
        # MXU matmul with M = TB*H*W and K = 9*cin (f32 accumulation).
        taps = [src_ref[:, dh:dh + H, dw:dw + W, :]
                for dh in range(3) for dw in range(3)]
        patch = jnp.concatenate(taps, axis=-1).reshape(M, 9 * cin)
        return jnp.dot(patch, w_ref[...], preferred_element_type=f32)

    # ---- conv1 (BN1 scale pre-folded) -> +shift -> ReLU ---------------------
    y1 = jnp.maximum(conv3x3(xpad_ref, w1_ref, Cin) + t1_ref[...], 0.0)

    # Zero only the 1-pixel border of the scratch (the interior is fully
    # overwritten every step).  Done each step so it stays correct when the
    # "parallel" batch axis is split across TensorCores (scratch is per-core).
    zrow = jnp.zeros((TB, 1, W + 2, C), ypad_ref.dtype)
    zcol = jnp.zeros((TB, H, 1, C), ypad_ref.dtype)
    ypad_ref[:, 0:1, :, :] = zrow
    ypad_ref[:, H + 1:H + 2, :, :] = zrow
    ypad_ref[:, 1:H + 1, 0:1, :] = zcol
    ypad_ref[:, 1:H + 1, W + 1:W + 2, :] = zcol
    ypad_ref[:, 1:H + 1, 1:W + 1, :] = (
        y1.reshape(TB, H, W, C).astype(ypad_ref.dtype))

    # ---- conv2 (BN2 scale pre-folded) -> +shift -> +residual(f32) -> ReLU ---
    y2 = conv3x3(ypad_ref, w2_ref, C) + t2_ref[...]
    out_ref[...] = jnp.maximum(y2 + res_ref[...], 0.0).astype(out_ref.dtype)


# ---------------------------------------------------------------------------
# Wrapper-side tiling / VMEM heuristics.
# ---------------------------------------------------------------------------
_VMEM_BUDGET = 40 * 1024 * 1024        # conservative: fits v7x (64 MiB physical)


def _round_up(n, m):
    return ((n + m - 1) // m) * m


def _vmem_bytes_estimate(TB, H, W, Cin, Cout, cbytes):
    """Rough per-grid-step VMEM footprint (pipelined blocks double-buffered)."""
    M = TB * H * W

    def tile2d(rows, cols, itemsize):
        return _round_up(rows, 8) * _round_up(cols, 128) * itemsize

    xpad = TB * (H + 2) * tile2d(W + 2, Cin, cbytes)
    res = tile2d(M, Cin, 4)
    out = tile2d(M, Cout, 4)
    wgt = tile2d(9 * Cin, Cout, cbytes) + tile2d(9 * Cout, Cout, cbytes)
    ypad = TB * (H + 2) * tile2d(W + 2, Cout, cbytes)
    patch = tile2d(M, 9 * max(Cin, Cout), cbytes)       # im2col temporary
    acc = 2 * tile2d(M, Cout, 4)                        # f32 conv results
    return 2 * (xpad + res + out + wgt) + ypad + 2 * patch + acc


def _pick_batch_tile(B, H, W, Cin, Cout, cbytes):
    divisors = [d for d in range(min(B, 8), 0, -1) if B % d == 0]

    def block_ok(d):     # 2-D residual/output blocks need sublane-aligned rows
        return d == B or (d * H * W) % 8 == 0

    def fits(d):
        return _vmem_bytes_estimate(d, H, W, Cin, Cout, cbytes) <= _VMEM_BUDGET

    # Prefer: fits VMEM budget AND >= 2 grid steps (keeps both v7x TCs busy).
    for d in divisors:
        if block_ok(d) and fits(d) and (B // d >= 2 or B == 1):
            return d
    for d in divisors:
        if block_ok(d) and fits(d):
            return d
    for d in divisors:
        if block_ok(d):
            return d
    return B


def basic_block_forward(x_nchw, params, *, eps=1e-5,
                        compute_dtype=jnp.bfloat16, batch_tile=None):
    """BasicBlock forward (stride=1, downsample=None) as one fused pallas_call."""
    B, Cin, H, W = x_nchw.shape
    Cout = params["conv1_w"].shape[0]
    if params["conv1_w"].shape[1] != Cin:
        raise ValueError("conv1 weight in_channels does not match input")
    if Cin != Cout:
        raise NotImplementedError(
            "downsample=None / stride=1 requires in_channels == out_channels")

    cbytes = jnp.dtype(compute_dtype).itemsize
    TB = batch_tile if batch_tile is not None else _pick_batch_tile(
        B, H, W, Cin, Cout, cbytes)
    if B % TB != 0:
        raise ValueError("batch must be divisible by the batch tile")
    if not (TB == B or (TB * H * W) % 8 == 0):
        raise ValueError("TB*H*W must be a multiple of 8 (sublane alignment)")
    M = TB * H * W

    # ---- wrapper-side layout plumbing (keeps the kernel matmul-only) --------
    # NCHW -> NHWC; pad H/W by 1 so the kernel only takes static tap slices.
    x_nhwc = jnp.transpose(x_nchw, (0, 2, 3, 1)).astype(jnp.float32)
    x_pad = jnp.pad(x_nhwc,
                    ((0, 0), (1, 1), (1, 1), (0, 0))).astype(compute_dtype)
    x_res = x_nhwc.reshape(B * H * W, Cin)          # f32 skip connection

    # Fold eval-mode BatchNorm into per-channel scale/shift (kept in f32).
    def fold_bn(g, b, m, v):
        scale = (g * lax.rsqrt(v + eps)).astype(jnp.float32)
        shift = (b - m * scale).astype(jnp.float32)
        return scale, shift

    s1, t1 = fold_bn(params["bn1_gamma"], params["bn1_beta"],
                     params["bn1_mean"], params["bn1_var"])
    s2, t2 = fold_bn(params["bn2_gamma"], params["bn2_beta"],
                     params["bn2_mean"], params["bn2_var"])

    # Conv weights (Cout, Cin, 3, 3): fold BN scale (per out-channel) in f32,
    # then pack to im2col layout (9*Cin, Cout), row index = (kh*3+kw)*Cin + ci.
    def pack_w(w, scale):
        w = w.astype(jnp.float32) * scale[:, None, None, None]
        w = jnp.transpose(w, (2, 3, 1, 0)).reshape(9 * w.shape[1], w.shape[0])
        return w.astype(compute_dtype)

    w1 = pack_w(params["conv1_w"], s1)
    w2 = pack_w(params["conv2_w"], s2)
    t1 = t1[None, :]
    t2 = t2[None, :]

    est = _vmem_bytes_estimate(TB, H, W, Cin, Cout, cbytes)
    vmem_limit = int(min(56 * 1024 * 1024,
                         max(32 * 1024 * 1024, est + est // 2)))

    def const_spec(arr):
        # NOTE: constant-index weight/shift blocks; small enough that default
        # double-buffering is acceptable at these sizes.
        zeros = (0,) * arr.ndim
        return pl.BlockSpec(arr.shape, lambda b, _z=zeros: _z)

    out2d = pl.pallas_call(
        functools.partial(_basic_block_kernel, H=H, W=W, TB=TB),
        out_shape=jax.ShapeDtypeStruct((B * H * W, Cout), jnp.float32),
        grid=(B // TB,),
        in_specs=[pl.BlockSpec((TB, H + 2, W + 2, Cin),
                               lambda b: (b, 0, 0, 0)),
                  pl.BlockSpec((M, Cin), lambda b: (b, 0)),
                  const_spec(w1), const_spec(t1),
                  const_spec(w2), const_spec(t2)],
        out_specs=pl.BlockSpec((M, Cout), lambda b: (b, 0)),
        scratch_shapes=[pltpu.VMEM((TB, H + 2, W + 2, Cout), compute_dtype)],
        compiler_params=pltpu.CompilerParams(
            dimension_semantics=("parallel",),
            vmem_limit_bytes=vmem_limit),
    )(x_pad, x_res, w1, t1, w2, t2)

    # (B*H*W, C) -> NHWC -> NCHW (no data movement for the reshape).
    return jnp.transpose(out2d.reshape(B, H, W, Cout), (0, 3, 1, 2))


def init_params(key, channels):
    ks = jax.random.split(key, 10)

    def n(k, shape, scale=1.0):
        return scale * jax.random.normal(k, shape, dtype=jnp.float32)

    w_scale = (2.0 / (9 * channels)) ** 0.5
    return {
        "conv1_w": n(ks[0], (channels, channels, 3, 3), w_scale),
        "conv2_w": n(ks[1], (channels, channels, 3, 3), w_scale),
        "bn1_gamma": 1.0 + 0.1 * n(ks[2], (channels,)),
        "bn1_beta": 0.1 * n(ks[3], (channels,)),
        "bn1_mean": 0.1 * n(ks[4], (channels,)),
        "bn1_var": 1.0 + 0.1 * jnp.abs(n(ks[5], (channels,))),
        "bn2_gamma": 1.0 + 0.1 * n(ks[6], (channels,)),
        "bn2_beta": 0.1 * n(ks[7], (channels,)),
        "bn2_mean": 0.1 * n(ks[8], (channels,)),
        "bn2_var": 1.0 + 0.1 * jnp.abs(n(ks[9], (channels,))),
    }


def basic_block_ref(x_nchw, params, eps=1e-5):
    """Pure-JAX reference (eval-mode BN), f32 / highest precision."""
    def bn(y, g, b, m, v):
        s = g / jnp.sqrt(v + eps)
        return y * s[None, :, None, None] + (b - m * s)[None, :, None, None]

    dn = lax.conv_dimension_numbers(x_nchw.shape, params["conv1_w"].shape,
                                    ("NCHW", "OIHW", "NCHW"))
    y = lax.conv_general_dilated(x_nchw, params["conv1_w"], (1, 1), "SAME",
                                 dimension_numbers=dn,
                                 precision=lax.Precision.HIGHEST)
    y = jnp.maximum(bn(y, params["bn1_gamma"], params["bn1_beta"],
                       params["bn1_mean"], params["bn1_var"]), 0.0)
    y2 = lax.conv_general_dilated(y, params["conv2_w"], (1, 1), "SAME",
                                  dimension_numbers=dn,
                                  precision=lax.Precision.HIGHEST)
    y2 = bn(y2, params["bn2_gamma"], params["bn2_beta"],
            params["bn2_mean"], params["bn2_var"])
    return jnp.maximum(y2 + x_nchw, 0.0)


if __name__ == "__main__":
    BATCH, CHANNELS, SPATIAL = 2, 4, 16
    key = jax.random.PRNGKey(0)
    kx, kp = jax.random.split(key)

    x = jax.random.normal(kx, (BATCH, CHANNELS, SPATIAL, SPATIAL),
                          dtype=jnp.float32)
    params = init_params(kp, CHANNELS)

    ref = jax.block_until_ready(basic_block_ref(x, params))

    # f32 matmul path: strict correctness check against the pure-JAX reference.
    out_f32 = jax.block_until_ready(
        basic_block_forward(x, params, compute_dtype=jnp.float32))
    assert out_f32.shape == (BATCH, CHANNELS, SPATIAL, SPATIAL)
    assert bool(jnp.all(jnp.isfinite(out_f32)))
    assert bool(jnp.allclose(out_f32, ref, atol=5e-3, rtol=5e-3))

    # Default bf16-matmul path (MXU-native on v5e/v6e/v7x); residual stays f32.
    out_bf16 = jax.block_until_ready(basic_block_forward(x, params))
    assert out_bf16.shape == (BATCH, CHANNELS, SPATIAL, SPATIAL)
    assert bool(jnp.all(jnp.isfinite(out_bf16)))
    assert bool(jnp.allclose(out_bf16, ref, atol=2.5e-1, rtol=2.5e-1))

    print("KERNEL_OK")
</pallas_src>

<mosaic_0001>
module attributes {stable_mosaic.version = 11 : i64} {
  func.func @_basic_block_kernel(%arg0: i32, %arg1: memref<1x18x18x4xf32, #tpu.memory_space<vmem>>, %arg2: memref<256x4xf32, #tpu.memory_space<vmem>>, %arg3: memref<36x4xf32, #tpu.memory_space<vmem>>, %arg4: memref<1x4xf32, #tpu.memory_space<vmem>>, %arg5: memref<36x4xf32, #tpu.memory_space<vmem>>, %arg6: memref<1x4xf32, #tpu.memory_space<vmem>>, %arg7: memref<256x4xf32, #tpu.memory_space<vmem>>, %arg8: memref<1x18x18x4xf32, #tpu.memory_space<vmem>>) attributes {dimension_semantics = [#tpu.dimension_semantics<parallel>], iteration_bounds = array<i64: 2>, scalar_prefetch = 0 : i64, scratch_operands = 1 : i64, tpu.core_type = #tpu.core_type<tc>, window_params = [{transform_indices = @transform_0, window_bounds = array<i64: 1, 18, 18, 4>}, {transform_indices = @transform_1, window_bounds = array<i64: 256, 4>}, {pipeline_mode = #tpu.pipeline_mode<synchronous>, transform_indices = @transform_2, window_bounds = array<i64: 36, 4>}, {pipeline_mode = #tpu.pipeline_mode<synchronous>, transform_indices = @transform_3, window_bounds = array<i64: 1, 4>}, {pipeline_mode = #tpu.pipeline_mode<synchronous>, transform_indices = @transform_4, window_bounds = array<i64: 36, 4>}, {pipeline_mode = #tpu.pipeline_mode<synchronous>, transform_indices = @transform_5, window_bounds = array<i64: 1, 4>}, {transform_indices = @transform_6, window_bounds = array<i64: 256, 4>}]} {
    %c0 = arith.constant 0 : index
    %c0_0 = arith.constant 0 : index
    %c0_1 = arith.constant 0 : index
    %c0_2 = arith.constant 0 : index
    %0 = vector.load %arg1[%c0, %c0_0, %c0_1, %c0_2] : memref<1x18x18x4xf32, #tpu.memory_space<vmem>>, vector<1x16x16x4xf32>
    %c0_3 = arith.constant 0 : index
    %c0_4 = arith.constant 0 : index
    %c1 = arith.constant 1 : index
    %c0_5 = arith.constant 0 : index
    %1 = vector.load %arg1[%c0_3, %c0_4, %c1, %c0_5] : memref<1x18x18x4xf32, #tpu.memory_space<vmem>>, vector<1x16x16x4xf32>
    %c0_6 = arith.constant 0 : index
    %c0_7 = arith.constant 0 : index
    %c2 = arith.constant 2 : index
    %c0_8 = arith.constant 0 : index
    %2 = vector.load %arg1[%c0_6, %c0_7, %c2, %c0_8] : memref<1x18x18x4xf32, #tpu.memory_space<vmem>>, vector<1x16x16x4xf32>
    %c0_9 = arith.constant 0 : index
    %c1_10 = arith.constant 1 : index
    %c0_11 = arith.constant 0 : index
    %c0_12 = arith.constant 0 : index
    %3 = vector.load %arg1[%c0_9, %c1_10, %c0_11, %c0_12] : memref<1x18x18x4xf32, #tpu.memory_space<vmem>>, vector<1x16x16x4xf32>
    %c0_13 = arith.constant 0 : index
    %c1_14 = arith.constant 1 : index
    %c1_15 = arith.constant 1 : index
    %c0_16 = arith.constant 0 : index
    %4 = vector.load %arg1[%c0_13, %c1_14, %c1_15, %c0_16] : memref<1x18x18x4xf32, #tpu.memory_space<vmem>>, vector<1x16x16x4xf32>
    %c0_17 = arith.constant 0 : index
    %c1_18 = arith.constant 1 : index
    %c2_19 = arith.constant 2 : index
    %c0_20 = arith.constant 0 : index
    %5 = vector.load %arg1[%c0_17, %c1_18, %c2_19, %c0_20] : memref<1x18x18x4xf32, #tpu.memory_space<vmem>>, vector<1x16x16x4xf32>
    %c0_21 = arith.constant 0 : index
    %c2_22 = arith.constant 2 : index
    %c0_23 = arith.constant 0 : index
    %c0_24 = arith.constant 0 : index
    %6 = vector.load %arg1[%c0_21, %c2_22, %c0_23, %c0_24] : memref<1x18x18x4xf32, #tpu.memory_space<vmem>>, vector<1x16x16x4xf32>
    %c0_25 = arith.constant 0 : index
    %c2_26 = arith.constant 2 : index
    %c1_27 = arith.constant 1 : index
    %c0_28 = arith.constant 0 : index
    %7 = vector.load %arg1[%c0_25, %c2_26, %c1_27, %c0_28] : memref<1x18x18x4xf32, #tpu.memory_space<vmem>>, vector<1x16x16x4xf32>
    %c0_29 = arith.constant 0 : index
    %c2_30 = arith.constant 2 : index
    %c2_31 = arith.constant 2 : index
    %c0_32 = arith.constant 0 : index
    %8 = vector.load %arg1[%c0_29, %c2_30, %c2_31, %c0_32] : memref<1x18x18x4xf32, #tpu.memory_space<vmem>>, vector<1x16x16x4xf32>
    %9 = tpu.concatenate %0, %1, %2, %3, %4, %5, %6, %7, %8 in 3 : vector<1x16x16x4xf32>, vector<1x16x16x4xf32>, vector<1x16x16x4xf32>, vector<1x16x16x4xf32>, vector<1x16x16x4xf32>, vector<1x16x16x4xf32>, vector<1x16x16x4xf32>, vector<1x16x16x4xf32>, vector<1x16x16x4xf32> -> vector<1x16x16x36xf32>
    %10 = vector.shape_cast %9 : vector<1x16x16x36xf32> to vector<256x36xf32>
    %c0_33 = arith.constant 0 : index
    %c0_34 = arith.constant 0 : index
    %11 = vector.load %arg3[%c0_33, %c0_34] : memref<36x4xf32, #tpu.memory_space<vmem>>, vector<36x4xf32>
    %cst = arith.constant dense<0.000000e+00> : vector<256x4xf32>
    %12 = tpu.matmul %10, %11, %cst {dimension_numbers = #tpu.dot_dimension_numbers<[1], [0], [0], [1], [0, 0, 1, 1], [], []>} : vector<256x36xf32>, vector<36x4xf32>, vector<256x4xf32> -> vector<256x4xf32>
    %c0_35 = arith.constant 0 : index
    %c0_36 = arith.constant 0 : index
    %13 = vector.load %arg4[%c0_35, %c0_36] : memref<1x4xf32, #tpu.memory_space<vmem>>, vector<1x4xf32>
    %14 = vector.broadcast %13 : vector<1x4xf32> to vector<256x4xf32>
    %15 = arith.addf %12, %14 : vector<256x4xf32>
    %cst_37 = arith.constant 0.000000e+00 : f32
    %16 = vector.broadcast %cst_37 : f32 to vector<256x4xf32>
    %17 = arith.maximumf %15, %16 : vector<256x4xf32>
    %cst_38 = arith.constant 0.000000e+00 : f32
    %18 = vector.broadcast %cst_38 : f32 to vector<1x1x18x4xf32>
    %cst_39 = arith.constant 0.000000e+00 : f32
    %19 = vector.broadcast %cst_39 : f32 to vector<1x16x1x4xf32>
    %c0_40 = arith.constant 0 : index
    %c0_41 = arith.constant 0 : index
    %c0_42 = arith.constant 0 : index
    %c0_43 = arith.constant 0 : index
    %20 = vector.load %arg8[%c0_40, %c0_41, %c0_42, %c0_43] : memref<1x18x18x4xf32, #tpu.memory_space<vmem>>, vector<1x1x18x4xf32>
    tpu.vector_store %arg8[%c0_40, %c0_41, %c0_42, %c0_43], %18 {strides = array<i32>} : memref<1x18x18x4xf32, #tpu.memory_space<vmem>>, vector<1x1x18x4xf32>,
    %c0_44 = arith.constant 0 : index
    %c17 = arith.constant 17 : index
    %c0_45 = arith.constant 0 : index
    %c0_46 = arith.constant 0 : index
    %21 = vector.load %arg8[%c0_44, %c17, %c0_45, %c0_46] : memref<1x18x18x4xf32, #tpu.memory_space<vmem>>, vector<1x1x18x4xf32>
    tpu.vector_store %arg8[%c0_44, %c17, %c0_45, %c0_46], %18 {strides = array<i32>} : memref<1x18x18x4xf32, #tpu.memory_space<vmem>>, vector<1x1x18x4xf32>,
    %c0_47 = arith.constant 0 : index
    %c1_48 = arith.constant 1 : index
    %c0_49 = arith.constant 0 : index
    %c0_50 = arith.constant 0 : index
    %22 = vector.load %arg8[%c0_47, %c1_48, %c0_49, %c0_50] : memref<1x18x18x4xf32, #tpu.memory_space<vmem>>, vector<1x16x1x4xf32>
    tpu.vector_store %arg8[%c0_47, %c1_48, %c0_49, %c0_50], %19 {strides = array<i32>} : memref<1x18x18x4xf32, #tpu.memory_space<vmem>>, vector<1x16x1x4xf32>,
    %c0_51 = arith.constant 0 : index
    %c1_52 = arith.constant 1 : index
    %c17_53 = arith.constant 17 : index
    %c0_54 = arith.constant 0 : index
    %23 = vector.load %arg8[%c0_51, %c1_52, %c17_53, %c0_54] : memref<1x18x18x4xf32, #tpu.memory_space<vmem>>, vector<1x16x1x4xf32>
    tpu.vector_store %arg8[%c0_51, %c1_52, %c17_53, %c0_54], %19 {strides = array<i32>} : memref<1x18x18x4xf32, #tpu.memory_space<vmem>>, vector<1x16x1x4xf32>,
    %24 = vector.shape_cast %17 : vector<256x4xf32> to vector<1x16x16x4xf32>
    %c0_55 = arith.constant 0 : index
    %c1_56 = arith.constant 1 : index
    %c1_57 = arith.constant 1 : index
    %c0_58 = arith.constant 0 : index
    %25 = vector.load %arg8[%c0_55, %c1_56, %c1_57, %c0_58] : memref<1x18x18x4xf32, #tpu.memory_space<vmem>>, vector<1x16x16x4xf32>
    tpu.vector_store %arg8[%c0_55, %c1_56, %c1_57, %c0_58], %24 {strides = array<i32>} : memref<1x18x18x4xf32, #tpu.memory_space<vmem>>, vector<1x16x16x4xf32>,
    %c0_59 = arith.constant 0 : index
    %c0_60 = arith.constant 0 : index
    %c0_61 = arith.constant 0 : index
    %c0_62 = arith.constant 0 : index
    %26 = vector.load %arg8[%c0_59, %c0_60, %c0_61, %c0_62] : memref<1x18x18x4xf32, #tpu.memory_space<vmem>>, vector<1x16x16x4xf32>
    %c0_63 = arith.constant 0 : index
    %c0_64 = arith.constant 0 : index
    %c1_65 = arith.constant 1 : index
    %c0_66 = arith.constant 0 : index
    %27 = vector.load %arg8[%c0_63, %c0_64, %c1_65, %c0_66] : memref<1x18x18x4xf32, #tpu.memory_space<vmem>>, vector<1x16x16x4xf32>
    %c0_67 = arith.constant 0 : index
    %c0_68 = arith.constant 0 : index
    %c2_69 = arith.constant 2 : index
    %c0_70 = arith.constant 0 : index
    %28 = vector.load %arg8[%c0_67, %c0_68, %c2_69, %c0_70] : memref<1x18x18x4xf32, #tpu.memory_space<vmem>>, vector<1x16x16x4xf32>
    %c0_71 = arith.constant 0 : index
    %c1_72 = arith.constant 1 : index
    %c0_73 = arith.constant 0 : index
    %c0_74 = arith.constant 0 : index
    %29 = vector.load %arg8[%c0_71, %c1_72, %c0_73, %c0_74] : memref<1x18x18x4xf32, #tpu.memory_space<vmem>>, vector<1x16x16x4xf32>
    %c0_75 = arith.constant 0 : index
    %c1_76 = arith.constant 1 : index
    %c1_77 = arith.constant 1 : index
    %c0_78 = arith.constant 0 : index
    %30 = vector.load %arg8[%c0_75, %c1_76, %c1_77, %c0_78] : memref<1x18x18x4xf32, #tpu.memory_space<vmem>>, vector<1x16x16x4xf32>
    %c0_79 = arith.constant 0 : index
    %c1_80 = arith.constant 1 : index
    %c2_81 = arith.constant 2 : index
    %c0_82 = arith.constant 0 : index
    %31 = vector.load %arg8[%c0_79, %c1_80, %c2_81, %c0_82] : memref<1x18x18x4xf32, #tpu.memory_space<vmem>>, vector<1x16x16x4xf32>
    %c0_83 = arith.constant 0 : index
    %c2_84 = arith.constant 2 : index
    %c0_85 = arith.constant 0 : index
    %c0_86 = arith.constant 0 : index
    %32 = vector.load %arg8[%c0_83, %c2_84, %c0_85, %c0_86] : memref<1x18x18x4xf32, #tpu.memory_space<vmem>>, vector<1x16x16x4xf32>
    %c0_87 = arith.constant 0 : index
    %c2_88 = arith.constant 2 : index
    %c1_89 = arith.constant 1 : index
    %c0_90 = arith.constant 0 : index
    %33 = vector.load %arg8[%c0_87, %c2_88, %c1_89, %c0_90] : memref<1x18x18x4xf32, #tpu.memory_space<vmem>>, vector<1x16x16x4xf32>
    %c0_91 = arith.constant 0 : index
    %c2_92 = arith.constant 2 : index
    %c2_93 = arith.constant 2 : index
    %c0_94 = arith.constant 0 : index
    %34 = vector.load %arg8[%c0_91, %c2_92, %c2_93, %c0_94] : memref<1x18x18x4xf32, #tpu.memory_space<vmem>>, vector<1x16x16x4xf32>
    %35 = tpu.concatenate %26, %27, %28, %29, %30, %31, %32, %33, %34 in 3 : vector<1x16x16x4xf32>, vector<1x16x16x4xf32>, vector<1x16x16x4xf32>, vector<1x16x16x4xf32>, vector<1x16x16x4xf32>, vector<1x16x16x4xf32>, vector<1x16x16x4xf32>, vector<1x16x16x4xf32>, vector<1x16x16x4xf32> -> vector<1x16x16x36xf32>
    %36 = vector.shape_cast %35 : vector<1x16x16x36xf32> to vector<256x36xf32>
    %c0_95 = arith.constant 0 : index
    %c0_96 = arith.constant 0 : index
    %37 = vector.load %arg5[%c0_95, %c0_96] : memref<36x4xf32, #tpu.memory_space<vmem>>, vector<36x4xf32>
    %cst_97 = arith.constant dense<0.000000e+00> : vector<256x4xf32>
    %38 = tpu.matmul %36, %37, %cst_97 {dimension_numbers = #tpu.dot_dimension_numbers<[1], [0], [0], [1], [0, 0, 1, 1], [], []>} : vector<256x36xf32>, vector<36x4xf32>, vector<256x4xf32> -> vector<256x4xf32>
    %c0_98 = arith.constant 0 : index
    %c0_99 = arith.constant 0 : index
    %39 = vector.load %arg6[%c0_98, %c0_99] : memref<1x4xf32, #tpu.memory_space<vmem>>, vector<1x4xf32>
    %40 = vector.broadcast %39 : vector<1x4xf32> to vector<256x4xf32>
    %41 = arith.addf %38, %40 : vector<256x4xf32>
    %c0_100 = arith.constant 0 : index
    %c0_101 = arith.constant 0 : index
    %42 = vector.load %arg2[%c0_100, %c0_101] : memref<256x4xf32, #tpu.memory_space<vmem>>, vector<256x4xf32>
    %43 = arith.addf %41, %42 : vector<256x4xf32>
    %cst_102 = arith.constant 0.000000e+00 : f32
    %44 = vector.broadcast %cst_102 : f32 to vector<256x4xf32>
    %45 = arith.maximumf %43, %44 : vector<256x4xf32>
    %c0_103 = arith.constant 0 : index
    %c0_104 = arith.constant 0 : index
    %46 = vector.load %arg7[%c0_103, %c0_104] : memref<256x4xf32, #tpu.memory_space<vmem>>, vector<256x4xf32>
    tpu.vector_store %arg7[%c0_103, %c0_104], %45 {strides = array<i32>} : memref<256x4xf32, #tpu.memory_space<vmem>>, vector<256x4xf32>,
    return
  }
  func.func @transform_0(%arg0: i32) -> (i32, i32, i32, i32) {
    %c0_i32 = arith.constant 0 : i32
    %c0_i32_0 = arith.constant 0 : i32
    %c0_i32_1 = arith.constant 0 : i32
    %c0_i32_2 = arith.constant 0 : i32
    return %arg0, %c0_i32, %c0_i32_0, %c0_i32_1 : i32, i32, i32, i32
  }
  func.func @transform_1(%arg0: i32) -> (i32, i32) {
    %c0_i32 = arith.constant 0 : i32
    %c0_i32_0 = arith.constant 0 : i32
    return %arg0, %c0_i32 : i32, i32
  }
  func.func @transform_2(%arg0: i32) -> (i32, i32) {
    %c0_i32 = arith.constant 0 : i32
    %c0_i32_0 = arith.constant 0 : i32
    %c0_i32_1 = arith.constant 0 : i32
    return %c0_i32, %c0_i32_0 : i32, i32
  }
  func.func @transform_3(%arg0: i32) -> (i32, i32) {
    %c0_i32 = arith.constant 0 : i32
    %c0_i32_0 = arith.constant 0 : i32
    %c0_i32_1 = arith.constant 0 : i32
    return %c0_i32, %c0_i32_0 : i32, i32
  }
  func.func @transform_4(%arg0: i32) -> (i32, i32) {
    %c0_i32 = arith.constant 0 : i32
    %c0_i32_0 = arith.constant 0 : i32
    %c0_i32_1 = arith.constant 0 : i32
    return %c0_i32, %c0_i32_0 : i32, i32
  }
  func.func @transform_5(%arg0: i32) -> (i32, i32) {
    %c0_i32 = arith.constant 0 : i32
    %c0_i32_0 = arith.constant 0 : i32
    %c0_i32_1 = arith.constant 0 : i32
    return %c0_i32, %c0_i32_0 : i32, i32
  }
  func.func @transform_6(%arg0: i32) -> (i32, i32) {
    %c0_i32 = arith.constant 0 : i32
    %c0_i32_0 = arith.constant 0 : i32
    return %arg0, %c0_i32 : i32, i32
  }
}

</mosaic_0001>

<bundles_post_ra>
// kernel: tpu_custom_call.1
= control target key start
LH: loop header
LB: loop body
LE: loop exit
PB: predicated region body
PF: predicated region fallthrough
CT: control target
= control target key end

     0   :  { %s4980_s21 = smov 0   ;;  %s8054_s0 = inlined_call_operand.vmem [shape: f32[2,18,18,4], index: 0, kind: input, shape index: {}]   ;;  %s8055_s1 = inlined_call_operand.vmem [shape: f32[512,4], index: 1, kind: input, shape index: {}]   ;;  %s8056_s2 = inlined_call_operand.vmem [shape: f32[36,4], index: 2, kind: input, shape index: {}]   ;;  %s8057_s3 = inlined_call_operand.vmem [shape: f32[1,4], index: 3, kind: input, shape index: {}]   ;;  %s8058_s4 = inlined_call_operand.vmem [shape: f32[36,4], index: 4, kind: input, shape index: {}]   ;;  %s8059_s5 = inlined_call_operand.vmem [shape: f32[1,4], index: 5, kind: input, shape index: {}]   ;;  %s8060_s6 = inlined_call_operand.vmem [shape: f32[512,4], index: 6, kind: output, shape index: {}]  }
   0x1 LB: > { %s4986_s22 = sadd.s32 4294967295, %s4934_s21   ;;  %p4402_p0 = scmp.ge.s32.totalorder %s4934_s21, 1  ;;  %s4934_s21 = sphi %s4980_s21, %s16_s21  }
   0x2   : > { %p223_p1 = scmp.lt.s32.totalorder %s4934_s21, 3 }
   0x4   : > { %p224_p2 = pnand %p4402_p0, %p223_p1 }
   0x6   : > { %227 = sbr.rel (%p224_p2) target bundleno = 1648 (0x670), region = 44 }
   0xd   : > { %p258_p3 = scmp.lt.s32.totalorder %s4986_s22, 1  ;;  %s4936_s28 = smov 4   ;;  %vm1962_vm0 = vcmask 1043456   ;;  %vm1589_vm1 = vcmask 31744   ;;  %vm1622_vm2 = vcmask 64512   ;;  %vm1655_vm3 = vcmask 97280  }
   0xe   : > { %s4937_s29 = smov 8   ;;  %s4938_s30 = smov 12   ;;  %vm1688_vm4 = vcmask 130048   ;;  %vm1721_vm5 = vcmask 162816   ;;  %vm1754_vm6 = vcmask 195584   ;;  %vm1787_vm7 = vcmask 228352  }
   0xf   : > { %s259_s23 = scalar_select %p258_p3, %s4986_s22, 1  ;;  %vm1820_vm8 = vcmask 261120   ;;  %vm1865_vm9 = vcmask 293888   ;;  %vm2225_vm10 = vcmask 25600   ;;  %vm2232_vm11 = vcmask 24576  }
  0x10   : > { %s4939_s7 = smov 16   ;;  %s4940_s8 = smov 20  }
  0x11   : > { %s4876_s24 = smul.u32 432, %s259_s23  ;;  %s4941_s9 = smov 24  }
  0x12   : > { %s4942_s20 = smov 28   ;;  %s4943_s23 = smov 32  }
  0x13   : > { %s4995_s27 = scalar_lea.vmem %s8054_s0, %s4876_s24 }
  0x14   : > { %v4998_v0 = vld [vmem:[%s4995_s27 + $0x19] sm:$0xff]  ;;  %v307_v1 = vld [vmem:[%s4995_s27 + $0x1] sm:$0xff]  ;;  %v308_v3 = vld [vmem:[%s4995_s27 + $0x9] sm:$0xff] }
  0x15   : > { %601 = vrot.lane.b32.xlu1 %v4998_v0, %s4936_s28  ;;  %597 = vrot.lane.b32.xlu0 %v307_v1, %s4936_s28  ;;  %v5005_v2 = vld [vmem:[%s4995_s27 + $0x21] sm:$0xff]  ;;  %v5012_v4 = vld [vmem:[%s4995_s27 + $0x39] sm:$0xff] }
  0x16   : > { %v5015_v5 = vld [vmem:[%s4995_s27 + $0x31] sm:$0xff]  ;;  %v5025_v7 = vld [vmem:[%s4995_s27 + $0x49] sm:$0xff]  ;;  %v5035_v9 = vld [vmem:[%s4995_s27 + $0x61] sm:$0xff] }
  0x17   : > { %v5022_v6 = vld [vmem:[%s4995_s27 + $0x51] sm:$0xff]  ;;  %v5032_v8 = vld [vmem:[%s4995_s27 + $0x69] sm:$0xff]  ;;  %v5042_v10 = vld [vmem:[%s4995_s27 + $0x81] sm:$0xff] }
  0x18   : > { %v5045_v11 = vld [vmem:[%s4995_s27 + $0x79] sm:$0xff]  ;;  %v5055_v13 = vld [vmem:[%s4995_s27 + $0x91] sm:$0xff]  ;;  %v5065_v15 = vld [vmem:[%s4995_s27 + $0xa9] sm:$0xff] }
  0x19   : > { %603 = vrot.lane.b32.xlu1 %v5005_v2, %s4936_s28  ;;  %599 = vrot.lane.b32.xlu0 %v308_v3, %s4936_s28  ;;  %v5052_v12 = vld [vmem:[%s4995_s27 + $0x99] sm:$0xff]  ;;  %v5062_v14 = vld [vmem:[%s4995_s27 + $0xb1] sm:$0xff] }
  0x1a   : > { %v5072_v16 = vld [vmem:[%s4995_s27 + $0xc9] sm:$0xff]  ;;  %v5075_v17 = vld [vmem:[%s4995_s27 + $0xc1] sm:$0xff]  ;;  %v5085_v19 = vld [vmem:[%s4995_s27 + $0xd9] sm:$0xff] }
  0x1b   : > { %v5082_v18 = vld [vmem:[%s4995_s27 + $0xe1] sm:$0xff]  ;;  %v5092_v20 = vld [vmem:[%s4995_s27 + $0xf9] sm:$0xff]  ;;  %v5095_v21 = vld [vmem:[%s4995_s27 + $0xf1] sm:$0xff] }
  0x1c   : > { %v5102_v22 = vld [vmem:[%s4995_s27 + $0x111] sm:$0xff]  ;;  %v5105_v23 = vld [vmem:[%s4995_s27 + $0x109] sm:$0xff]  ;;  %v5115_v25 = vld [vmem:[%s4995_s27 + $0x121] sm:$0xff] }
  0x1d   : > { %607 = vrot.lane.b32.xlu1 %v5012_v4, %s4936_s28  ;;  %605 = vrot.lane.b32.xlu0 %v5015_v5, %s4936_s28  ;;  %v5112_v24 = vld [vmem:[%s4995_s27 + $0x129] sm:$0xff]  ;;  %v5122_v26 = vld [vmem:[%s4995_s27 + $0x141] sm:$0xff] }
  0x1e   : > { %v5125_v27 = vld [vmem:[%s4995_s27 + $0x139] sm:$0xff]  ;;  %v5135_v29 = vld [vmem:[%s4995_s27 + $0x151] sm:$0xff]  ;;  %v5145_v31 = vld [vmem:[%s4995_s27 + $0x169] sm:$0xff] }
  0x1f   : > { %v5132_v28 = vld [vmem:[%s4995_s27 + $0x159] sm:$0xff]  ;;  %v5142_v30 = vld [vmem:[%s4995_s27 + $0x171] sm:$0xff]  ;;  %v339_v33 = vld [vmem:[%s4995_s27 + $0x2] sm:$0xff] }
  0x20   : > { %v340_v32 = vld [vmem:[%s4995_s27 + $0xa] sm:$0xff]  ;;  %v5156_v34 = vld [vmem:[%s4995_s27 + $0x22] sm:$0xff]  ;;  %v5159_v35 = vld [vmem:[%s4995_s27 + $0x1a] sm:$0xff] }
  0x21   : > { %611 = vrot.lane.b32.xlu1 %v5022_v6, %s4936_s28  ;;  %609 = vrot.lane.b32.xlu0 %v5025_v7, %s4936_s28  ;;  %v5166_v36 = vld [vmem:[%s4995_s27 + $0x3a] sm:$0xff]  ;;  %v5169_v37 = vld [vmem:[%s4995_s27 + $0x32] sm:$0xff] }
  0x22   : > { %v5176_v38 = vld [vmem:[%s4995_s27 + $0x52] sm:$0xff]  ;;  %v5179_v39 = vld [vmem:[%s4995_s27 + $0x4a] sm:$0xff]  ;;  %v5189_v41 = vld [vmem:[%s4995_s27 + $0x62] sm:$0xff] }
  0x23   : > { %v5186_v40 = vld [vmem:[%s4995_s27 + $0x6a] sm:$0xff]  ;;  %v5196_v42 = vld [vmem:[%s4995_s27 + $0x82] sm:$0xff]  ;;  %v5199_v43 = vld [vmem:[%s4995_s27 + $0x7a] sm:$0xff] }
  0x24   : > { %v5206_v44 = vld [vmem:[%s4995_s27 + $0x9a] sm:$0xff]  ;;  %v5209_v45 = vld [vmem:[%s4995_s27 + $0x92] sm:$0xff]  ;;  %v5219_v47 = vld [vmem:[%s4995_s27 + $0xaa] sm:$0xff] }
  0x25   : > { %615 = vrot.lane.b32.xlu1 %v5032_v8, %s4936_s28  ;;  %613 = vrot.lane.b32.xlu0 %v5035_v9, %s4936_s28  ;;  %v5216_v46 = vld [vmem:[%s4995_s27 + $0xb2] sm:$0xff]  ;;  %v5226_v48 = vld [vmem:[%s4995_s27 + $0xca] sm:$0xff] }
  0x26   : > { %v5229_v49 = vld [vmem:[%s4995_s27 + $0xc2] sm:$0xff]  ;;  %v5239_v51 = vld [vmem:[%s4995_s27 + $0xda] sm:$0xff]  ;;  %v5249_v53 = vld [vmem:[%s4995_s27 + $0xf2] sm:$0xff] }
  0x27   : > { %v5236_v50 = vld [vmem:[%s4995_s27 + $0xe2] sm:$0xff]  ;;  %v5246_v52 = vld [vmem:[%s4995_s27 + $0xfa] sm:$0xff]  ;;  %v5256_v54 = vld [vmem:[%s4995_s27 + $0x112] sm:$0xff] }
  0x28   : > { %v5259_v55 = vld [vmem:[%s4995_s27 + $0x10a] sm:$0xff]  ;;  %v5269_v57 = vld [vmem:[%s4995_s27 + $0x122] sm:$0xff]  ;;  %v5279_v59 = vld [vmem:[%s4995_s27 + $0x13a] sm:$0xff] }
  0x29   : > { %619 = vrot.lane.b32.xlu1 %v5042_v10, %s4936_s28  ;;  %617 = vrot.lane.b32.xlu0 %v5045_v11, %s4936_s28  ;;  %v5266_v56 = vld [vmem:[%s4995_s27 + $0x12a] sm:$0xff]  ;;  %v5276_v58 = vld [vmem:[%s4995_s27 + $0x142] sm:$0xff] }
  0x2a   : > { %v5290_v62 = vld [vmem:[%s4995_s27 + $0x15a] sm:$0xff]  ;;  %v5293_v63 = vld [vmem:[%s4995_s27 + $0x152] sm:$0xff] }
  0x2b   : > { %8101 = vst [vmem:[#allocation5_spill] sm:$0xff] %v5290_v62  ;;  %8102 = vst [vmem:[#allocation6_spill] sm:$0xff] %v5293_v63 }
  0x2d   : > { %623 = vrot.lane.b32.xlu1 %v5052_v12, %s4936_s28  ;;  %621 = vrot.lane.b32.xlu0 %v5055_v13, %s4936_s28 }
  0x31   : > { %627 = vrot.lane.b32.xlu1 %v5062_v14, %s4936_s28  ;;  %625 = vrot.lane.b32.xlu0 %v5065_v15, %s4936_s28 }
  0x35   : > { %631 = vrot.lane.b32.xlu1 %v5072_v16, %s4936_s28  ;;  %629 = vrot.lane.b32.xlu0 %v5075_v17, %s4936_s28 }
  0x39   : > { %635 = vrot.lane.b32.xlu1 %v5082_v18, %s4936_s28  ;;  %633 = vrot.lane.b32.xlu0 %v5085_v19, %s4936_s28 }
  0x3d   : > { %639 = vrot.lane.b32.xlu1 %v5092_v20, %s4936_s28  ;;  %637 = vrot.lane.b32.xlu0 %v5095_v21, %s4936_s28 }
  0x41   : > { %643 = vrot.lane.b32.xlu1 %v5102_v22, %s4936_s28  ;;  %641 = vrot.lane.b32.xlu0 %v5105_v23, %s4936_s28 }
  0x45   : > { %647 = vrot.lane.b32.xlu1 %v5112_v24, %s4936_s28  ;;  %645 = vrot.lane.b32.xlu0 %v5115_v25, %s4936_s28 }
  0x49   : > { %651 = vrot.lane.b32.xlu1 %v5122_v26, %s4936_s28  ;;  %649 = vrot.lane.b32.xlu0 %v5125_v27, %s4936_s28 }
  0x4d   : > { %655 = vrot.lane.b32.xlu1 %v5132_v28, %s4936_s28  ;;  %653 = vrot.lane.b32.xlu0 %v5135_v29, %s4936_s28 }
  0x51   : > { %659 = vrot.lane.b32.xlu1 %v5142_v30, %s4936_s28  ;;  %657 = vrot.lane.b32.xlu0 %v5145_v31, %s4936_s28 }
  0x55   : > { %727 = vrot.lane.b32.xlu1 %v340_v32, %s4937_s29  ;;  %725 = vrot.lane.b32.xlu0 %v339_v33, %s4937_s29  ;;  %v5304_v32 = vld [vmem:[%s4995_s27 + $0x172] sm:$0xff]  ;;  %v5307_v33 = vld [vmem:[%s4995_s27 + $0x16a] sm:$0xff] }
  0x56   : > { %8105 = vst [vmem:[#allocation9_spill] sm:$0xff] %v5304_v32  ;;  %8106 = vst [vmem:[#allocation10_spill] sm:$0xff] %v5307_v33 }
  0x59   : > { %731 = vrot.lane.b32.xlu1 %v5156_v34, %s4937_s29  ;;  %729 = vrot.lane.b32.xlu0 %v5159_v35, %s4937_s29 }
  0x5d   : > { %735 = vrot.lane.b32.xlu1 %v5166_v36, %s4937_s29  ;;  %733 = vrot.lane.b32.xlu0 %v5169_v37, %s4937_s29 }
  0x61   : > { %739 = vrot.lane.b32.xlu1 %v5176_v38, %s4937_s29  ;;  %737 = vrot.lane.b32.xlu0 %v5179_v39, %s4937_s29 }
  0x65   : > { %743 = vrot.lane.b32.xlu1 %v5186_v40, %s4937_s29  ;;  %741 = vrot.lane.b32.xlu0 %v5189_v41, %s4937_s29 }
  0x69   : > { %747 = vrot.lane.b32.xlu1 %v5196_v42, %s4937_s29  ;;  %745 = vrot.lane.b32.xlu0 %v5199_v43, %s4937_s29 }
  0x6d   : > { %751 = vrot.lane.b32.xlu1 %v5206_v44, %s4937_s29  ;;  %749 = vrot.lane.b32.xlu0 %v5209_v45, %s4937_s29 }
  0x71   : > { %755 = vrot.lane.b32.xlu1 %v5216_v46, %s4937_s29  ;;  %753 = vrot.lane.b32.xlu0 %v5219_v47, %s4937_s29 }
  0x75   : > { %759 = vrot.lane.b32.xlu1 %v5226_v48, %s4937_s29  ;;  %757 = vrot.lane.b32.xlu0 %v5229_v49, %s4937_s29 }
  0x79   : > { %763 = vrot.lane.b32.xlu1 %v5236_v50, %s4937_s29  ;;  %761 = vrot.lane.b32.xlu0 %v5239_v51, %s4937_s29 }
  0x7d   : > { %767 = vrot.lane.b32.xlu1 %v5246_v52, %s4937_s29  ;;  %765 = vrot.lane.b32.xlu0 %v5249_v53, %s4937_s29 }
  0x81   : > { %771 = vrot.lane.b32.xlu1 %v5256_v54, %s4937_s29  ;;  %769 = vrot.lane.b32.xlu0 %v5259_v55, %s4937_s29 }
  0x85   : > { %775 = vrot.lane.b32.xlu1 %v5266_v56, %s4937_s29  ;;  %773 = vrot.lane.b32.xlu0 %v5269_v57, %s4937_s29 }
  0x87   : > { %v5281_v60 = vpop.permute.xlu1 %601  ;;  %v5283_v61 = vpop.permute.xlu0 %597 }
  0x88   : > { %8099 = vst [vmem:[#allocation3_spill] sm:$0xff] %v5281_v60  ;;  %8100 = vst [vmem:[#allocation4_spill] sm:$0xff] %v5283_v61 }
  0x89   : > { %779 = vrot.lane.b32.xlu1 %v5276_v58, %s4937_s29  ;;  %777 = vrot.lane.b32.xlu0 %v5279_v59, %s4937_s29 }
  0x8b   : > { %v5295_v1 = vpop.permute.xlu1 %603  ;;  %v5297_v3 = vpop.permute.xlu0 %599 }
  0x8c   : > { %8103 = vst [vmem:[#allocation7_spill] sm:$0xff] %v5295_v1  ;;  %8104 = vst [vmem:[#allocation8_spill] sm:$0xff] %v5297_v3 }
  0x8d   : > { %783 = vrot.lane.b32.xlu1 %v5290_v62, %s4937_s29  ;;  %781 = vrot.lane.b32.xlu0 %v5293_v63, %s4937_s29  ;;  %v5322_v63 = vld [vmem:[%s4995_s27 + $0x18] sm:$0xff]  ;;  %v278_v62 = vld [vmem:[%s4995_s27 + $0x20] sm:$0xff] }
  0x8e   : > { %8111 = vst [vmem:[#allocation15_spill] sm:$0xff] %v5322_v63 }
  0x8f   : > { %v5309_v60 = vpop.permute.xlu1 %607  ;;  %v5311_v61 = vpop.permute.xlu0 %605 }
  0x90   : > { %8107 = vst [vmem:[#allocation11_spill] sm:$0xff] %v5309_v60  ;;  %8108 = vst [vmem:[#allocation12_spill] sm:$0xff] %v5311_v61 }
  0x91   : > { %787 = vrot.lane.b32.xlu1 %v5304_v32, %s4937_s29  ;;  %785 = vrot.lane.b32.xlu0 %v5307_v33, %s4937_s29  ;;  %v5333_v33 = vld [vmem:[%s4995_s27 + $0x38] sm:$0xff]  ;;  %v5515_v32 = vld [vmem:[%s4995_s27 + $0x170] sm:$0xff] }
  0x92   : > { %8114 = vst [vmem:[#allocation18_spill] sm:$0xff] %v5333_v33 }
  0x93   : > { %v5317_v1 = vpop.permute.xlu1 %611  ;;  %v5319_v3 = vpop.permute.xlu0 %609 }
  0x94   : > { %8109 = vst [vmem:[#allocation13_spill] sm:$0xff] %v5317_v1  ;;  %8110 = vst [vmem:[#allocation14_spill] sm:$0xff] %v5319_v3  ;;  %v5336_v1 = vld [vmem:[%s4995_s27 + $0x30] sm:$0xff] }
  0x95   : > { %855 = vrot.lane.b32.xlu1 %v278_v62, %s4938_s30  ;;  %853 = vrot.lane.b32.xlu0 %v5322_v63, %s4938_s30  ;;  %8115 = vst [vmem:[#allocation19_spill] sm:$0xff] %v5336_v1  ;;  %v5347_v63 = vld [vmem:[%s4995_s27 + $0x50] sm:$0xff] }
  0x96   : > { %8118 = vst [vmem:[#allocation22_spill] sm:$0xff] %v5347_v63 }
  0x97   : > { %v5328_v61 = vpop.permute.xlu1 %615  ;;  %v5330_v60 = vpop.permute.xlu0 %613 }
  0x98   : > { %8112 = vst [vmem:[#allocation16_spill] sm:$0xff] %v5328_v61  ;;  %8113 = vst [vmem:[#allocation17_spill] sm:$0xff] %v5330_v60  ;;  %v5350_v61 = vld [vmem:[%s4995_s27 + $0x48] sm:$0xff] }
  0x99   : > { %859 = vrot.lane.b32.xlu1 %v5333_v33, %s4938_s30  ;;  %857 = vrot.lane.b32.xlu0 %v5336_v1, %s4938_s30  ;;  %8119 = vst [vmem:[#allocation23_spill] sm:$0xff] %v5350_v61  ;;  %v5361_v33 = vld [vmem:[%s4995_s27 + $0x68] sm:$0xff] }
  0x9a   : > { %8122 = vst [vmem:[#allocation26_spill] sm:$0xff] %v5361_v33 }
  0x9b   : > { %v5342_v62 = vpop.permute.xlu1 %619  ;;  %v5344_v3 = vpop.permute.xlu0 %617 }
  0x9c   : > { %8116 = vst [vmem:[#allocation20_spill] sm:$0xff] %v5342_v62  ;;  %8117 = vst [vmem:[#allocation21_spill] sm:$0xff] %v5344_v3  ;;  %v5364_v62 = vld [vmem:[%s4995_s27 + $0x60] sm:$0xff] }
  0x9d   : > { %863 = vrot.lane.b32.xlu1 %v5347_v63, %s4938_s30  ;;  %861 = vrot.lane.b32.xlu0 %v5350_v61, %s4938_s30  ;;  %8123 = vst [vmem:[#allocation27_spill] sm:$0xff] %v5364_v62  ;;  %v5375_v63 = vld [vmem:[%s4995_s27 + $0x80] sm:$0xff] }
  0x9e   : > { %8126 = vst [vmem:[#allocation30_spill] sm:$0xff] %v5375_v63 }
  0x9f   : > { %v5356_v60 = vpop.permute.xlu1 %623  ;;  %v5358_v1 = vpop.permute.xlu0 %621 }
  0xa0   : > { %8120 = vst [vmem:[#allocation24_spill] sm:$0xff] %v5356_v60  ;;  %8121 = vst [vmem:[#allocation25_spill] sm:$0xff] %v5358_v1  ;;  %v5378_v60 = vld [vmem:[%s4995_s27 + $0x78] sm:$0xff] }
  0xa1   : > { %867 = vrot.lane.b32.xlu1 %v5361_v33, %s4938_s30  ;;  %865 = vrot.lane.b32.xlu0 %v5364_v62, %s4938_s30  ;;  %8127 = vst [vmem:[#allocation31_spill] sm:$0xff] %v5378_v60  ;;  %v5389_v33 = vld [vmem:[%s4995_s27 + $0x98] sm:$0xff] }
  0xa2   : > { %8130 = vst [vmem:[#allocation34_spill] sm:$0xff] %v5389_v33 }
  0xa3   : > { %v5370_v3 = vpop.permute.xlu1 %627  ;;  %v5372_v61 = vpop.permute.xlu0 %625 }
  0xa4   : > { %8124 = vst [vmem:[#allocation28_spill] sm:$0xff] %v5370_v3  ;;  %8125 = vst [vmem:[#allocation29_spill] sm:$0xff] %v5372_v61  ;;  %v5392_v3 = vld [vmem:[%s4995_s27 + $0x90] sm:$0xff] }
  0xa5   : > { %871 = vrot.lane.b32.xlu1 %v5375_v63, %s4938_s30  ;;  %869 = vrot.lane.b32.xlu0 %v5378_v60, %s4938_s30  ;;  %8131 = vst [vmem:[#allocation35_spill] sm:$0xff] %v5392_v3  ;;  %v5403_v63 = vld [vmem:[%s4995_s27 + $0xb0] sm:$0xff] }
  0xa6   : > { %8134 = vst [vmem:[#allocation38_spill] sm:$0xff] %v5403_v63 }
  0xa7   : > { %v5384_v1 = vpop.permute.xlu1 %631  ;;  %v5386_v62 = vpop.permute.xlu0 %629 }
  0xa8   : > { %8128 = vst [vmem:[#allocation32_spill] sm:$0xff] %v5384_v1  ;;  %8129 = vst [vmem:[#allocation33_spill] sm:$0xff] %v5386_v62  ;;  %v5406_v1 = vld [vmem:[%s4995_s27 + $0xa8] sm:$0xff] }
  0xa9   : > { %875 = vrot.lane.b32.xlu1 %v5389_v33, %s4938_s30  ;;  %873 = vrot.lane.b32.xlu0 %v5392_v3, %s4938_s30  ;;  %8135 = vst [vmem:[#allocation39_spill] sm:$0xff] %v5406_v1  ;;  %v5417_v33 = vld [vmem:[%s4995_s27 + $0xc8] sm:$0xff] }
  0xaa   : > { %8138 = vst [vmem:[#allocation42_spill] sm:$0xff] %v5417_v33 }
  0xab   : > { %v5398_v61 = vpop.permute.xlu1 %635  ;;  %v5400_v60 = vpop.permute.xlu0 %633 }
  0xac   : > { %8132 = vst [vmem:[#allocation36_spill] sm:$0xff] %v5398_v61  ;;  %8133 = vst [vmem:[#allocation37_spill] sm:$0xff] %v5400_v60  ;;  %v5420_v61 = vld [vmem:[%s4995_s27 + $0xc0] sm:$0xff] }
  0xad   : > { %879 = vrot.lane.b32.xlu1 %v5403_v63, %s4938_s30  ;;  %877 = vrot.lane.b32.xlu0 %v5406_v1, %s4938_s30  ;;  %8139 = vst [vmem:[#allocation43_spill] sm:$0xff] %v5420_v61  ;;  %v5431_v63 = vld [vmem:[%s4995_s27 + $0xe0] sm:$0xff] }
  0xae   : > { %8142 = vst [vmem:[#allocation46_spill] sm:$0xff] %v5431_v63 }
  0xaf   : > { %v5412_v62 = vpop.permute.xlu1 %639  ;;  %v5414_v3 = vpop.permute.xlu0 %637 }
  0xb0   : > { %8136 = vst [vmem:[#allocation40_spill] sm:$0xff] %v5412_v62  ;;  %8137 = vst [vmem:[#allocation41_spill] sm:$0xff] %v5414_v3  ;;  %v5434_v62 = vld [vmem:[%s4995_s27 + $0xd8] sm:$0xff] }
  0xb1   : > { %883 = vrot.lane.b32.xlu1 %v5417_v33, %s4938_s30  ;;  %881 = vrot.lane.b32.xlu0 %v5420_v61, %s4938_s30  ;;  %8143 = vst [vmem:[#allocation47_spill] sm:$0xff] %v5434_v62  ;;  %v5445_v33 = vld [vmem:[%s4995_s27 + $0xf8] sm:$0xff] }
  0xb2   : > { %8146 = vst [vmem:[#allocation50_spill] sm:$0xff] %v5445_v33 }
  0xb3   : > { %v5426_v60 = vpop.permute.xlu1 %643  ;;  %v5428_v1 = vpop.permute.xlu0 %641 }
  0xb4   : > { %8140 = vst [vmem:[#allocation44_spill] sm:$0xff] %v5426_v60  ;;  %8141 = vst [vmem:[#allocation45_spill] sm:$0xff] %v5428_v1  ;;  %v5448_v60 = vld [vmem:[%s4995_s27 + $0xf0] sm:$0xff] }
  0xb5   : > { %887 = vrot.lane.b32.xlu1 %v5431_v63, %s4938_s30  ;;  %885 = vrot.lane.b32.xlu0 %v5434_v62, %s4938_s30  ;;  %8147 = vst [vmem:[#allocation51_spill] sm:$0xff] %v5448_v60  ;;  %v5459_v63 = vld [vmem:[%s4995_s27 + $0x110] sm:$0xff] }
  0xb6   : > { %8150 = vst [vmem:[#allocation54_spill] sm:$0xff] %v5459_v63 }
  0xb7   : > { %v5440_v3 = vpop.permute.xlu1 %647  ;;  %v5442_v61 = vpop.permute.xlu0 %645 }
  0xb8   : > { %8144 = vst [vmem:[#allocation48_spill] sm:$0xff] %v5440_v3  ;;  %8145 = vst [vmem:[#allocation49_spill] sm:$0xff] %v5442_v61  ;;  %v5462_v3 = vld [vmem:[%s4995_s27 + $0x108] sm:$0xff] }
  0xb9   : > { %891 = vrot.lane.b32.xlu1 %v5445_v33, %s4938_s30  ;;  %889 = vrot.lane.b32.xlu0 %v5448_v60, %s4938_s30  ;;  %8151 = vst [vmem:[#allocation55_spill] sm:$0xff] %v5462_v3  ;;  %v5473_v33 = vld [vmem:[%s4995_s27 + $0x128] sm:$0xff] }
  0xba   : > { %8154 = vst [vmem:[#allocation58_spill] sm:$0xff] %v5473_v33 }
  0xbb   : > { %v5454_v1 = vpop.permute.xlu1 %651  ;;  %v5456_v62 = vpop.permute.xlu0 %649 }
  0xbc   : > { %8148 = vst [vmem:[#allocation52_spill] sm:$0xff] %v5454_v1  ;;  %8149 = vst [vmem:[#allocation53_spill] sm:$0xff] %v5456_v62  ;;  %v5476_v1 = vld [vmem:[%s4995_s27 + $0x120] sm:$0xff] }
  0xbd   : > { %895 = vrot.lane.b32.xlu1 %v5459_v63, %s4938_s30  ;;  %893 = vrot.lane.b32.xlu0 %v5462_v3, %s4938_s30  ;;  %8155 = vst [vmem:[#allocation59_spill] sm:$0xff] %v5476_v1  ;;  %v5487_v63 = vld [vmem:[%s4995_s27 + $0x140] sm:$0xff] }
  0xbe   : > { %8158 = vst [vmem:[#allocation62_spill] sm:$0xff] %v5487_v63 }
  0xbf   : > { %v5468_v61 = vpop.permute.xlu1 %655  ;;  %v5470_v60 = vpop.permute.xlu0 %653 }
  0xc0   : > { %8152 = vst [vmem:[#allocation56_spill] sm:$0xff] %v5468_v61  ;;  %8153 = vst [vmem:[#allocation57_spill] sm:$0xff] %v5470_v60  ;;  %v5490_v60 = vld [vmem:[%s4995_s27 + $0x138] sm:$0xff] }
  0xc1   : > { %899 = vrot.lane.b32.xlu1 %v5473_v33, %s4938_s30  ;;  %897 = vrot.lane.b32.xlu0 %v5476_v1, %s4938_s30  ;;  %8159 = vst [vmem:[#allocation63_spill] sm:$0xff] %v5490_v60  ;;  %v5501_v33 = vld [vmem:[%s4995_s27 + $0x158] sm:$0xff] }
  0xc2   : > { %8162 = vst [vmem:[#allocation66_spill] sm:$0xff] %v5501_v33 }
  0xc3   : > { %v5482_v62 = vpop.permute.xlu1 %659  ;;  %v5484_v3 = vpop.permute.xlu0 %657 }
  0xc4   : > { %8156 = vst [vmem:[#allocation60_spill] sm:$0xff] %v5482_v62  ;;  %8157 = vst [vmem:[#allocation61_spill] sm:$0xff] %v5484_v3  ;;  %v5504_v62 = vld [vmem:[%s4995_s27 + $0x150] sm:$0xff] }
  0xc5   : > { %903 = vrot.lane.b32.xlu1 %v5487_v63, %s4938_s30  ;;  %901 = vrot.lane.b32.xlu0 %v5490_v60, %s4938_s30  ;;  %8163 = vst [vmem:[#allocation67_spill] sm:$0xff] %v5504_v62  ;;  %v5518_v60 = vld [vmem:[%s4995_s27 + $0x168] sm:$0xff] }
  0xc7   : > { %v5496_v61 = vpop.permute.xlu1 %727  ;;  %v5498_v1 = vpop.permute.xlu0 %725 }
  0xc8   : > { %8160 = vst [vmem:[#allocation64_spill] sm:$0xff] %v5496_v61  ;;  %8161 = vst [vmem:[#allocation65_spill] sm:$0xff] %v5498_v1  ;;  %v5525_v61 = vld [vmem:[%s4995_s27 + $0x188] sm:$0xff]  ;;  %v5528_v1 = vld [vmem:[%s4995_s27 + $0x180] sm:$0xff] }
  0xc9   : > { %907 = vrot.lane.b32.xlu1 %v5501_v33, %s4938_s30  ;;  %905 = vrot.lane.b32.xlu0 %v5504_v62, %s4938_s30 }
  0xcb   : > { %v5510_v3 = vpop.permute.xlu1 %731  ;;  %v5512_v63 = vpop.permute.xlu0 %729 }
  0xcc   : > { %8164 = vst [vmem:[#allocation68_spill] sm:$0xff] %v5510_v3  ;;  %8165 = vst [vmem:[#allocation69_spill] sm:$0xff] %v5512_v63 }
  0xcd   : > { %911 = vrot.lane.b32.xlu1 %v5515_v32, %s4938_s30  ;;  %909 = vrot.lane.b32.xlu0 %v5518_v60, %s4938_s30 }
  0xcf   : > { %v5530_v33 = vpop.permute.xlu1 %735  ;;  %v5532_v62 = vpop.permute.xlu0 %733 }
  0xd0   : > { %8166 = vst [vmem:[#allocation70_spill] sm:$0xff] %v5530_v33  ;;  %8167 = vst [vmem:[#allocation71_spill] sm:$0xff] %v5532_v62 }
  0xd1   : > { %915 = vrot.lane.b32.xlu1 %v5525_v61, %s4938_s30  ;;  %913 = vrot.lane.b32.xlu0 %v5528_v1, %s4938_s30 }
  0xd3   : > { %v5538_v3 = vpop.permute.xlu1 %739  ;;  %v5540_v63 = vpop.permute.xlu0 %737 }
  0xd4   : > { %8168 = vst [vmem:[#allocation72_spill] sm:$0xff] %v5538_v3  ;;  %8169 = vst [vmem:[#allocation73_spill] sm:$0xff] %v5540_v63 }
  0xd5   : > { %983 = vrot.lane.b32.xlu1 %v5005_v2, %s4939_s7  ;;  %981 = vrot.lane.b32.xlu0 %v4998_v0, %s4939_s7 }
  0xd7   : > { %v5546_v33 = vpop.permute.xlu1 %743  ;;  %v5548_v62 = vpop.permute.xlu0 %741 }
  0xd9   : > { %987 = vrot.lane.b32.xlu1 %v5012_v4, %s4939_s7  ;;  %985 = vrot.lane.b32.xlu0 %v5015_v5, %s4939_s7 }
  0xdb   : > { %v5554_v3 = vpop.permute.xlu1 %747  ;;  %v5556_v63 = vpop.permute.xlu0 %745 }
  0xdd   : > { %991 = vrot.lane.b32.xlu1 %v5022_v6, %s4939_s7  ;;  %989 = vrot.lane.b32.xlu0 %v5025_v7, %s4939_s7 }
  0xdf   : > { %v5562_v0 = vpop.permute.xlu1 %751  ;;  %v5564_v2 = vpop.permute.xlu0 %749 }
  0xe0   : > { %8170 = vst [vmem:[#allocation74_spill] sm:$0xff] %v5562_v0  ;;  %8171 = vst [vmem:[#allocation75_spill] sm:$0xff] %v5564_v2  ;;  %v4556_v0 = vld [vmem:[%s4995_s27 + $0x121] sm:$0xff] }
  0xe1   : > { %995 = vrot.lane.b32.xlu1 %v5032_v8, %s4939_s7  ;;  %993 = vrot.lane.b32.xlu0 %v5035_v9, %s4939_s7 }
  0xe3   : > { %v5570_v4 = vpop.permute.xlu1 %755  ;;  %v5572_v5 = vpop.permute.xlu0 %753 }
  0xe4   : > { %8172 = vst [vmem:[#allocation76_spill] sm:$0xff] %v5570_v4  ;;  %8173 = vst [vmem:[#allocation77_spill] sm:$0xff] %v5572_v5  ;;  %v4552_v4 = vld [vmem:[%s4995_s27 + $0xf1] sm:$0xff] }
  0xe5   : > { %999 = vrot.lane.b32.xlu1 %v5042_v10, %s4939_s7  ;;  %997 = vrot.lane.b32.xlu0 %v5045_v11, %s4939_s7 }
  0xe7   : > { %v5578_v6 = vpop.permute.xlu1 %759  ;;  %v5580_v7 = vpop.permute.xlu0 %757 }
  0xe8   : > { %8174 = vst [vmem:[#allocation78_spill] sm:$0xff] %v5578_v6  ;;  %8175 = vst [vmem:[#allocation79_spill] sm:$0xff] %v5580_v7  ;;  %v4571_v6 = vld [vmem:[%s4995_s27 + $0x52] sm:$0xff] }
  0xe9   : > { %1003 = vrot.lane.b32.xlu1 %v5052_v12, %s4939_s7  ;;  %1001 = vrot.lane.b32.xlu0 %v5055_v13, %s4939_s7 }
  0xeb   : > { %v5586_v8 = vpop.permute.xlu1 %763  ;;  %v5588_v9 = vpop.permute.xlu0 %761 }
  0xec   : > { %8176 = vst [vmem:[#allocation80_spill] sm:$0xff] %v5586_v8  ;;  %8177 = vst [vmem:[#allocation81_spill] sm:$0xff] %v5588_v9  ;;  %v8238_v9 = vld [vmem:[#allocation46_spill] sm:$0xff]  ;;  %v1857_v8 = vld [vmem:[%s8056_s2 + $0x20] sm:$0xf] }
  0xed   : > { %1007 = vrot.lane.b32.xlu1 %v5062_v14, %s4939_s7  ;;  %1005 = vrot.lane.b32.xlu0 %v5065_v15, %s4939_s7 }
  0xef   : > { %v5594_v10 = vpop.permute.xlu1 %767  ;;  %v5596_v11 = vpop.permute.xlu0 %765 }
  0xf0   : > { %8178 = vst [vmem:[#allocation82_spill] sm:$0xff] %v5594_v10  ;;  %8179 = vst [vmem:[#allocation83_spill] sm:$0xff] %v5596_v11  ;;  %v8230_v11 = vld [vmem:[#allocation38_spill] sm:$0xff] }
  0xf1   : > { %1011 = vrot.lane.b32.xlu1 %v5072_v16, %s4939_s7  ;;  %1009 = vrot.lane.b32.xlu0 %v5075_v17, %s4939_s7 }
  0xf3   : > { %v5602_v12 = vpop.permute.xlu1 %771  ;;  %v5604_v13 = vpop.permute.xlu0 %769 }
  0xf4   : > { %8180 = vst [vmem:[#allocation84_spill] sm:$0xff] %v5602_v12  ;;  %8181 = vst [vmem:[#allocation85_spill] sm:$0xff] %v5604_v13  ;;  %v8222_v13 = vld [vmem:[#allocation30_spill] sm:$0xff] }
  0xf5   : > { %1015 = vrot.lane.b32.xlu1 %v5082_v18, %s4939_s7  ;;  %1013 = vrot.lane.b32.xlu0 %v5085_v19, %s4939_s7 }
  0xf7   : > { %v5610_v14 = vpop.permute.xlu1 %775  ;;  %v5612_v15 = vpop.permute.xlu0 %773 }
  0xf8   : > { %8182 = vst [vmem:[#allocation86_spill] sm:$0xff] %v5610_v14  ;;  %8183 = vst [vmem:[#allocation87_spill] sm:$0xff] %v5612_v15 }
  0xf9   : > { %1019 = vrot.lane.b32.xlu1 %v5092_v20, %s4939_s7  ;;  %1017 = vrot.lane.b32.xlu0 %v5095_v21, %s4939_s7 }
  0xfb   : > { %v5618_v16 = vpop.permute.xlu1 %779  ;;  %v5620_v17 = vpop.permute.xlu0 %777 }
  0xfc   : > { %8184 = vst [vmem:[#allocation88_spill] sm:$0xff] %v5618_v16  ;;  %8185 = vst [vmem:[#allocation89_spill] sm:$0xff] %v5620_v17 }
  0xfd   : > { %1023 = vrot.lane.b32.xlu1 %v5102_v22, %s4939_s7  ;;  %1021 = vrot.lane.b32.xlu0 %v5105_v23, %s4939_s7 }
  0xff   : > { %v5626_v18 = vpop.permute.xlu1 %783  ;;  %v5628_v19 = vpop.permute.xlu0 %781 }
 0x100   : > { %8186 = vst [vmem:[#allocation90_spill] sm:$0xff] %v5626_v18  ;;  %8187 = vst [vmem:[#allocation91_spill] sm:$0xff] %v5628_v19 }
 0x101   : > { %1027 = vrot.lane.b32.xlu1 %v5112_v24, %s4939_s7  ;;  %1025 = vrot.lane.b32.xlu0 %v5115_v25, %s4939_s7 }
 0x103   : > { %v5634_v20 = vpop.permute.xlu1 %787  ;;  %v5636_v21 = vpop.permute.xlu0 %785 }
 0x104   : > { %8188 = vst [vmem:[#allocation92_spill] sm:$0xff] %v5634_v20  ;;  %8189 = vst [vmem:[#allocation93_spill] sm:$0xff] %v5636_v21 }
 0x105   : > { %1031 = vrot.lane.b32.xlu1 %v5122_v26, %s4939_s7  ;;  %1029 = vrot.lane.b32.xlu0 %v5125_v27, %s4939_s7  ;;  %v5659_v26 = vld [vmem:[%s4995_s27 + $0x189] sm:$0xff]  ;;  %v5662_v27 = vld [vmem:[%s4995_s27 + $0x181] sm:$0xff] }
 0x107   : > { %v5642_v22 = vpop.permute.xlu1 %855  ;;  %v5644_v23 = vpop.permute.xlu0 %853 }
 0x109   : > { %1035 = vrot.lane.b32.xlu1 %v5132_v28, %s4939_s7  ;;  %1033 = vrot.lane.b32.xlu0 %v5135_v29, %s4939_s7 }
 0x10b   : > { %v5650_v24 = vpop.permute.xlu1 %859  ;;  %v5652_v25 = vpop.permute.xlu0 %857 }
 0x10d   : > { %1039 = vrot.lane.b32.xlu1 %v5142_v30, %s4939_s7  ;;  %1037 = vrot.lane.b32.xlu0 %v5145_v31, %s4939_s7 }
 0x10f   : > { %v5664_v21 = vpop.permute.xlu1 %863  ;;  %v5666_v28 = vpop.permute.xlu0 %861 }
 0x111   : > { %1043 = vrot.lane.b32.xlu1 %v5659_v26, %s4939_s7  ;;  %1041 = vrot.lane.b32.xlu0 %v5662_v27, %s4939_s7 }
 0x113   : > { %v5672_v29 = vpop.permute.xlu1 %867  ;;  %v5674_v30 = vpop.permute.xlu0 %865 }
 0x115   : > { %1111 = vrot.lane.b32.xlu1 %v5156_v34, %s4940_s8  ;;  %1109 = vrot.lane.b32.xlu0 %v5159_v35, %s4940_s8 }
 0x117   : > { %v5680_v31 = vpop.permute.xlu1 %871  ;;  %v5682_v20 = vpop.permute.xlu0 %869 }
 0x119   : > { %1115 = vrot.lane.b32.xlu1 %v5166_v36, %s4940_s8  ;;  %1113 = vrot.lane.b32.xlu0 %v5169_v37, %s4940_s8 }
 0x11b   : > { %v5688_v19 = vpop.permute.xlu1 %875  ;;  %v5690_v18 = vpop.permute.xlu0 %873 }
 0x11d   : > { %1119 = vrot.lane.b32.xlu1 %v5176_v38, %s4940_s8  ;;  %1117 = vrot.lane.b32.xlu0 %v5179_v39, %s4940_s8 }
 0x11f   : > { %v5696_v34 = vpop.permute.xlu1 %879  ;;  %v5698_v35 = vpop.permute.xlu0 %877 }
 0x120   : > { %8190 = vst [vmem:[#allocation94_spill] sm:$0xff] %v5696_v34  ;;  %8191 = vst [vmem:[#allocation95_spill] sm:$0xff] %v5698_v35  ;;  %v4586_v34 = vld [vmem:[%s4995_s27 + $0x10a] sm:$0xff] }
 0x121   : > { %1123 = vrot.lane.b32.xlu1 %v5186_v40, %s4940_s8  ;;  %1121 = vrot.lane.b32.xlu0 %v5189_v41, %s4940_s8 }
 0x123   : > { %v5704_v36 = vpop.permute.xlu1 %883  ;;  %v5706_v37 = vpop.permute.xlu0 %881 }
 0x124   : > { %8192 = vst [vmem:[#allocation96_spill] sm:$0xff] %v5704_v36  ;;  %8193 = vst [vmem:[#allocation97_spill] sm:$0xff] %v5706_v37  ;;  %v4582_v36 = vld [vmem:[%s4995_s27 + $0xda] sm:$0xff] }
 0x125   : > { %1127 = vrot.lane.b32.xlu1 %v5196_v42, %s4940_s8  ;;  %1125 = vrot.lane.b32.xlu0 %v5199_v43, %s4940_s8 }
 0x127   : > { %v5712_v38 = vpop.permute.xlu1 %887  ;;  %v5714_v39 = vpop.permute.xlu0 %885 }
 0x128   : > { %8194 = vst [vmem:[#allocation98_spill] sm:$0xff] %v5712_v38  ;;  %8195 = vst [vmem:[#allocation99_spill] sm:$0xff] %v5714_v39  ;;  %v4569_v38 = vld [vmem:[%s4995_s27 + $0x3a] sm:$0xff] }
 0x129   : > { %1131 = vrot.lane.b32.xlu1 %v5206_v44, %s4940_s8  ;;  %1129 = vrot.lane.b32.xlu0 %v5209_v45, %s4940_s8 }
 0x12b   : > { %v5720_v40 = vpop.permute.xlu1 %891  ;;  %v5722_v41 = vpop.permute.xlu0 %889 }
 0x12c   : > { %8196 = vst [vmem:[#allocation100_spill] sm:$0xff] %v5720_v40  ;;  %8197 = vst [vmem:[#allocation101_spill] sm:$0xff] %v5722_v41  ;;  %v8234_v41 = vld [vmem:[#allocation42_spill] sm:$0xff] }
 0x12d   : > { %1135 = vrot.lane.b32.xlu1 %v5216_v46, %s4940_s8  ;;  %1133 = vrot.lane.b32.xlu0 %v5219_v47, %s4940_s8 }
 0x12f   : > { %v5728_v42 = vpop.permute.xlu1 %895  ;;  %v5730_v43 = vpop.permute.xlu0 %893 }
 0x130   : > { %8198 = vst [vmem:[#allocation102_spill] sm:$0xff] %v5728_v42  ;;  %8199 = vst [vmem:[#allocation103_spill] sm:$0xff] %v5730_v43  ;;  %v8226_v43 = vld [vmem:[#allocation34_spill] sm:$0xff] }
 0x131   : > { %1139 = vrot.lane.b32.xlu1 %v5226_v48, %s4940_s8  ;;  %1137 = vrot.lane.b32.xlu0 %v5229_v49, %s4940_s8 }
 0x133   : > { %v5736_v44 = vpop.permute.xlu1 %899  ;;  %v5738_v45 = vpop.permute.xlu0 %897 }
 0x134   : > { %8200 = vst [vmem:[#allocation104_spill] sm:$0xff] %v5736_v44  ;;  %8201 = vst [vmem:[#allocation105_spill] sm:$0xff] %v5738_v45  ;;  %v8218_v45 = vld [vmem:[#allocation26_spill] sm:$0xff] }
 0x135   : > { %1143 = vrot.lane.b32.xlu1 %v5236_v50, %s4940_s8  ;;  %1141 = vrot.lane.b32.xlu0 %v5239_v51, %s4940_s8 }
 0x137   : > { %v5744_v46 = vpop.permute.xlu1 %903  ;;  %v5746_v47 = vpop.permute.xlu0 %901 }
 0x138   : > { %8202 = vst [vmem:[#allocation106_spill] sm:$0xff] %v5744_v46  ;;  %8203 = vst [vmem:[#allocation107_spill] sm:$0xff] %v5746_v47  ;;  %v8216_v47 = vld [vmem:[#allocation22_spill] sm:$0xff]  ;;  %v8217_v46 = vld [vmem:[#allocation23_spill] sm:$0xff] }
 0x139   : > { %1147 = vrot.lane.b32.xlu1 %v5246_v52, %s4940_s8  ;;  %1145 = vrot.lane.b32.xlu0 %v5249_v53, %s4940_s8 }
 0x13b   : > { %v5752_v48 = vpop.permute.xlu1 %907  ;;  %v5754_v49 = vpop.permute.xlu0 %905 }
 0x13c   : > { %8204 = vst [vmem:[#allocation108_spill] sm:$0xff] %v5752_v48  ;;  %8205 = vst [vmem:[#allocation109_spill] sm:$0xff] %v5754_v49  ;;  %v8215_v48 = vld [vmem:[#allocation19_spill] sm:$0xff] }
 0x13d   : > { %1151 = vrot.lane.b32.xlu1 %v5256_v54, %s4940_s8  ;;  %1149 = vrot.lane.b32.xlu0 %v5259_v55, %s4940_s8 }
 0x13f   : > { %v5760_v50 = vpop.permute.xlu1 %911  ;;  %v5762_v51 = vpop.permute.xlu0 %909 }
 0x140   : > { %8206 = vst [vmem:[#allocation110_spill] sm:$0xff] %v5760_v50  ;;  %8207 = vst [vmem:[#allocation111_spill] sm:$0xff] %v5762_v51  ;;  %v8210_v51 = vld [vmem:[#allocation5_spill] sm:$0xff] }
 0x141   : > { %1155 = vrot.lane.b32.xlu1 %v5266_v56, %s4940_s8  ;;  %1153 = vrot.lane.b32.xlu0 %v5269_v57, %s4940_s8  ;;  %v8211_v56 = vld [vmem:[#allocation6_spill] sm:$0xff] }
 0x142   : > { %v5796_v50 = vld [vmem:[%s4995_s27 + $0x182] sm:$0xff] }
 0x143   : > { %v5768_v52 = vpop.permute.xlu1 %915  ;;  %v5770_v53 = vpop.permute.xlu0 %913 }
 0x144   : > { %8208 = vst [vmem:[#allocation112_spill] sm:$0xff] %v5768_v52  ;;  %8209 = vst [vmem:[#allocation113_spill] sm:$0xff] %v5770_v53  ;;  %v8212_v53 = vld [vmem:[#allocation9_spill] sm:$0xff] }
 0x145   : > { %1159 = vrot.lane.b32.xlu1 %v5276_v58, %s4940_s8  ;;  %1157 = vrot.lane.b32.xlu0 %v5279_v59, %s4940_s8  ;;  %v8213_v58 = vld [vmem:[#allocation10_spill] sm:$0xff] }
 0x146   : > { %v5793_v59 = vld [vmem:[%s4995_s27 + $0x18a] sm:$0xff] }
 0x147   : > { %v5776_v54 = vpop.permute.xlu1 %983  ;;  %v5778_v55 = vpop.permute.xlu0 %981 }
 0x149   : > { %1163 = vrot.lane.b32.xlu1 %v8210_v51, %s4940_s8  ;;  %1161 = vrot.lane.b32.xlu0 %v8211_v56, %s4940_s8 }
 0x14b   : > { %v5784_v57 = vpop.permute.xlu1 %987  ;;  %v5786_v52 = vpop.permute.xlu0 %985 }
 0x14d   : > { %1167 = vrot.lane.b32.xlu1 %v8212_v53, %s4940_s8  ;;  %1165 = vrot.lane.b32.xlu0 %v8213_v58, %s4940_s8  ;;  %v8214_v58 = vld [vmem:[#allocation18_spill] sm:$0xff] }
 0x14f   : > { %v5798_v49 = vpop.permute.xlu1 %991  ;;  %v5800_v51 = vpop.permute.xlu0 %989 }
 0x151   : > { %1171 = vrot.lane.b32.xlu1 %v5793_v59, %s4940_s8  ;;  %1169 = vrot.lane.b32.xlu0 %v5796_v50, %s4940_s8 }
 0x153   : > { %v5806_v56 = vpop.permute.xlu1 %995  ;;  %v5808_v53 = vpop.permute.xlu0 %993 }
 0x155   : > { %1239 = vrot.lane.b32.xlu1 %v8214_v58, %s4941_s9  ;;  %1237 = vrot.lane.b32.xlu0 %v8215_v48, %s4941_s9  ;;  %v8219_v58 = vld [vmem:[#allocation27_spill] sm:$0xff] }
 0x157   : > { %v5814_v17 = vpop.permute.xlu1 %999  ;;  %v5816_v16 = vpop.permute.xlu0 %997 }
 0x159   : > { %1243 = vrot.lane.b32.xlu1 %v8216_v47, %s4941_s9  ;;  %1241 = vrot.lane.b32.xlu0 %v8217_v46, %s4941_s9  ;;  %v8223_v47 = vld [vmem:[#allocation31_spill] sm:$0xff] }
 0x15b   : > { %v5822_v15 = vpop.permute.xlu1 %1003  ;;  %v5824_v14 = vpop.permute.xlu0 %1001 }
 0x15d   : > { %1247 = vrot.lane.b32.xlu1 %v8218_v45, %s4941_s9  ;;  %1245 = vrot.lane.b32.xlu0 %v8219_v58, %s4941_s9  ;;  %v8227_v45 = vld [vmem:[#allocation35_spill] sm:$0xff] }
 0x15f   : > { %v5830_v48 = vpop.permute.xlu1 %1007  ;;  %v5832_v44 = vpop.permute.xlu0 %1005 }
 0x160   : > { %8220 = vst [vmem:[#allocation5_spill] sm:$0xff] %v5830_v48  ;;  %8221 = vst [vmem:[#allocation6_spill] sm:$0xff] %v5832_v44  ;;  %v4554_v48 = vld [vmem:[%s4995_s27 + $0x109] sm:$0xff] }
 0x161   : > { %1251 = vrot.lane.b32.xlu1 %v8222_v13, %s4941_s9  ;;  %1249 = vrot.lane.b32.xlu0 %v8223_v47, %s4941_s9  ;;  %v8231_v13 = vld [vmem:[#allocation39_spill] sm:$0xff] }
 0x163   : > { %v5838_v46 = vpop.permute.xlu1 %1011  ;;  %v5840_v12 = vpop.permute.xlu0 %1009 }
 0x164   : > { %8224 = vst [vmem:[#allocation9_spill] sm:$0xff] %v5838_v46  ;;  %8225 = vst [vmem:[#allocation10_spill] sm:$0xff] %v5840_v12  ;;  %v4572_v46 = vld [vmem:[%s4995_s27 + $0x62] sm:$0xff] }
 0x165   : > { %1255 = vrot.lane.b32.xlu1 %v8226_v43, %s4941_s9  ;;  %1253 = vrot.lane.b32.xlu0 %v8227_v45, %s4941_s9  ;;  %v8235_v43 = vld [vmem:[#allocation43_spill] sm:$0xff] }
 0x167   : > { %v5846_v58 = vpop.permute.xlu1 %1015  ;;  %v5848_v42 = vpop.permute.xlu0 %1013 }
 0x168   : > { %8228 = vst [vmem:[#allocation18_spill] sm:$0xff] %v5846_v58  ;;  %8229 = vst [vmem:[#allocation19_spill] sm:$0xff] %v5848_v42  ;;  %v4568_v58 = vld [vmem:[%s4995_s27 + $0x32] sm:$0xff] }
 0x169   : > { %1259 = vrot.lane.b32.xlu1 %v8230_v11, %s4941_s9  ;;  %1257 = vrot.lane.b32.xlu0 %v8231_v13, %s4941_s9  ;;  %v8239_v11 = vld [vmem:[#allocation47_spill] sm:$0xff] }
 0x16b   : > { %v5854_v47 = vpop.permute.xlu1 %1019  ;;  %v5856_v10 = vpop.permute.xlu0 %1017 }
 0x16c   : > { %8232 = vst [vmem:[#allocation22_spill] sm:$0xff] %v5854_v47  ;;  %8233 = vst [vmem:[#allocation23_spill] sm:$0xff] %v5856_v10  ;;  %v8242_v10 = vld [vmem:[#allocation50_spill] sm:$0xff] }
 0x16d   : > { %1263 = vrot.lane.b32.xlu1 %v8234_v41, %s4941_s9  ;;  %1261 = vrot.lane.b32.xlu0 %v8235_v43, %s4941_s9  ;;  %v8243_v41 = vld [vmem:[#allocation51_spill] sm:$0xff] }
 0x16f   : > { %v5862_v45 = vpop.permute.xlu1 %1023  ;;  %v5864_v40 = vpop.permute.xlu0 %1021 }
 0x170   : > { %8236 = vst [vmem:[#allocation26_spill] sm:$0xff] %v5862_v45  ;;  %8237 = vst [vmem:[#allocation27_spill] sm:$0xff] %v5864_v40  ;;  %v8246_v40 = vld [vmem:[#allocation54_spill] sm:$0xff] }
 0x171   : > { %1267 = vrot.lane.b32.xlu1 %v8238_v9, %s4941_s9  ;;  %1265 = vrot.lane.b32.xlu0 %v8239_v11, %s4941_s9  ;;  %v8247_v9 = vld [vmem:[#allocation55_spill] sm:$0xff] }
 0x173   : > { %v5870_v13 = vpop.permute.xlu1 %1027  ;;  %v5872_v47 = vpop.permute.xlu0 %1025 }
 0x174   : > { %8240 = vst [vmem:[#allocation30_spill] sm:$0xff] %v5870_v13  ;;  %8241 = vst [vmem:[#allocation31_spill] sm:$0xff] %v5872_v47  ;;  %v8250_v47 = vld [vmem:[#allocation58_spill] sm:$0xff] }
 0x175   : > { %1271 = vrot.lane.b32.xlu1 %v8242_v10, %s4941_s9  ;;  %1269 = vrot.lane.b32.xlu0 %v8243_v41, %s4941_s9  ;;  %v8251_v10 = vld [vmem:[#allocation59_spill] sm:$0xff] }
 0x177   : > { %v5878_v43 = vpop.permute.xlu1 %1031  ;;  %v5880_v45 = vpop.permute.xlu0 %1029 }
 0x178   : > { %8244 = vst [vmem:[#allocation34_spill] sm:$0xff] %v5878_v43  ;;  %8245 = vst [vmem:[#allocation35_spill] sm:$0xff] %v5880_v45  ;;  %v8254_v45 = vld [vmem:[#allocation62_spill] sm:$0xff] }
 0x179   : > { %1275 = vrot.lane.b32.xlu1 %v8246_v40, %s4941_s9  ;;  %1273 = vrot.lane.b32.xlu0 %v8247_v9, %s4941_s9  ;;  %v8255_v40 = vld [vmem:[#allocation63_spill] sm:$0xff] }
 0x17b   : > { %v5886_v11 = vpop.permute.xlu1 %1035  ;;  %v5888_v13 = vpop.permute.xlu0 %1033 }
 0x17c   : > { %8248 = vst [vmem:[#allocation38_spill] sm:$0xff] %v5886_v11  ;;  %8249 = vst [vmem:[#allocation39_spill] sm:$0xff] %v5888_v13  ;;  %v8258_v13 = vld [vmem:[#allocation66_spill] sm:$0xff] }
 0x17d   : > { %1279 = vrot.lane.b32.xlu1 %v8250_v47, %s4941_s9  ;;  %1277 = vrot.lane.b32.xlu0 %v8251_v10, %s4941_s9  ;;  %v8259_v47 = vld [vmem:[#allocation67_spill] sm:$0xff] }
 0x17f   : > { %v5894_v41 = vpop.permute.xlu1 %1039  ;;  %v5896_v43 = vpop.permute.xlu0 %1037 }
 0x180   : > { %8252 = vst [vmem:[#allocation42_spill] sm:$0xff] %v5894_v41  ;;  %8253 = vst [vmem:[#allocation43_spill] sm:$0xff] %v5896_v43 }
 0x181   : > { %1283 = vrot.lane.b32.xlu1 %v8254_v45, %s4941_s9  ;;  %1281 = vrot.lane.b32.xlu0 %v8255_v40, %s4941_s9  ;;  %v1853_v45 = vld [vmem:[%s8056_s2] sm:$0xff]  ;;  %v1854_v40 = vld [vmem:[%s8056_s2 + $0x8] sm:$0xff] }
 0x183   : > { %v5902_v9 = vpop.permute.xlu1 %1043  ;;  %v5904_v11 = vpop.permute.xlu0 %1041 }
 0x184   : > { %8256 = vst [vmem:[#allocation46_spill] sm:$0xff] %v5902_v9  ;;  %8257 = vst [vmem:[#allocation47_spill] sm:$0xff] %v5904_v11  ;;  %v1855_v9 = vld [vmem:[%s8056_s2 + $0x10] sm:$0xff] }
 0x185   : > { %1287 = vrot.lane.b32.xlu1 %v8258_v13, %s4941_s9  ;;  %1285 = vrot.lane.b32.xlu0 %v8259_v47, %s4941_s9  ;;  %v4860_v13 = vpack.c.bf16 %v1854_v40, %v1853_v45  ;;  %v4534_v45 = vld [vmem:[%s4995_s27 + $0x198] sm:$0xff] }
 0x187   : > { %v5910_v10 = vpop.permute.xlu1 %1111  ;;  %v5912_v43 = vpop.permute.xlu0 %1109  ;;  %4861 = vmatprep.subr.bf16.mxu0 %v4860_v13 }
 0x188   : > { %4863 = vmatpush3.bf16.msra.mxu0 %v4860_v13 }
 0x189   : > { %1291 = vrot.lane.b32.xlu1 %v5515_v32, %s4941_s9  ;;  %1289 = vrot.lane.b32.xlu0 %v5518_v60, %s4941_s9  ;;  %v1856_v60 = vld [vmem:[%s8056_s2 + $0x18] sm:$0xff]  ;;  %v4535_v32 = vld [vmem:[%s4995_s27 + $0x1a0] sm:$0xff] }
 0x18a   : > { %v4864_v40 = vpack.c.bf16 %v1856_v60, %v1855_v9 }
 0x18b   : > { %v5924_v47 = vpop.permute.xlu1 %1115  ;;  %v5926_v11 = vpop.permute.xlu0 %1113 }
 0x18c   : > { %4865 = vmatprep.subr.bf16.mxu0 %v4864_v40 }
 0x18d   : > { %1295 = vrot.lane.b32.xlu1 %v5525_v61, %s4941_s9  ;;  %1293 = vrot.lane.b32.xlu0 %v5528_v1, %s4941_s9  ;;  %v4537_v61 = vld [vmem:[%s4995_s27 + $0x39] sm:$0xff]  ;;  %v4536_v1 = vld [vmem:[%s4995_s27 + $0x31] sm:$0xff] }
 0x18e   : > { %4867 = vmatpush3.bf16.msra.mxu0 %v4864_v40 }
 0x18f   : > { %v5940_v41 = vpop.permute.xlu1 %1119  ;;  %v5942_v13 = vpop.permute.xlu0 %1117  ;;  %4752 = vmatprep.subr.msk.mxu0 %vm1962_vm0, %v1857_v8 }
 0x191   : > { %1299 = vrot.lane.b32.xlu1 %v4535_v32, %s4941_s9  ;;  %1297 = vrot.lane.b32.xlu0 %v4534_v45, %s4941_s9  ;;  %v4539_v32 = vld [vmem:[%s4995_s27 + $0x51] sm:$0xff]  ;;  %v4538_v45 = vld [vmem:[%s4995_s27 + $0x49] sm:$0xff] }
 0x192   : > { %4753 = vmatpush3.msk.msra.mxu0 %vm1962_vm0, %v1857_v8  ;;  %v4570_v8 = vld [vmem:[%s4995_s27 + $0x4a] sm:$0xff] }
 0x193   : > { %v5951_v9 = vpop.permute.xlu1 %1123  ;;  %v5953_v60 = vpop.permute.xlu0 %1121 }
 0x195   : > { %1367 = vrot.lane.b32.xlu1 %v4537_v61, %s4942_s20  ;;  %1365 = vrot.lane.b32.xlu0 %v4536_v1, %s4942_s20  ;;  %v4540_v61 = vld [vmem:[%s4995_s27 + $0x61] sm:$0xff] }
 0x197   : > { %v5961_v40 = vpop.permute.xlu1 %1127  ;;  %v5963_v42 = vpop.permute.xlu0 %1125 }
 0x199   : > { %1371 = vrot.lane.b32.xlu1 %v4539_v32, %s4942_s20  ;;  %1369 = vrot.lane.b32.xlu0 %v4538_v45, %s4942_s20  ;;  %v4541_v45 = vld [vmem:[%s4995_s27 + $0x69] sm:$0xff] }
 0x19b   : > { %v5969_v39 = vpop.permute.xlu1 %1131  ;;  %v5971_v1 = vpop.permute.xlu0 %1129 }
 0x19c   : > { %8260 = vst [vmem:[#allocation50_spill] sm:$0xff] %v5969_v39  ;;  %8261 = vst [vmem:[#allocation51_spill] sm:$0xff] %v5971_v1 }
 0x19d   : > { %1493 = vrot.lane.b32.xlu1 %v4568_v58, %s4943_s23  ;;  %1373 = vrot.lane.b32.xlu0 %v4540_v61, %s4942_s20  ;;  %v4573_v61 = vld [vmem:[%s4995_s27 + $0x6a] sm:$0xff] }
 0x19f   : > { %v5977_v7 = vpop.permute.xlu1 %1135  ;;  %v5979_v32 = vpop.permute.xlu0 %1133 }
 0x1a0   : > { %8262 = vst [vmem:[#allocation54_spill] sm:$0xff] %v5977_v7  ;;  %8263 = vst [vmem:[#allocation55_spill] sm:$0xff] %v5979_v32  ;;  %v4584_v7 = vld [vmem:[%s4995_s27 + $0xf2] sm:$0xff] }
 0x1a1   : > { %1497 = vrot.lane.b32.xlu1 %v4570_v8, %s4943_s23  ;;  %1495 = vrot.lane.b32.xlu0 %v4569_v38, %s4943_s23  ;;  %v4543_v38 = vld [vmem:[%s4995_s27 + $0x81] sm:$0xff] }
 0x1a3   : > { %v5985_v12 = vpop.permute.xlu1 %1139  ;;  %v5987_v58 = vpop.permute.xlu0 %1137 }
 0x1a4   : > { %8264 = vst [vmem:[#allocation58_spill] sm:$0xff] %v5985_v12  ;;  %8265 = vst [vmem:[#allocation59_spill] sm:$0xff] %v5987_v58  ;;  %v4542_v12 = vld [vmem:[%s4995_s27 + $0x79] sm:$0xff] }
 0x1a5   : > { %1375 = vrot.lane.b32.xlu1 %v4541_v45, %s4942_s20  ;;  %1499 = vrot.lane.b32.xlu0 %v4571_v6, %s4943_s23  ;;  %v4575_v6 = vld [vmem:[%s4995_s27 + $0x82] sm:$0xff] }
 0x1a7   : > { %v5993_v37 = vpop.permute.xlu1 %1143  ;;  %v5995_v8 = vpop.permute.xlu0 %1141 }
 0x1a8   : > { %8266 = vst [vmem:[#allocation62_spill] sm:$0xff] %v5993_v37  ;;  %8267 = vst [vmem:[#allocation63_spill] sm:$0xff] %v5995_v8  ;;  %v4574_v37 = vld [vmem:[%s4995_s27 + $0x7a] sm:$0xff] }
 0x1a9   : > { %1503 = vrot.lane.b32.xlu1 %v4573_v61, %s4943_s23  ;;  %1501 = vrot.lane.b32.xlu0 %v4572_v46, %s4943_s23  ;;  %v4545_v46 = vld [vmem:[%s4995_s27 + $0x99] sm:$0xff] }
 0x1ab   : > { %v6001_v58 = vpop.permute.xlu1 %1147  ;;  %v6003_v45 = vpop.permute.xlu0 %1145 }
 0x1ac   : > { %8268 = vst [vmem:[#allocation66_spill] sm:$0xff] %v6001_v58  ;;  %8269 = vst [vmem:[#allocation67_spill] sm:$0xff] %v6003_v45  ;;  %v4544_v58 = vld [vmem:[%s4995_s27 + $0x91] sm:$0xff] }
 0x1ad   : > { %1379 = vrot.lane.b32.xlu1 %v4543_v38, %s4942_s20  ;;  %1377 = vrot.lane.b32.xlu0 %v4542_v12, %s4942_s20  ;;  %v4577_v12 = vld [vmem:[%s4995_s27 + $0x9a] sm:$0xff] }
 0x1af   : > { %v6009_v8 = vpop.permute.xlu1 %1151  ;;  %v6011_v61 = vpop.permute.xlu0 %1149 }
 0x1b0   : > { %8270 = vst [vmem:[#allocation114_spill] sm:$0xff] %v6009_v8  ;;  %8271 = vst [vmem:[#allocation115_spill] sm:$0xff] %v6011_v61  ;;  %v4576_v8 = vld [vmem:[%s4995_s27 + $0x92] sm:$0xff] }
 0x1b1   : > { %1507 = vrot.lane.b32.xlu1 %v4575_v6, %s4943_s23  ;;  %1505 = vrot.lane.b32.xlu0 %v4574_v37, %s4943_s23  ;;  %v4547_v37 = vld [vmem:[%s4995_s27 + $0xb1] sm:$0xff] }
 0x1b3   : > { %v6017_v45 = vpop.permute.xlu1 %1155  ;;  %v6019_v38 = vpop.permute.xlu0 %1153 }
 0x1b4   : > { %8272 = vst [vmem:[#allocation116_spill] sm:$0xff] %v6017_v45  ;;  %8273 = vst [vmem:[#allocation117_spill] sm:$0xff] %v6019_v38  ;;  %v4546_v45 = vld [vmem:[%s4995_s27 + $0xa9] sm:$0xff] }
 0x1b5   : > { %1383 = vrot.lane.b32.xlu1 %v4545_v46, %s4942_s20  ;;  %1381 = vrot.lane.b32.xlu0 %v4544_v58, %s4942_s20  ;;  %v4579_v58 = vld [vmem:[%s4995_s27 + $0xb2] sm:$0xff] }
 0x1b7   : > { %v6025_v61 = vpop.permute.xlu1 %1159  ;;  %v6027_v6 = vpop.permute.xlu0 %1157 }
 0x1b8   : > { %8274 = vst [vmem:[#allocation118_spill] sm:$0xff] %v6025_v61  ;;  %8275 = vst [vmem:[#allocation119_spill] sm:$0xff] %v6027_v6  ;;  %v4578_v61 = vld [vmem:[%s4995_s27 + $0xaa] sm:$0xff] }
 0x1b9   : > { %1511 = vrot.lane.b32.xlu1 %v4577_v12, %s4943_s23  ;;  %1509 = vrot.lane.b32.xlu0 %v4576_v8, %s4943_s23  ;;  %v4549_v8 = vld [vmem:[%s4995_s27 + $0xc9] sm:$0xff] }
 0x1bb   : > { %v6033_v38 = vpop.permute.xlu1 %1163  ;;  %v6035_v46 = vpop.permute.xlu0 %1161 }
 0x1bc   : > { %8276 = vst [vmem:[#allocation120_spill] sm:$0xff] %v6033_v38  ;;  %8277 = vst [vmem:[#allocation121_spill] sm:$0xff] %v6035_v46  ;;  %v4548_v38 = vld [vmem:[%s4995_s27 + $0xc1] sm:$0xff] }
 0x1bd   : > { %1387 = vrot.lane.b32.xlu1 %v4547_v37, %s4942_s20  ;;  %1385 = vrot.lane.b32.xlu0 %v4546_v45, %s4942_s20  ;;  %v4581_v45 = vld [vmem:[%s4995_s27 + $0xca] sm:$0xff] }
 0x1bf   : > { %v6041_v6 = vpop.permute.xlu1 %1167  ;;  %v6043_v12 = vpop.permute.xlu0 %1165 }
 0x1c0   : > { %8278 = vst [vmem:[#allocation122_spill] sm:$0xff] %v6041_v6  ;;  %8279 = vst [vmem:[#allocation123_spill] sm:$0xff] %v6043_v12  ;;  %v4580_v6 = vld [vmem:[%s4995_s27 + $0xc2] sm:$0xff] }
 0x1c1   : > { %1515 = vrot.lane.b32.xlu1 %v4579_v58, %s4943_s23  ;;  %1513 = vrot.lane.b32.xlu0 %v4578_v61, %s4943_s23  ;;  %v4551_v61 = vld [vmem:[%s4995_s27 + $0xe1] sm:$0xff] }
 0x1c3   : > { %v6049_v46 = vpop.permute.xlu1 %1171  ;;  %v6051_v37 = vpop.permute.xlu0 %1169 }
 0x1c4   : > { %8280 = vst [vmem:[#allocation124_spill] sm:$0xff] %v6049_v46  ;;  %8281 = vst [vmem:[#allocation125_spill] sm:$0xff] %v6051_v37  ;;  %v4550_v46 = vld [vmem:[%s4995_s27 + $0xd9] sm:$0xff] }
 0x1c5   : > { %1391 = vrot.lane.b32.xlu1 %v4549_v8, %s4942_s20  ;;  %1389 = vrot.lane.b32.xlu0 %v4548_v38, %s4942_s20  ;;  %v4583_v38 = vld [vmem:[%s4995_s27 + $0xe2] sm:$0xff] }
 0x1c7   : > { %v6057_v12 = vpop.permute.xlu1 %1239  ;;  %v6059_v58 = vpop.permute.xlu0 %1237 }
 0x1c9   : > { %1519 = vrot.lane.b32.xlu1 %v4581_v45, %s4943_s23  ;;  %1517 = vrot.lane.b32.xlu0 %v4580_v6, %s4943_s23  ;;  %v4553_v6 = vld [vmem:[%s4995_s27 + $0xf9] sm:$0xff] }
 0x1cb   : > { %v6065_v37 = vpop.permute.xlu1 %1243  ;;  %v6067_v8 = vpop.permute.xlu0 %1241 }
 0x1cd   : > { %1395 = vrot.lane.b32.xlu1 %v4551_v61, %s4942_s20  ;;  %1393 = vrot.lane.b32.xlu0 %v4550_v46, %s4942_s20  ;;  %v4585_v46 = vld [vmem:[%s4995_s27 + $0xfa] sm:$0xff] }
 0x1cf   : > { %v6073_v5 = vpop.permute.xlu1 %1247  ;;  %v6075_v45 = vpop.permute.xlu0 %1245 }
 0x1d1   : > { %1523 = vrot.lane.b32.xlu1 %v4583_v38, %s4943_s23  ;;  %1521 = vrot.lane.b32.xlu0 %v4582_v36, %s4943_s23  ;;  %v4555_v36 = vld [vmem:[%s4995_s27 + $0x111] sm:$0xff] }
 0x1d3   : > { %v6081_v32 = vpop.permute.xlu1 %1251  ;;  %v6083_v61 = vpop.permute.xlu0 %1249 }
 0x1d5   : > { %1399 = vrot.lane.b32.xlu1 %v4553_v6, %s4942_s20  ;;  %1397 = vrot.lane.b32.xlu0 %v4552_v4, %s4942_s20  ;;  %v4587_v4 = vld [vmem:[%s4995_s27 + $0x112] sm:$0xff] }
 0x1d7   : > { %v6089_v44 = vpop.permute.xlu1 %1255  ;;  %v6091_v38 = vpop.permute.xlu0 %1253 }
 0x1d9   : > { %1527 = vrot.lane.b32.xlu1 %v4585_v46, %s4943_s23  ;;  %1525 = vrot.lane.b32.xlu0 %v4584_v7, %s4943_s23  ;;  %v4557_v7 = vld [vmem:[%s4995_s27 + $0x129] sm:$0xff] }
 0x1db   : > { %v6097_v35 = vpop.permute.xlu1 %1259  ;;  %v6099_v6 = vpop.permute.xlu0 %1257 }
 0x1dc   : > { %8282 = vst [vmem:[#allocation126_spill] sm:$0xff] %v6097_v35  ;;  %8283 = vst [vmem:[#allocation127_spill] sm:$0xff] %v6099_v6 }
 0x1dd   : > { %1403 = vrot.lane.b32.xlu1 %v4555_v36, %s4942_s20  ;;  %1401 = vrot.lane.b32.xlu0 %v4554_v48, %s4942_s20  ;;  %v4589_v48 = vld [vmem:[%s4995_s27 + $0x12a] sm:$0xff] }
 0x1df   : > { %v6105_v2 = vpop.permute.xlu1 %1263  ;;  %v6107_v46 = vpop.permute.xlu0 %1261 }
 0x1e0   : > { %8284 = vst [vmem:[#allocation128_spill] sm:$0xff] %v6105_v2  ;;  %8285 = vst [vmem:[#allocation129_spill] sm:$0xff] %v6107_v46  ;;  %v4588_v2 = vld [vmem:[%s4995_s27 + $0x122] sm:$0xff] }
 0x1e1   : > { %1531 = vrot.lane.b32.xlu1 %v4587_v4, %s4943_s23  ;;  %1529 = vrot.lane.b32.xlu0 %v4586_v34, %s4943_s23  ;;  %v4559_v34 = vld [vmem:[%s4995_s27 + $0x141] sm:$0xff] }
 0x1e3   : > { %v6113_v6 = vpop.permute.xlu1 %1267  ;;  %v6115_v36 = vpop.permute.xlu0 %1265 }
 0x1e4   : > { %8286 = vst [vmem:[#allocation130_spill] sm:$0xff] %v6113_v6  ;;  %8287 = vst [vmem:[#allocation131_spill] sm:$0xff] %v6115_v36  ;;  %v4558_v6 = vld [vmem:[%s4995_s27 + $0x139] sm:$0xff] }
 0x1e5   : > { %1407 = vrot.lane.b32.xlu1 %v4557_v7, %s4942_s20  ;;  %1405 = vrot.lane.b32.xlu0 %v4556_v0, %s4942_s20  ;;  %v4591_v0 = vld [vmem:[%s4995_s27 + $0x142] sm:$0xff] }
 0x1e7   : > { %v6121_v46 = vpop.permute.xlu1 %1271  ;;  %v6123_v4 = vpop.permute.xlu0 %1269 }
 0x1e8   : > { %8288 = vst [vmem:[#allocation132_spill] sm:$0xff] %v6121_v46  ;;  %8289 = vst [vmem:[#allocation133_spill] sm:$0xff] %v6123_v4  ;;  %v4590_v46 = vld [vmem:[%s4995_s27 + $0x13a] sm:$0xff] }
 0x1e9   : > { %1535 = vrot.lane.b32.xlu1 %v4589_v48, %s4943_s23  ;;  %1533 = vrot.lane.b32.xlu0 %v4588_v2, %s4943_s23  ;;  %v4561_v2 = vld [vmem:[%s4995_s27 + $0x159] sm:$0xff] }
 0x1eb   : > { %v6129_v36 = vpop.permute.xlu1 %1275  ;;  %v6131_v7 = vpop.permute.xlu0 %1273 }
 0x1ec   : > { %8290 = vst [vmem:[#allocation134_spill] sm:$0xff] %v6129_v36  ;;  %8291 = vst [vmem:[#allocation135_spill] sm:$0xff] %v6131_v7  ;;  %v4560_v36 = vld [vmem:[%s4995_s27 + $0x151] sm:$0xff] }
 0x1ed   : > { %1411 = vrot.lane.b32.xlu1 %v4559_v34, %s4942_s20  ;;  %1409 = vrot.lane.b32.xlu0 %v4558_v6, %s4942_s20  ;;  %v4593_v6 = vld [vmem:[%s4995_s27 + $0x15a] sm:$0xff] }
 0x1ef   : > { %v6137_v4 = vpop.permute.xlu1 %1279  ;;  %v6139_v48 = vpop.permute.xlu0 %1277 }
 0x1f0   : > { %8292 = vst [vmem:[#allocation136_spill] sm:$0xff] %v6137_v4  ;;  %8293 = vst [vmem:[#allocation137_spill] sm:$0xff] %v6139_v48  ;;  %v4592_v4 = vld [vmem:[%s4995_s27 + $0x152] sm:$0xff] }
 0x1f1   : > { %1539 = vrot.lane.b32.xlu1 %v4591_v0, %s4943_s23  ;;  %1537 = vrot.lane.b32.xlu0 %v4590_v46, %s4943_s23  ;;  %v4563_v46 = vld [vmem:[%s4995_s27 + $0x171] sm:$0xff]  ;;  %v4562_v0 = vld [vmem:[%s4995_s27 + $0x169] sm:$0xff] }
 0x1f3   : > { %v6145_v7 = vpop.permute.xlu1 %1283  ;;  %v6147_v34 = vpop.permute.xlu0 %1281 }
 0x1f4   : > { %8294 = vst [vmem:[#allocation138_spill] sm:$0xff] %v6145_v7  ;;  %8295 = vst [vmem:[#allocation139_spill] sm:$0xff] %v6147_v34 }
 0x1f5   : > { %1415 = vrot.lane.b32.xlu1 %v4561_v2, %s4942_s20  ;;  %1413 = vrot.lane.b32.xlu0 %v4560_v36, %s4942_s20  ;;  %v4595_v36 = vld [vmem:[%s4995_s27 + $0x172] sm:$0xff]  ;;  %v4594_v2 = vld [vmem:[%s4995_s27 + $0x16a] sm:$0xff] }
 0x1f7   : > { %v6153_v48 = vpop.permute.xlu1 %1287  ;;  %v6155_v35 = vpop.permute.xlu0 %1285 }
 0x1f8   : > { %8296 = vst [vmem:[#allocation140_spill] sm:$0xff] %v6153_v48  ;;  %8297 = vst [vmem:[#allocation141_spill] sm:$0xff] %v6155_v35 }
 0x1f9   : > { %1543 = vrot.lane.b32.xlu1 %v4593_v6, %s4943_s23  ;;  %1541 = vrot.lane.b32.xlu0 %v4592_v4, %s4943_s23 }
 0x1fb   : > { %v6161_v7 = vpop.permute.xlu1 %1291  ;;  %v6163_v34 = vpop.permute.xlu0 %1289 }
 0x1fc   : > { %8298 = vst [vmem:[#allocation142_spill] sm:$0xff] %v6161_v7  ;;  %8299 = vst [vmem:[#allocation143_spill] sm:$0xff] %v6163_v34  ;;  %v8307_v7 = vld [vmem:[#allocation15_spill] sm:$0xff] }
 0x1fd   : > { %1419 = vrot.lane.b32.xlu1 %v4563_v46, %s4942_s20  ;;  %1417 = vrot.lane.b32.xlu0 %v4562_v0, %s4942_s20  ;;  %v275_v46 = vld [vmem:[%s4995_s27] sm:$0xff] }
 0x1ff   : > { %v6169_v48 = vpop.permute.xlu1 %1295  ;;  %v6171_v35 = vpop.permute.xlu0 %1293 }
 0x200   : > { %8300 = vst [vmem:[#allocation144_spill] sm:$0xff] %v6169_v48  ;;  %8301 = vst [vmem:[#allocation145_spill] sm:$0xff] %v6171_v35  ;;  %v8304_v35 = vld [vmem:[#allocation4_spill] sm:$0xff] }
 0x201   : > { %1547 = vrot.lane.b32.xlu1 %v4595_v36, %s4943_s23  ;;  %1545 = vrot.lane.b32.xlu0 %v4594_v2, %s4943_s23  ;;  %v1590_v2 = vsel %vm1589_vm1, %v275_v46, %v8304_v35  ;;  %v4566_v48 = vld [vmem:[%s4995_s27 + $0x199] sm:$0xff] }
 0x203   : > { %v6175_v4 = vpop.permute.xlu1 %1299  ;;  %v6177_v6 = vpop.permute.xlu0 %1297 }
 0x204   : > { %8302 = vst [vmem:[#allocation146_spill] sm:$0xff] %v6175_v4  ;;  %8303 = vst [vmem:[#allocation147_spill] sm:$0xff] %v6177_v6  ;;  %v8305_v6 = vld [vmem:[#allocation65_spill] sm:$0xff] }
 0x205   : > { %1423 = vrot.lane.b32.xlu1 %v5659_v26, %s4942_s20  ;;  %1421 = vrot.lane.b32.xlu0 %v5662_v27, %s4942_s20  ;;  %v276_v26 = vld [vmem:[%s4995_s27 + $0x8] sm:$0xff]  ;;  %v1623_v27 = vsel %vm1622_vm2, %v1590_v2, %v8305_v6  ;;  %v8308_v6 = vld [vmem:[#allocation8_spill] sm:$0xff] }
 0x206   : > { %v4567_v4 = vld [vmem:[%s4995_s27 + $0x1a1] sm:$0xff]  ;;  %v1656_v34 = vsel %vm1655_vm3, %v1623_v27, %v5644_v23  ;;  %v1591_v2 = vsel %vm1589_vm1, %v276_v26, %v8308_v6  ;;  %v8309_v23 = vld [vmem:[#allocation64_spill] sm:$0xff] }
 0x207   : > { %v1368_v0 = vpop.permute.xlu1 %1367  ;;  %v1366_v36 = vpop.permute.xlu0 %1365  ;;  %v4598_v26 = vld [vmem:[%s4995_s27 + $0x19a] sm:$0xff] }
 0x209   : > { %1551 = vrot.lane.b32.xlu1 %v5793_v59, %s4943_s23  ;;  %1549 = vrot.lane.b32.xlu0 %v5796_v50, %s4943_s23  ;;  %v1689_v59 = vsel %vm1688_vm4, %v1656_v34, %v5778_v55  ;;  %v8306_v50 = vld [vmem:[#allocation3_spill] sm:$0xff]  ;;  %v1624_v55 = vsel %vm1622_vm2, %v1591_v2, %v8309_v23  ;;  %v8310_v34 = vld [vmem:[#allocation69_spill] sm:$0xff] }
 0x20a   : > { %v1592_v1 = vsel %vm1589_vm1, %v8307_v7, %v8306_v50  ;;  %v1722_v39 = vsel %vm1721_vm5, %v1689_v59, %v5912_v43  ;;  %v4599_v50 = vld [vmem:[%s4995_s27 + $0x1a2] sm:$0xff]  ;;  %v1657_v43 = vsel %vm1655_vm3, %v1624_v55, %v5642_v22  ;;  %v8311_v23 = vld [vmem:[#allocation7_spill] sm:$0xff] }
 0x20b   : > { %v1372_v35 = vpop.permute.xlu1 %1371  ;;  %v1370_v46 = vpop.permute.xlu0 %1369  ;;  %v1625_v27 = vsel %vm1622_vm2, %v1592_v1, %v8310_v34  ;;  %v1755_v7 = vsel %vm1754_vm6, %v1722_v39, %v6059_v58  ;;  %v1690_v2 = vsel %vm1688_vm4, %v1657_v43, %v5776_v54  ;;  %v4894_v58 = vld [vmem:[%s4995_s27 + $0x20] sm:$0xff]  ;;  %v8312_v54 = vld [vmem:[#allocation68_spill] sm:$0xff] }
 0x20c   : > { %v1593_v22 = vsel %vm1589_vm1, %v4894_v58, %v8311_v23 }
 0x20d   : > { %1427 = vrot.lane.b32.xlu1 %v4567_v4, %s4942_s20  ;;  %1425 = vrot.lane.b32.xlu0 %v4566_v48, %s4942_s20  ;;  %v1658_v4 = vsel %vm1655_vm3, %v1625_v27, %v5652_v25  ;;  %v1788_v48 = vsel %vm1787_vm7, %v1755_v7, %v1366_v36  ;;  %v1723_v25 = vsel %vm1721_vm5, %v1690_v2, %v5910_v10  ;;  %v8314_v2 = vld [vmem:[#allocation12_spill] sm:$0xff] }
 0x20e   : > { %v1691_v1 = vsel %vm1688_vm4, %v1658_v4, %v5786_v52  ;;  %v1626_v52 = vsel %vm1622_vm2, %v1593_v22, %v8312_v54  ;;  %v1756_v55 = vsel %vm1754_vm6, %v1723_v25, %v6057_v12  ;;  %v4895_v4 = vld [vmem:[%s4995_s27 + $0x38] sm:$0xff] }
 0x20f   : > { %v1494_v59 = vpop.permute.xlu1 %1493  ;;  %v1374_v6 = vpop.permute.xlu0 %1373  ;;  %v1724_v36 = vsel %vm1721_vm5, %v1691_v1, %v5926_v11  ;;  %v1659_v10 = vsel %vm1655_vm3, %v1626_v52, %v5650_v24  ;;  %v1789_v11 = vsel %vm1787_vm7, %v1756_v55, %v1368_v0  ;;  %v8316_v1 = vld [vmem:[#allocation71_spill] sm:$0xff] }
 0x210   : > { %v1821_v39 = vsel %vm1820_vm8, %v1788_v48, %v1494_v59  ;;  %v1757_v34 = vsel %vm1754_vm6, %v1724_v36, %v6067_v8  ;;  %v8313_v8 = vld [vmem:[#allocation11_spill] sm:$0xff] }
 0x211   : > { %1555 = vrot.lane.b32.xlu1 %v4599_v50, %s4943_s23  ;;  %1553 = vrot.lane.b32.xlu0 %v4598_v26, %s4943_s23  ;;  %v1790_v27 = vsel %vm1787_vm7, %v1757_v34, %v1370_v46  ;;  %v1692_v26 = vsel %vm1688_vm4, %v1659_v10, %v5784_v57  ;;  %v1595_v48 = vsel %vm1589_vm1, %v4895_v4, %v8313_v8  ;;  %v4896_v59 = vld [vmem:[%s4995_s27 + $0x30] sm:$0xff]  ;;  %v8315_v46 = vld [vmem:[#allocation70_spill] sm:$0xff] }
 0x212   : > { %4754 = vmatprep.mubr.msk.f32.mxu0 %vm1865_vm9, %v1821_v39  ;;  %v1594_v24 = vsel %vm1589_vm1, %v4896_v59, %v8314_v2  ;;  %v1725_v0 = vsel %vm1721_vm5, %v1692_v26, %v5924_v47  ;;  %v1628_v57 = vsel %vm1622_vm2, %v1595_v48, %v8315_v46  ;;  %v8318_v26 = vld [vmem:[#allocation14_spill] sm:$0xff] }
 0x213   : > { %v1498_v7 = vpop.permute.xlu1 %1497  ;;  %v1496_v50 = vpop.permute.xlu0 %1495  ;;  %v1627_v39 = vsel %vm1622_vm2, %v1594_v24, %v8316_v1  ;;  %v1758_v58 = vsel %vm1754_vm6, %v1725_v0, %v6065_v37  ;;  %v1661_v23 = vsel %vm1655_vm3, %v1628_v57, %v5664_v21 }
 0x214   : > { %v1823_v43 = vsel %vm1820_vm8, %v1790_v27, %v1498_v7  ;;  %v1822_v12 = vsel %vm1820_vm8, %v1789_v11, %v1496_v50  ;;  %v1660_v22 = vsel %vm1655_vm3, %v1627_v39, %v5666_v28  ;;  %v1791_v47 = vsel %vm1787_vm7, %v1758_v58, %v1372_v35  ;;  %v4897_v27 = vld [vmem:[%s4995_s27 + $0x50] sm:$0xff]  ;;  %v4898_v50 = vld [vmem:[%s4995_s27 + $0x48] sm:$0xff] }
 0x215   : > { %4755 = vmatmul.mubr.msk.f32.vlgmr.msra.gmra.mrb[0].mxu0 %vm1865_vm9, %v1822_v12  ;;  %v1694_v54 = vsel %vm1688_vm4, %v1661_v23, %v5798_v49  ;;  %v1693_v37 = vsel %vm1688_vm4, %v1660_v22, %v5800_v51  ;;  %v8321_v23 = vld [vmem:[#allocation16_spill] sm:$0xff]  ;;  %v4900_v22 = vld [vmem:[%s4995_s27 + $0x60] sm:$0xff] }
 0x216   : > { %4757 = vmatprep.mubr.msk.f32.mxu0 %vm1865_vm9, %v1823_v43  ;;  %v1727_v21 = vsel %vm1721_vm5, %v1694_v54, %v5940_v41  ;;  %v1726_v28 = vsel %vm1721_vm5, %v1693_v37, %v5942_v13  ;;  %v8317_v13 = vld [vmem:[#allocation13_spill] sm:$0xff] }
 0x217   : > { %v1376_v25 = vpop.permute.xlu1 %1375  ;;  %v1500_v36 = vpop.permute.xlu0 %1499  ;;  %v1760_v35 = vsel %vm1754_vm6, %v1727_v21, %v6073_v5  ;;  %v1759_v49 = vsel %vm1754_vm6, %v1726_v28, %v6075_v45  ;;  %v1597_v7 = vsel %vm1589_vm1, %v4897_v27, %v8317_v13  ;;  %v1596_v5 = vsel %vm1589_vm1, %v4898_v50, %v8318_v26  ;;  %v8319_v45 = vld [vmem:[#allocation72_spill] sm:$0xff]  ;;  %v8320_v43 = vld [vmem:[#allocation73_spill] sm:$0xff] }
 0x218   : > { %v1824_v52 = vsel %vm1820_vm8, %v1791_v47, %v1500_v36  ;;  %v1792_v55 = vsel %vm1787_vm7, %v1759_v49, %v1374_v6  ;;  %v1793_v51 = vsel %vm1787_vm7, %v1760_v35, %v1376_v25  ;;  %v1630_v6 = vsel %vm1622_vm2, %v1597_v7, %v8319_v45  ;;  %v8322_v47 = vld [vmem:[#allocation17_spill] sm:$0xff]  ;;  %v8326_v45 = vld [vmem:[#allocation51_spill] sm:$0xff] }
 0x219   : > { %4758 = vmatmul.mubr.msk.f32.gmra.mrb[2].mxu0 %vm1865_vm9, %v1824_v52  ;;  %v1629_v12 = vsel %vm1622_vm2, %v1596_v5, %v8320_v43  ;;  %v1663_v4 = vsel %vm1655_vm3, %v1630_v6, %v5672_v29  ;;  %v8325_v5 = vld [vmem:[#allocation50_spill] sm:$0xff] }
 0x21a   : > { %v1662_v8 = vsel %vm1655_vm3, %v1629_v12, %v5674_v30  ;;  %v1696_v2 = vsel %vm1688_vm4, %v1663_v4, %v5806_v56  ;;  %v8328_v12 = vld [vmem:[#allocation127_spill] sm:$0xff] }
 0x21b   : > { %v1504_v34 = vpop.permute.xlu1 %1503  ;;  %v1502_v10 = vpop.permute.xlu0 %1501  ;;  %v1695_v24 = vsel %vm1688_vm4, %v1662_v8, %v5808_v53  ;;  %v1729_v0 = vsel %vm1721_vm5, %v1696_v2, %v5951_v9  ;;  %v4899_v9 = vld [vmem:[%s4995_s27 + $0x68] sm:$0xff]  ;;  %v4903_v2 = vld [vmem:[%s4995_s27 + $0x98] sm:$0xff] }
 0x21c   : > { %v1826_v11 = vsel %vm1820_vm8, %v1793_v51, %v1504_v34  ;;  %v1825_v41 = vsel %vm1820_vm8, %v1792_v55, %v1502_v10  ;;  %v1728_v46 = vsel %vm1721_vm5, %v1695_v24, %v5953_v60  ;;  %v1762_v29 = vsel %vm1754_vm6, %v1729_v0, %v6081_v32  ;;  %v8323_v34 = vld [vmem:[#allocation20_spill] sm:$0xff] }
 0x21d   : > { %4760 = vmatprep.mubr.msk.f32.mxu0 %vm1865_vm9, %v1825_v41  ;;  %v1761_v30 = vsel %vm1754_vm6, %v1728_v46, %v6083_v61  ;;  %v1599_v60 = vsel %vm1589_vm1, %v4899_v9, %v8321_v23  ;;  %v1598_v32 = vsel %vm1589_vm1, %v4900_v22, %v8322_v47  ;;  %v4902_v10 = vld [vmem:[%s4995_s27 + $0x78] sm:$0xff]  ;;  %v4904_v46 = vld [vmem:[%s4995_s27 + $0x90] sm:$0xff]  ;;  %v8335_v47 = vld [vmem:[#allocation5_spill] sm:$0xff] }
 0x21e   : > { %4761 = vmatmul.mubr.msk.f32.gmra.mrb[4].mxu0 %vm1865_vm9, %v1826_v11  ;;  %v1632_v61 = vsel %vm1622_vm2, %v1599_v60, %v5546_v33  ;;  %v1631_v25 = vsel %vm1622_vm2, %v1598_v32, %v5548_v62  ;;  %v8324_v11 = vld [vmem:[#allocation21_spill] sm:$0xff]  ;;  %v8329_v24 = vld [vmem:[#allocation24_spill] sm:$0xff]  ;;  %v8334_v9 = vld [vmem:[#allocation95_spill] sm:$0xff] }
 0x21f   : > { %v1380_v48 = vpop.permute.xlu1 %1379  ;;  %v1378_v59 = vpop.permute.xlu0 %1377  ;;  %v1665_v36 = vsel %vm1655_vm3, %v1632_v61, %v5680_v31  ;;  %v1664_v54 = vsel %vm1655_vm3, %v1631_v25, %v5682_v20  ;;  %v1603_v0 = vsel %vm1589_vm1, %v4903_v2, %v8329_v24  ;;  %v8336_v61 = vld [vmem:[#allocation6_spill] sm:$0xff] }
 0x220   : > { %v1795_v57 = vsel %vm1787_vm7, %v1762_v29, %v1380_v48  ;;  %v1794_v1 = vsel %vm1787_vm7, %v1761_v30, %v1378_v59  ;;  %v1698_v21 = vsel %vm1688_vm4, %v1665_v36, %v5814_v17  ;;  %v1697_v33 = vsel %vm1688_vm4, %v1664_v54, %v5816_v16  ;;  %v8330_v29 = vld [vmem:[#allocation25_spill] sm:$0xff]  ;;  %v8337_v36 = vld [vmem:[#allocation54_spill] sm:$0xff] }
 0x221   : > { %v1731_v62 = vsel %vm1721_vm5, %v1698_v21, %v5961_v40  ;;  %v1730_v28 = vsel %vm1721_vm5, %v1697_v33, %v5963_v42  ;;  %v4901_v40 = vld [vmem:[%s4995_s27 + $0x80] sm:$0xff]  ;;  %v1602_v30 = vsel %vm1589_vm1, %v4904_v46, %v8330_v29  ;;  %v8339_v21 = vld [vmem:[#allocation128_spill] sm:$0xff]  ;;  %v4907_v29 = vld [vmem:[%s4995_s27 + $0xc8] sm:$0xff] }
 0x222   : > { %v1764_v31 = vsel %vm1754_vm6, %v1731_v62, %v6089_v44  ;;  %v1763_v20 = vsel %vm1754_vm6, %v1730_v28, %v6091_v38  ;;  %v1601_v42 = vsel %vm1589_vm1, %v4901_v40, %v8323_v34  ;;  %v1600_v44 = vsel %vm1589_vm1, %v4902_v10, %v8324_v11  ;;  %v8340_v62 = vld [vmem:[#allocation129_spill] sm:$0xff]  ;;  %v4906_v34 = vld [vmem:[%s4995_s27 + $0xa8] sm:$0xff]  ;;  %v8343_v11 = vld [vmem:[#allocation76_spill] sm:$0xff] }
 0x223   : > { %v1508_v56 = vpop.permute.xlu1 %1507  ;;  %v1506_v39 = vpop.permute.xlu0 %1505  ;;  %v1634_v38 = vsel %vm1622_vm2, %v1601_v42, %v5554_v3  ;;  %v1633_v41 = vsel %vm1622_vm2, %v1600_v44, %v5556_v63  ;;  %v8342_v42 = vld [vmem:[#allocation29_spill] sm:$0xff] }
 0x224   : > { %v1828_v53 = vsel %vm1820_vm8, %v1795_v57, %v1508_v56  ;;  %v1827_v58 = vsel %vm1820_vm8, %v1794_v1, %v1506_v39  ;;  %v1667_v27 = vsel %vm1655_vm3, %v1634_v38, %v5688_v19  ;;  %v1666_v13 = vsel %vm1655_vm3, %v1633_v41, %v5690_v18  ;;  %v8327_v19 = vld [vmem:[#allocation126_spill] sm:$0xff]  ;;  %v8332_v56 = vld [vmem:[#allocation75_spill] sm:$0xff]  ;;  %v8344_v38 = vld [vmem:[#allocation77_spill] sm:$0xff] }
 0x225   : > { %4763 = vmatprep.mubr.msk.f32.mxu0 %vm1865_vm9, %v1827_v58  ;;  %v1700_v26 = vsel %vm1688_vm4, %v1667_v27, %v5822_v15  ;;  %v1699_v3 = vsel %vm1688_vm4, %v1666_v13, %v5824_v14  ;;  %v8331_v57 = vld [vmem:[#allocation74_spill] sm:$0xff]  ;;  %v1635_v39 = vsel %vm1622_vm2, %v1602_v30, %v8332_v56  ;;  %v1604_v10 = vsel %vm1589_vm1, %v4906_v34, %v8342_v42  ;;  %v8345_v27 = vld [vmem:[#allocation96_spill] sm:$0xff]  ;;  %v8354_v56 = vld [vmem:[#allocation33_spill] sm:$0xff] }
 0x226   : > { %4764 = vmatmul.mubr.msk.f32.gmra.mrb[6].mxu0 %vm1865_vm9, %v1828_v53  ;;  %v1733_v63 = vsel %vm1721_vm5, %v1700_v26, %v8325_v5  ;;  %v1732_v6 = vsel %vm1721_vm5, %v1699_v3, %v8326_v45  ;;  %v1636_v1 = vsel %vm1622_vm2, %v1603_v0, %v8331_v57  ;;  %v8333_v53 = vld [vmem:[#allocation94_spill] sm:$0xff]  ;;  %v1668_v23 = vsel %vm1655_vm3, %v1635_v39, %v8334_v9  ;;  %v8347_v5 = vld [vmem:[#allocation9_spill] sm:$0xff]  ;;  %v8353_v30 = vld [vmem:[#allocation32_spill] sm:$0xff] }
 0x227   : > { %v1384_v37 = vpop.permute.xlu1 %1383  ;;  %v1382_v52 = vpop.permute.xlu0 %1381  ;;  %v1766_v43 = vsel %vm1754_vm6, %v1733_v63, %v8327_v19  ;;  %v1765_v18 = vsel %vm1754_vm6, %v1732_v6, %v8328_v12  ;;  %v1669_v58 = vsel %vm1655_vm3, %v1636_v1, %v8333_v53  ;;  %v1701_v25 = vsel %vm1688_vm4, %v1668_v23, %v8336_v61  ;;  %v8348_v45 = vld [vmem:[#allocation10_spill] sm:$0xff]  ;;  %v8350_v12 = vld [vmem:[#allocation59_spill] sm:$0xff]  ;;  %v4908_v1 = vld [vmem:[%s4995_s27 + $0xc0] sm:$0xff] }
 0x228   : > { %v1797_v35 = vsel %vm1787_vm7, %v1764_v31, %v1384_v37  ;;  %v1796_v49 = vsel %vm1787_vm7, %v1763_v20, %v1382_v52  ;;  %v1702_v32 = vsel %vm1688_vm4, %v1669_v58, %v8335_v47  ;;  %v8338_v37 = vld [vmem:[#allocation55_spill] sm:$0xff]  ;;  %v1637_v41 = vsel %vm1622_vm2, %v1604_v10, %v8344_v38  ;;  %v8349_v19 = vld [vmem:[#allocation58_spill] sm:$0xff]  ;;  %v4909_v42 = vld [vmem:[%s4995_s27 + $0xe0] sm:$0xff] }
 0x229   : > { %v1735_v54 = vsel %vm1721_vm5, %v1702_v32, %v8337_v36  ;;  %v1734_v52 = vsel %vm1721_vm5, %v1701_v25, %v8338_v37  ;;  %v1607_v57 = vsel %vm1589_vm1, %v4907_v29, %v8353_v30  ;;  %v1606_v39 = vsel %vm1589_vm1, %v4908_v1, %v8354_v56  ;;  %v8355_v53 = vld [vmem:[#allocation78_spill] sm:$0xff]  ;;  %v8356_v9 = vld [vmem:[#allocation79_spill] sm:$0xff]  ;;  %v8365_v10 = vld [vmem:[#allocation36_spill] sm:$0xff] }
 0x22a   : > { %v1768_v33 = vsel %vm1754_vm6, %v1735_v54, %v8339_v21  ;;  %v1767_v28 = vsel %vm1754_vm6, %v1734_v52, %v8340_v62  ;;  %v1640_v58 = vsel %vm1622_vm2, %v1607_v57, %v8355_v53  ;;  %v1639_v23 = vsel %vm1622_vm2, %v1606_v39, %v8356_v9  ;;  %v8358_v47 = vld [vmem:[#allocation99_spill] sm:$0xff]  ;;  %v8359_v36 = vld [vmem:[#allocation18_spill] sm:$0xff]  ;;  %v8366_v38 = vld [vmem:[#allocation37_spill] sm:$0xff] }
 0x22b   : > { %v1512_v17 = vpop.permute.xlu1 %1511  ;;  %v1510_v55 = vpop.permute.xlu0 %1509  ;;  %v1672_v32 = vsel %vm1655_vm3, %v1639_v23, %v8358_v47  ;;  %v8360_v37 = vld [vmem:[#allocation19_spill] sm:$0xff]  ;;  %v8361_v21 = vld [vmem:[#allocation62_spill] sm:$0xff]  ;;  %v4911_v56 = vld [vmem:[%s4995_s27 + $0xf8] sm:$0xff] }
 0x22c   : > { %v1830_v16 = vsel %vm1820_vm8, %v1797_v35, %v1512_v17  ;;  %v1829_v51 = vsel %vm1820_vm8, %v1796_v49, %v1510_v55  ;;  %v1705_v52 = vsel %vm1688_vm4, %v1672_v32, %v8360_v37  ;;  %v8362_v62 = vld [vmem:[#allocation63_spill] sm:$0xff]  ;;  %v8377_v39 = vld [vmem:[#allocation40_spill] sm:$0xff]  ;;  %v8378_v9 = vld [vmem:[#allocation41_spill] sm:$0xff] }
 0x22d   : > { %4766 = vmatprep.mubr.msk.f32.mxu0 %vm1865_vm9, %v1829_v51  ;;  %v8341_v51 = vld [vmem:[#allocation28_spill] sm:$0xff]  ;;  %v1611_v53 = vsel %vm1589_vm1, %v4911_v56, %v8377_v39  ;;  %v8380_v47 = vld [vmem:[#allocation83_spill] sm:$0xff] }
 0x22e   : > { %4767 = vmatmul.mubr.msk.f32.gmra.mrb[8].mxu0 %vm1865_vm9, %v1830_v16  ;;  %v4905_v16 = vld [vmem:[%s4995_s27 + $0xb0] sm:$0xff] }
 0x22f   : > { %v1388_v7 = vpop.permute.xlu1 %1387  ;;  %v1386_v50 = vpop.permute.xlu0 %1385  ;;  %v1605_v40 = vsel %vm1589_vm1, %v4905_v16, %v8341_v51 }
 0x230   : > { %v1799_v4 = vsel %vm1787_vm7, %v1766_v43, %v1388_v7  ;;  %v1798_v8 = vsel %vm1787_vm7, %v1765_v18, %v1386_v50  ;;  %v1638_v44 = vsel %vm1622_vm2, %v1605_v40, %v8343_v11  ;;  %v8346_v7 = vld [vmem:[#allocation97_spill] sm:$0xff]  ;;  %v1609_v11 = vsel %vm1589_vm1, %v4909_v42, %v8365_v10 }
 0x231   : > { %v1671_v13 = vsel %vm1655_vm3, %v1638_v44, %v8345_v27  ;;  %v1670_v50 = vsel %vm1655_vm3, %v1637_v41, %v8346_v7  ;;  %v4910_v44 = vld [vmem:[%s4995_s27 + $0xd8] sm:$0xff]  ;;  %v8368_v7 = vld [vmem:[#allocation81_spill] sm:$0xff] }
 0x232   : > { %v1704_v63 = vsel %vm1688_vm4, %v1671_v13, %v8347_v5  ;;  %v1703_v6 = vsel %vm1688_vm4, %v1670_v50, %v8348_v45  ;;  %v1608_v41 = vsel %vm1589_vm1, %v4910_v44, %v8366_v38  ;;  %v8367_v27 = vld [vmem:[#allocation80_spill] sm:$0xff]  ;;  %v8370_v5 = vld [vmem:[#allocation101_spill] sm:$0xff]  ;;  %v4913_v38 = vld [vmem:[%s4995_s27 + $0x110] sm:$0xff] }
 0x233   : > { %v1516_v15 = vpop.permute.xlu1 %1515  ;;  %v1514_v48 = vpop.permute.xlu0 %1513  ;;  %v1737_v43 = vsel %vm1721_vm5, %v1704_v63, %v8349_v19  ;;  %v1736_v18 = vsel %vm1721_vm5, %v1703_v6, %v8350_v12  ;;  %v1642_v13 = vsel %vm1622_vm2, %v1609_v11, %v8367_v27  ;;  %v1641_v50 = vsel %vm1622_vm2, %v1608_v41, %v8368_v7  ;;  %v8371_v19 = vld [vmem:[#allocation22_spill] sm:$0xff]  ;;  %v8372_v12 = vld [vmem:[#allocation23_spill] sm:$0xff]  ;;  %v8389_v41 = vld [vmem:[#allocation44_spill] sm:$0xff] }
 0x234   : > { %v1832_v14 = vsel %vm1820_vm8, %v1799_v4, %v1516_v15  ;;  %v1831_v59 = vsel %vm1820_vm8, %v1798_v8, %v1514_v48  ;;  %v8351_v4 = vld [vmem:[#allocation130_spill] sm:$0xff]  ;;  %v8352_v15 = vld [vmem:[#allocation131_spill] sm:$0xff]  ;;  %v1674_v63 = vsel %vm1655_vm3, %v1641_v50, %v8370_v5  ;;  %v1613_v27 = vsel %vm1589_vm1, %v4913_v38, %v8389_v41  ;;  %v8390_v7 = vld [vmem:[#allocation45_spill] sm:$0xff] }
 0x235   : > { %4769 = vmatprep.mubr.msk.f32.mxu0 %vm1865_vm9, %v1831_v59  ;;  %v1770_v8 = vsel %vm1754_vm6, %v1737_v43, %v8351_v4  ;;  %v1769_v48 = vsel %vm1754_vm6, %v1736_v18, %v8352_v15  ;;  %v1707_v18 = vsel %vm1688_vm4, %v1674_v63, %v8372_v12  ;;  %v8373_v4 = vld [vmem:[#allocation66_spill] sm:$0xff]  ;;  %v8374_v15 = vld [vmem:[#allocation67_spill] sm:$0xff]  ;;  %v8392_v5 = vld [vmem:[#allocation85_spill] sm:$0xff] }
 0x236   : > { %4770 = vmatmul.mubr.msk.f32.gmra.mrb[10].mxu0 %vm1865_vm9, %v1832_v14 }
 0x237   : > { %v1392_v60 = vpop.permute.xlu1 %1391  ;;  %v1390_v22 = vpop.permute.xlu0 %1389 }
 0x238   : > { %v1801_v31 = vsel %vm1787_vm7, %v1768_v33, %v1392_v60  ;;  %v1800_v20 = vsel %vm1787_vm7, %v1767_v28, %v1390_v22  ;;  %v8357_v60 = vld [vmem:[#allocation98_spill] sm:$0xff]  ;;  %v1738_v28 = vsel %vm1721_vm5, %v1705_v52, %v8362_v62  ;;  %v8384_v62 = vld [vmem:[#allocation27_spill] sm:$0xff] }
 0x239   : > { %v1673_v22 = vsel %vm1655_vm3, %v1640_v58, %v8357_v60  ;;  %v4912_v58 = vld [vmem:[%s4995_s27 + $0xf0] sm:$0xff]  ;;  %v8379_v60 = vld [vmem:[#allocation82_spill] sm:$0xff] }
 0x23a   : > { %v1706_v54 = vsel %vm1688_vm4, %v1673_v22, %v8359_v36  ;;  %v1610_v23 = vsel %vm1589_vm1, %v4912_v58, %v8378_v9  ;;  %v1644_v22 = vsel %vm1622_vm2, %v1611_v53, %v8379_v60  ;;  %v8382_v36 = vld [vmem:[#allocation103_spill] sm:$0xff]  ;;  %v4915_v9 = vld [vmem:[%s4995_s27 + $0x128] sm:$0xff] }
 0x23b   : > { %v1520_v35 = vpop.permute.xlu1 %1519  ;;  %v1518_v49 = vpop.permute.xlu0 %1517  ;;  %v1739_v33 = vsel %vm1721_vm5, %v1706_v54, %v8361_v21  ;;  %v1643_v32 = vsel %vm1622_vm2, %v1610_v23, %v8380_v47  ;;  %v8383_v21 = vld [vmem:[#allocation26_spill] sm:$0xff]  ;;  %v8401_v23 = vld [vmem:[#allocation48_spill] sm:$0xff]  ;;  %v8402_v47 = vld [vmem:[#allocation49_spill] sm:$0xff] }
 0x23c   : > { %v1834_v17 = vsel %vm1820_vm8, %v1801_v31, %v1520_v35  ;;  %v1833_v55 = vsel %vm1820_vm8, %v1800_v20, %v1518_v49  ;;  %v8363_v31 = vld [vmem:[#allocation132_spill] sm:$0xff]  ;;  %v8364_v35 = vld [vmem:[#allocation133_spill] sm:$0xff]  ;;  %v1676_v54 = vsel %vm1655_vm3, %v1643_v32, %v8382_v36  ;;  %v1615_v60 = vsel %vm1589_vm1, %v4915_v9, %v8401_v23  ;;  %v8404_v36 = vld [vmem:[#allocation87_spill] sm:$0xff] }
 0x23d   : > { %4772 = vmatprep.mubr.msk.f32.mxu0 %vm1865_vm9, %v1833_v55  ;;  %v1772_v20 = vsel %vm1754_vm6, %v1739_v33, %v8363_v31  ;;  %v1771_v49 = vsel %vm1754_vm6, %v1738_v28, %v8364_v35  ;;  %v1709_v28 = vsel %vm1688_vm4, %v1676_v54, %v8384_v62  ;;  %v8385_v31 = vld [vmem:[#allocation114_spill] sm:$0xff]  ;;  %v8386_v35 = vld [vmem:[#allocation115_spill] sm:$0xff] }
 0x23e   : > { %4773 = vmatmul.mubr.msk.f32.gmra.mrb[12].mxu0 %vm1865_vm9, %v1834_v17 }
 0x23f   : > { %v1396_v26 = vpop.permute.xlu1 %1395  ;;  %v1394_v3 = vpop.permute.xlu0 %1393 }
 0x240   : > { %v1803_v14 = vsel %vm1787_vm7, %v1770_v8, %v1396_v26  ;;  %v1802_v59 = vsel %vm1787_vm7, %v1769_v48, %v1394_v3  ;;  %v8369_v26 = vld [vmem:[#allocation100_spill] sm:$0xff]  ;;  %v1740_v48 = vsel %vm1721_vm5, %v1707_v18, %v8374_v15  ;;  %v8396_v15 = vld [vmem:[#allocation31_spill] sm:$0xff] }
 0x241   : > { %v1675_v3 = vsel %vm1655_vm3, %v1642_v13, %v8369_v26  ;;  %v4914_v13 = vld [vmem:[%s4995_s27 + $0x108] sm:$0xff]  ;;  %v8391_v26 = vld [vmem:[#allocation84_spill] sm:$0xff] }
 0x242   : > { %v1708_v43 = vsel %vm1688_vm4, %v1675_v3, %v8371_v19  ;;  %v1612_v50 = vsel %vm1589_vm1, %v4914_v13, %v8390_v7  ;;  %v1646_v3 = vsel %vm1622_vm2, %v1613_v27, %v8391_v26  ;;  %v8394_v19 = vld [vmem:[#allocation105_spill] sm:$0xff]  ;;  %v8413_v26 = vld [vmem:[#allocation52_spill] sm:$0xff] }
 0x243   : > { %v1524_v2 = vpop.permute.xlu1 %1523  ;;  %v1522_v24 = vpop.permute.xlu0 %1521  ;;  %v1741_v8 = vsel %vm1721_vm5, %v1708_v43, %v8373_v4  ;;  %v1645_v63 = vsel %vm1622_vm2, %v1612_v50, %v8392_v5  ;;  %v8395_v4 = vld [vmem:[#allocation30_spill] sm:$0xff]  ;;  %v4917_v50 = vld [vmem:[%s4995_s27 + $0x140] sm:$0xff]  ;;  %v4918_v5 = vld [vmem:[%s4995_s27 + $0x138] sm:$0xff] }
 0x244   : > { %v1836_v0 = vsel %vm1820_vm8, %v1803_v14, %v1524_v2  ;;  %v1835_v46 = vsel %vm1820_vm8, %v1802_v59, %v1522_v24  ;;  %v8375_v14 = vld [vmem:[#allocation134_spill] sm:$0xff]  ;;  %v8376_v2 = vld [vmem:[#allocation135_spill] sm:$0xff]  ;;  %v1678_v43 = vsel %vm1655_vm3, %v1645_v63, %v8394_v19  ;;  %v8414_v63 = vld [vmem:[#allocation53_spill] sm:$0xff] }
 0x245   : > { %4775 = vmatprep.mubr.msk.f32.mxu0 %vm1865_vm9, %v1835_v46  ;;  %v1774_v59 = vsel %vm1754_vm6, %v1741_v8, %v8375_v14  ;;  %v1773_v24 = vsel %vm1754_vm6, %v1740_v48, %v8376_v2  ;;  %v1711_v48 = vsel %vm1688_vm4, %v1678_v43, %v8396_v15  ;;  %v8397_v14 = vld [vmem:[#allocation116_spill] sm:$0xff]  ;;  %v8398_v2 = vld [vmem:[#allocation117_spill] sm:$0xff] }
 0x246   : > { %4776 = vmatmul.mubr.msk.f32.gmra.mrb[14].mxu0 %vm1865_vm9, %v1836_v0  ;;  %v8416_v43 = vld [vmem:[#allocation89_spill] sm:$0xff] }
 0x247   : > { %v1400_v61 = vpop.permute.xlu1 %1399  ;;  %v1398_v25 = vpop.permute.xlu0 %1397 }
 0x248   : > { %v1805_v17 = vsel %vm1787_vm7, %v1772_v20, %v1400_v61  ;;  %v1804_v55 = vsel %vm1787_vm7, %v1771_v49, %v1398_v25  ;;  %v8381_v61 = vld [vmem:[#allocation102_spill] sm:$0xff]  ;;  %v1742_v49 = vsel %vm1721_vm5, %v1709_v28, %v8386_v35  ;;  %v8408_v35 = vld [vmem:[#allocation35_spill] sm:$0xff] }
 0x249   : > { %v1677_v25 = vsel %vm1655_vm3, %v1644_v22, %v8381_v61  ;;  %v4916_v22 = vld [vmem:[%s4995_s27 + $0x120] sm:$0xff]  ;;  %v8403_v61 = vld [vmem:[#allocation86_spill] sm:$0xff] }
 0x24a   : > { %v1710_v33 = vsel %vm1688_vm4, %v1677_v25, %v8383_v21  ;;  %v1614_v32 = vsel %vm1589_vm1, %v4916_v22, %v8402_v47  ;;  %v1648_v25 = vsel %vm1622_vm2, %v1615_v60, %v8403_v61  ;;  %v8406_v21 = vld [vmem:[#allocation107_spill] sm:$0xff] }
 0x24b   : > { %v1528_v16 = vpop.permute.xlu1 %1527  ;;  %v1526_v51 = vpop.permute.xlu0 %1525  ;;  %v1743_v20 = vsel %vm1721_vm5, %v1710_v33, %v8385_v31  ;;  %v1647_v54 = vsel %vm1622_vm2, %v1614_v32, %v8404_v36  ;;  %v8407_v31 = vld [vmem:[#allocation34_spill] sm:$0xff]  ;;  %v8425_v36 = vld [vmem:[#allocation56_spill] sm:$0xff] }
 0x24c   : > { %v1838_v40 = vsel %vm1820_vm8, %v1805_v17, %v1528_v16  ;;  %v1837_v34 = vsel %vm1820_vm8, %v1804_v55, %v1526_v51  ;;  %v8387_v17 = vld [vmem:[#allocation136_spill] sm:$0xff]  ;;  %v8388_v16 = vld [vmem:[#allocation137_spill] sm:$0xff]  ;;  %v1680_v33 = vsel %vm1655_vm3, %v1647_v54, %v8406_v21 }
 0x24d   : > { %4778 = vmatprep.mubr.msk.f32.mxu0 %vm1865_vm9, %v1837_v34  ;;  %v1776_v55 = vsel %vm1754_vm6, %v1743_v20, %v8387_v17  ;;  %v1775_v51 = vsel %vm1754_vm6, %v1742_v49, %v8388_v16  ;;  %v1713_v49 = vsel %vm1688_vm4, %v1680_v33, %v8408_v35  ;;  %v8409_v17 = vld [vmem:[#allocation118_spill] sm:$0xff]  ;;  %v8410_v16 = vld [vmem:[#allocation119_spill] sm:$0xff] }
 0x24e   : > { %4779 = vmatmul.mubr.msk.f32.gmra.mrb[16].mxu0 %vm1865_vm9, %v1838_v40  ;;  %v8427_v33 = vld [vmem:[#allocation90_spill] sm:$0xff] }
 0x24f   : > { %v1404_v45 = vpop.permute.xlu1 %1403  ;;  %v1402_v6 = vpop.permute.xlu0 %1401 }
 0x250   : > { %v1807_v0 = vsel %vm1787_vm7, %v1774_v59, %v1404_v45  ;;  %v1806_v46 = vsel %vm1787_vm7, %v1773_v24, %v1402_v6  ;;  %v8393_v45 = vld [vmem:[#allocation104_spill] sm:$0xff]  ;;  %v1744_v24 = vsel %vm1721_vm5, %v1711_v48, %v8398_v2 }
 0x251   : > { %v1679_v6 = vsel %vm1655_vm3, %v1646_v3, %v8393_v45  ;;  %v1617_v3 = vsel %vm1589_vm1, %v4917_v50, %v8413_v26  ;;  %v1616_v45 = vsel %vm1589_vm1, %v4918_v5, %v8414_v63 }
 0x252   : > { %v1712_v8 = vsel %vm1688_vm4, %v1679_v6, %v8395_v4  ;;  %v8415_v6 = vld [vmem:[#allocation88_spill] sm:$0xff] }
 0x253   : > { %v1532_v29 = vpop.permute.xlu1 %1531  ;;  %v1530_v30 = vpop.permute.xlu0 %1529  ;;  %v1745_v59 = vsel %vm1721_vm5, %v1712_v8, %v8397_v14  ;;  %v1650_v19 = vsel %vm1622_vm2, %v1617_v3, %v8415_v6  ;;  %v8418_v8 = vld [vmem:[#allocation109_spill] sm:$0xff]  ;;  %v4921_v6 = vld [vmem:[%s4995_s27 + $0x170] sm:$0xff] }
 0x254   : > { %v1840_v57 = vsel %vm1820_vm8, %v1807_v0, %v1532_v29  ;;  %v1839_v1 = vsel %vm1820_vm8, %v1806_v46, %v1530_v30  ;;  %v8399_v0 = vld [vmem:[#allocation138_spill] sm:$0xff]  ;;  %v8400_v29 = vld [vmem:[#allocation139_spill] sm:$0xff] }
 0x255   : > { %4781 = vmatprep.mubr.msk.f32.mxu0 %vm1865_vm9, %v1839_v1  ;;  %v1778_v46 = vsel %vm1754_vm6, %v1745_v59, %v8399_v0  ;;  %v1777_v30 = vsel %vm1754_vm6, %v1744_v24, %v8400_v29  ;;  %v8419_v59 = vld [vmem:[#allocation38_spill] sm:$0xff]  ;;  %v8420_v24 = vld [vmem:[#allocation39_spill] sm:$0xff] }
 0x256   : > { %4782 = vmatmul.mubr.msk.f32.gmra.mrb[18].mxu0 %vm1865_vm9, %v1840_v57 }
 0x257   : > { %v1408_v37 = vpop.permute.xlu1 %1407  ;;  %v1406_v52 = vpop.permute.xlu0 %1405 }
 0x258   : > { %v1809_v40 = vsel %vm1787_vm7, %v1776_v55, %v1408_v37  ;;  %v1808_v34 = vsel %vm1787_vm7, %v1775_v51, %v1406_v52  ;;  %v8405_v37 = vld [vmem:[#allocation106_spill] sm:$0xff]  ;;  %v1746_v51 = vsel %vm1721_vm5, %v1713_v49, %v8410_v16  ;;  %v8430_v49 = vld [vmem:[#allocation111_spill] sm:$0xff] }
 0x259   : > { %v1681_v52 = vsel %vm1655_vm3, %v1648_v25, %v8405_v37  ;;  %v4919_v25 = vld [vmem:[%s4995_s27 + $0x158] sm:$0xff]  ;;  %v4920_v37 = vld [vmem:[%s4995_s27 + $0x150] sm:$0xff] }
 0x25a   : > { %v1714_v20 = vsel %vm1688_vm4, %v1681_v52, %v8407_v31  ;;  %v1619_v54 = vsel %vm1589_vm1, %v4919_v25, %v8425_v36  ;;  %v8426_v52 = vld [vmem:[#allocation57_spill] sm:$0xff] }
 0x25b   : > { %v1536_v42 = vpop.permute.xlu1 %1535  ;;  %v1534_v10 = vpop.permute.xlu0 %1533  ;;  %v1747_v55 = vsel %vm1721_vm5, %v1714_v20, %v8409_v17  ;;  %v1618_v21 = vsel %vm1589_vm1, %v4920_v37, %v8426_v52  ;;  %v8429_v20 = vld [vmem:[#allocation110_spill] sm:$0xff]  ;;  %v6748_v52 = vld [vmem:[%s8057_s3] ss:$0 sm:$0xff] }
 0x25c   : > { %v1842_v11 = vsel %vm1820_vm8, %v1809_v40, %v1536_v42  ;;  %v1841_v44 = vsel %vm1820_vm8, %v1808_v34, %v1534_v10  ;;  %v8411_v40 = vld [vmem:[#allocation140_spill] sm:$0xff]  ;;  %v8412_v42 = vld [vmem:[#allocation141_spill] sm:$0xff] }
 0x25d   : > { %4784 = vmatprep.mubr.msk.f32.mxu0 %vm1865_vm9, %v1841_v44  ;;  %v1780_v34 = vsel %vm1754_vm6, %v1747_v55, %v8411_v40  ;;  %v1779_v10 = vsel %vm1754_vm6, %v1746_v51, %v8412_v42  ;;  %v8431_v51 = vld [vmem:[#allocation42_spill] sm:$0xff] }
 0x25e   : > { %4785 = vmatmul.mubr.msk.f32.gmra.mrb[20].mxu0 %vm1865_vm9, %v1842_v11  ;;  %v4944_v11 = vmov 0.0  }
 0x25f   : > { %v1412_v12 = vpop.permute.xlu1 %1411  ;;  %v1410_v18 = vpop.permute.xlu0 %1409  ;;  %2224 = vst.msk [vmem:[#allocation2 + $0x8] sm:$0xff] %vm1589_vm1, %v4944_v11  ;;  %2223 = vst.msk [vmem:[#allocation2] sm:$0xff] %vm1589_vm1, %v4944_v11 }
 0x260   : > { %v1811_v57 = vsel %vm1787_vm7, %v1778_v46, %v1412_v12  ;;  %v1810_v1 = vsel %vm1787_vm7, %v1777_v30, %v1410_v18  ;;  %2226 = vst.msk [vmem:[#allocation2 + $0x10] sm:$0x3] %vm2225_vm10, %v4944_v11  ;;  %2230 = vst.msk [vmem:[#allocation2 + $0x1a8] sm:$0x3] %vm2225_vm10, %v4944_v11  ;;  %v1649_v12 = vsel %vm1622_vm2, %v1616_v45, %v8416_v43  ;;  %v8417_v18 = vld [vmem:[#allocation108_spill] sm:$0xff]  ;;  %v8422_v30 = vld [vmem:[#allocation121_spill] sm:$0xff] }
 0x261   : > { %2228 = vst.msk [vmem:[#allocation2 + $0x198] sm:$0xff] %vm1589_vm1, %v4944_v11  ;;  %2229 = vst.msk [vmem:[#allocation2 + $0x1a0] sm:$0xff] %vm1589_vm1, %v4944_v11  ;;  %v1683_v4 = vsel %vm1655_vm3, %v1650_v19, %v8417_v18  ;;  %v1682_v15 = vsel %vm1655_vm3, %v1649_v12, %v8418_v8  ;;  %v8421_v46 = vld [vmem:[#allocation120_spill] sm:$0xff]  ;;  %v4922_v12 = vld [vmem:[%s4995_s27 + $0x168] sm:$0xff] }
 0x262   : > { %2249 = vst.msk [vmem:[#allocation2 + $0x29] sm:$0x1] %vm2232_vm11, %v4944_v11  ;;  %2233 = vst.msk [vmem:[#allocation2 + $0x18] sm:$0x1] %vm2232_vm11, %v4944_v11  ;;  %v1716_v2 = vsel %vm1688_vm4, %v1683_v4, %v8419_v59  ;;  %v1715_v0 = vsel %vm1688_vm4, %v1682_v15, %v8420_v24  ;;  %v8437_v19 = vld [vmem:[#allocation60_spill] sm:$0xff]  ;;  %v8438_v18 = vld [vmem:[#allocation61_spill] sm:$0xff] }
 0x263   : > { %v1540_v56 = vpop.permute.xlu1 %1539  ;;  %v1538_v39 = vpop.permute.xlu0 %1537  ;;  %2234 = vst.msk [vmem:[#allocation2 + $0x30] sm:$0x1] %vm2232_vm11, %v4944_v11  ;;  %2235 = vst.msk [vmem:[#allocation2 + $0x48] sm:$0x1] %vm2232_vm11, %v4944_v11  ;;  %v1749_v29 = vsel %vm1721_vm5, %v1716_v2, %v8421_v46  ;;  %v1621_v43 = vsel %vm1589_vm1, %v4921_v6, %v8437_v19  ;;  %v1620_v4 = vsel %vm1589_vm1, %v4922_v12, %v8438_v18  ;;  %v8439_v8 = vld [vmem:[#allocation92_spill] sm:$0xff]  ;;  %v8442_v24 = vld [vmem:[#allocation113_spill] sm:$0xff] }
 0x264   : > { %v1844_v53 = vsel %vm1820_vm8, %v1811_v57, %v1540_v56  ;;  %v1843_v58 = vsel %vm1820_vm8, %v1810_v1, %v1538_v39  ;;  %2236 = vst.msk [vmem:[#allocation2 + $0x60] sm:$0x1] %vm2232_vm11, %v4944_v11  ;;  %2237 = vst.msk [vmem:[#allocation2 + $0x78] sm:$0x1] %vm2232_vm11, %v4944_v11  ;;  %v1748_v57 = vsel %vm1721_vm5, %v1715_v0, %v8422_v30  ;;  %v8423_v56 = vld [vmem:[#allocation142_spill] sm:$0xff]  ;;  %v8441_v59 = vld [vmem:[#allocation112_spill] sm:$0xff] }
 0x265   : > { %4787 = vmatprep.mubr.msk.f32.mxu0 %vm1865_vm9, %v1843_v58  ;;  %2238 = vst.msk [vmem:[#allocation2 + $0x90] sm:$0x1] %vm2232_vm11, %v4944_v11  ;;  %2239 = vst.msk [vmem:[#allocation2 + $0xa8] sm:$0x1] %vm2232_vm11, %v4944_v11  ;;  %v1782_v39 = vsel %vm1754_vm6, %v1749_v29, %v8423_v56  ;;  %v1654_v15 = vsel %vm1622_vm2, %v1621_v43, %v8439_v8  ;;  %v8443_v30 = vld [vmem:[#allocation46_spill] sm:$0xff] }
 0x266   : > { %4788 = vmatmul.mubr.msk.f32.gmra.mrb[22].mxu0 %vm1865_vm9, %v1844_v53  ;;  %2240 = vst.msk [vmem:[#allocation2 + $0xc0] sm:$0x1] %vm2232_vm11, %v4944_v11  ;;  %2241 = vst.msk [vmem:[#allocation2 + $0xd8] sm:$0x1] %vm2232_vm11, %v4944_v11  ;;  %v8424_v53 = vld [vmem:[#allocation143_spill] sm:$0xff]  ;;  %v2329_v9 = vld [vmem:[#allocation2 + $0x1] sm:$0xff]  ;;  %v1687_v2 = vsel %vm1655_vm3, %v1654_v15, %v8441_v59 }
 0x267   : > { %v1416_v62 = vpop.permute.xlu1 %1415  ;;  %v1414_v28 = vpop.permute.xlu0 %1413  ;;  %2242 = vst.msk [vmem:[#allocation2 + $0xf0] sm:$0x1] %vm2232_vm11, %v4944_v11  ;;  %2243 = vst.msk [vmem:[#allocation2 + $0x108] sm:$0x1] %vm2232_vm11, %v4944_v11  ;;  %v2330_v1 = vld [vmem:[#allocation2 + $0x9] sm:$0xff]  ;;  %v1781_v58 = vsel %vm1754_vm6, %v1748_v57, %v8424_v53  ;;  %2618 = vrot.lane.b32.xlu0 %v2329_v9, %s4936_s28  ;;  %v1720_v57 = vsel %vm1688_vm4, %v1687_v2, %v8443_v30 }
 0x268   : > { %v1813_v44 = vsel %vm1787_vm7, %v1780_v34, %v1416_v62  ;;  %v1812_v38 = vsel %vm1787_vm7, %v1779_v10, %v1414_v28  ;;  %2244 = vst.msk [vmem:[#allocation2 + $0x120] sm:$0x1] %vm2232_vm11, %v4944_v11  ;;  %2245 = vst.msk [vmem:[#allocation2 + $0x138] sm:$0x1] %vm2232_vm11, %v4944_v11  ;;  %2620 = vrot.lane.b32.xlu1 %v2330_v1, %s4936_s28  ;;  %v1652_v62 = vsel %vm1622_vm2, %v1619_v54, %v8427_v33  ;;  %v8428_v28 = vld [vmem:[#allocation91_spill] sm:$0xff]  ;;  %v8433_v10 = vld [vmem:[#allocation122_spill] sm:$0xff] }
 0x269   : > { %2246 = vst.msk [vmem:[#allocation2 + $0x150] sm:$0x1] %vm2232_vm11, %v4944_v11  ;;  %2247 = vst.msk [vmem:[#allocation2 + $0x168] sm:$0x1] %vm2232_vm11, %v4944_v11  ;;  %v1651_v31 = vsel %vm1622_vm2, %v1618_v21, %v8428_v28  ;;  %v1685_v35 = vsel %vm1655_vm3, %v1652_v62, %v8429_v20  ;;  %v8432_v34 = vld [vmem:[#allocation43_spill] sm:$0xff] }
 0x26a   : > { %2248 = vst.msk [vmem:[#allocation2 + $0x180] sm:$0x1] %vm2232_vm11, %v4944_v11  ;;  %2250 = vst.msk [vmem:[#allocation2 + $0x41] sm:$0x1] %vm2232_vm11, %v4944_v11  ;;  %v1684_v17 = vsel %vm1655_vm3, %v1651_v31, %v8430_v49  ;;  %v1718_v40 = vsel %vm1688_vm4, %v1685_v35, %v8431_v51  ;;  %v8444_v1 = vld [vmem:[#allocation47_spill] sm:$0xff] }
 0x26b   : > { %v1544_v41 = vpop.permute.xlu1 %1543  ;;  %v1542_v27 = vpop.permute.xlu0 %1541  ;;  %2251 = vst.msk [vmem:[#allocation2 + $0x59] sm:$0x1] %vm2232_vm11, %v4944_v11  ;;  %2252 = vst.msk [vmem:[#allocation2 + $0x71] sm:$0x1] %vm2232_vm11, %v4944_v11  ;;  %v1717_v42 = vsel %vm1688_vm4, %v1684_v17, %v8432_v34 }
 0x26c   : > { %v1846_v13 = vsel %vm1820_vm8, %v1813_v44, %v1544_v41  ;;  %v1845_v7 = vsel %vm1820_vm8, %v1812_v38, %v1542_v27  ;;  %2253 = vst.msk [vmem:[#allocation2 + $0x89] sm:$0x1] %vm2232_vm11, %v4944_v11  ;;  %2254 = vst.msk [vmem:[#allocation2 + $0xa1] sm:$0x1] %vm2232_vm11, %v4944_v11  ;;  %v8434_v44 = vld [vmem:[#allocation123_spill] sm:$0xff]  ;;  %v8435_v41 = vld [vmem:[#allocation144_spill] sm:$0xff] }
 0x26d   : > { %4790 = vmatprep.mubr.msk.f32.mxu0 %vm1865_vm9, %v1845_v7  ;;  %2255 = vst.msk [vmem:[#allocation2 + $0xb9] sm:$0x1] %vm2232_vm11, %v4944_v11  ;;  %2256 = vst.msk [vmem:[#allocation2 + $0xd1] sm:$0x1] %vm2232_vm11, %v4944_v11  ;;  %v1750_v38 = vsel %vm1721_vm5, %v1717_v42, %v8434_v44 }
 0x26e   : > { %4791 = vmatmul.mubr.msk.f32.gmra.mrb[24].mxu0 %vm1865_vm9, %v1846_v13  ;;  %2257 = vst.msk [vmem:[#allocation2 + $0xe9] sm:$0x1] %vm2232_vm11, %v4944_v11  ;;  %2258 = vst.msk [vmem:[#allocation2 + $0x101] sm:$0x1] %vm2232_vm11, %v4944_v11  ;;  %v8436_v13 = vld [vmem:[#allocation145_spill] sm:$0xff] }
 0x26f   : > { %2259 = vst.msk [vmem:[#allocation2 + $0x119] sm:$0x1] %vm2232_vm11, %v4944_v11  ;;  %2260 = vst.msk [vmem:[#allocation2 + $0x131] sm:$0x1] %vm2232_vm11, %v4944_v11  ;;  %v1420_v48 = vpop.permute.xlu1 %1419  ;;  %v1418_v14 = vpop.permute.xlu0 %1417  ;;  %v1783_v7 = vsel %vm1754_vm6, %v1750_v38, %v8436_v13 }
 0x270   : > { %2261 = vst.msk [vmem:[#allocation2 + $0x149] sm:$0x1] %vm2232_vm11, %v4944_v11  ;;  %2262 = vst.msk [vmem:[#allocation2 + $0x161] sm:$0x1] %vm2232_vm11, %v4944_v11  ;;  %v1815_v23 = vsel %vm1787_vm7, %v1782_v39, %v1420_v48  ;;  %v1814_v60 = vsel %vm1787_vm7, %v1781_v58, %v1418_v14  ;;  %v8440_v48 = vld [vmem:[#allocation93_spill] sm:$0xff]  ;;  %v8445_v39 = vld [vmem:[#allocation124_spill] sm:$0xff] }
 0x271   : > { %2263 = vst.msk [vmem:[#allocation2 + $0x179] sm:$0x1] %vm2232_vm11, %v4944_v11  ;;  %2264 = vst.msk [vmem:[#allocation2 + $0x191] sm:$0x1] %vm2232_vm11, %v4944_v11  ;;  %v1751_v11 = vsel %vm1721_vm5, %v1718_v40, %v8433_v10  ;;  %v1653_v14 = vsel %vm1622_vm2, %v1620_v4, %v8440_v48  ;;  %v1753_v53 = vsel %vm1721_vm5, %v1720_v57, %v8445_v39  ;;  %v8446_v58 = vld [vmem:[#allocation125_spill] sm:$0xff] }
 0x272   : > { %v1784_v27 = vsel %vm1754_vm6, %v1751_v11, %v8435_v41  ;;  %v1686_v0 = vsel %vm1655_vm3, %v1653_v14, %v8442_v24 }
 0x273   : > { %v1548_v22 = vpop.permute.xlu1 %1547  ;;  %v1546_v47 = vpop.permute.xlu0 %1545  ;;  %v1719_v56 = vsel %vm1688_vm4, %v1686_v0, %v8444_v1 }
 0x274   : > { %v1848_v32 = vsel %vm1820_vm8, %v1815_v23, %v1548_v22  ;;  %v1847_v61 = vsel %vm1820_vm8, %v1814_v60, %v1546_v47  ;;  %v1752_v9 = vsel %vm1721_vm5, %v1719_v56, %v8446_v58  ;;  %v8447_v23 = vld [vmem:[#allocation146_spill] sm:$0xff]  ;;  %v8448_v22 = vld [vmem:[#allocation147_spill] sm:$0xff] }
 0x275   : > { %4793 = vmatprep.mubr.msk.f32.mxu0 %vm1865_vm9, %v1847_v61  ;;  %v1786_v60 = vsel %vm1754_vm6, %v1753_v53, %v8447_v23  ;;  %v1785_v47 = vsel %vm1754_vm6, %v1752_v9, %v8448_v22 }
 0x276   : > { %4794 = vmatmul.mubr.msk.f32.gmra.mrb[26].mxu0 %vm1865_vm9, %v1848_v32 }
 0x277   : > { %v1424_v55 = vpop.permute.xlu1 %1423  ;;  %v1422_v16 = vpop.permute.xlu0 %1421 }
 0x278   : > { %v1817_v50 = vsel %vm1787_vm7, %v1784_v27, %v1424_v55  ;;  %v1816_v26 = vsel %vm1787_vm7, %v1783_v7, %v1422_v16 }
 0x27b   : > { %v1552_v3 = vpop.permute.xlu1 %1551  ;;  %v1550_v5 = vpop.permute.xlu0 %1549 }
 0x27c   : > { %v1850_v63 = vsel %vm1820_vm8, %v1817_v50, %v1552_v3  ;;  %v1849_v45 = vsel %vm1820_vm8, %v1816_v26, %v1550_v5 }
 0x27d   : > { %4796 = vmatprep.mubr.msk.f32.mxu0 %vm1865_vm9, %v1849_v45 }
 0x27e   : > { %4797 = vmatmul.mubr.msk.f32.gmra.mrb[28].mxu0 %vm1865_vm9, %v1850_v63 }
 0x27f   : > { %v1428_v46 = vpop.permute.xlu1 %1427  ;;  %v1426_v29 = vpop.permute.xlu0 %1425 }
 0x280   : > { %v1819_v32 = vsel %vm1787_vm7, %v1786_v60, %v1428_v46  ;;  %v1818_v61 = vsel %vm1787_vm7, %v1785_v47, %v1426_v29 }
 0x283   : > { %v1556_v25 = vpop.permute.xlu1 %1555  ;;  %v1554_v36 = vpop.permute.xlu0 %1553 }
 0x284   : > { %v1852_v54 = vsel %vm1820_vm8, %v1819_v32, %v1556_v25  ;;  %v1851_v37 = vsel %vm1820_vm8, %v1818_v61, %v1554_v36 }
 0x285   : > { %4799 = vmatprep.mubr.msk.f32.mxu0 %vm1865_vm9, %v1851_v37 }
 0x286   : > { %4800 = vmatmul.mubr.msk.f32.gmra.mrb[30].mxu0 %vm1865_vm9, %v1852_v54 }
 0x2e8   : > { %v4756_v21 = vpop.f32.mrb[0].mxu0 }
 0x2e9   : > { %v2038_v33 = vadd.f32 %v4756_v21, %v6748_v52  ;;  %v2032_v62 = vpop.f32.mrb[1].mxu0 }
 0x2ea   : > { %v2033_v28 = vadd.f32 %v6748_v52, %v2032_v62 }
 0x2eb   : > { %v2192_v31 = vmax.f32 %v2038_v33, 0.0 }
 0x2ec   : > { %v2191_v20 = vmax.f32 %v2033_v28, 0.0  ;;  %v4759_v35 = vpop.f32.mrb[2].mxu0 }
 0x2ed   : > { %2266 = vst.msk [vmem:[#allocation2 + $0x21] sm:$0xff] %vm1589_vm1, %v2192_v31  ;;  %v2048_v49 = vadd.f32 %v4759_v35, %v6748_v52  ;;  %v2042_v17 = vpop.f32.mrb[3].mxu0 }
 0x2ee   : > { %2265 = vst.msk [vmem:[#allocation2 + $0x19] sm:$0xff] %vm1589_vm1, %v2191_v20  ;;  %v2043_v55 = vadd.f32 %v6748_v52, %v2042_v17 }
 0x2ef   : > { %v2194_v16 = vmax.f32 %v2048_v49, 0.0 }
 0x2f0   : > { %v2193_v51 = vmax.f32 %v2043_v55, 0.0 }
 0x2f1   : > { %2268 = vst.msk [vmem:[#allocation2 + $0x39] sm:$0xff] %vm1589_vm1, %v2194_v16  ;;  %v4762_v40 = vpop.f32.mrb[4].mxu0 }
 0x2f2   : > { %2267 = vst.msk [vmem:[#allocation2 + $0x31] sm:$0xff] %vm1589_vm1, %v2193_v51  ;;  %v2058_v34 = vadd.f32 %v4762_v40, %v6748_v52  ;;  %v2052_v42 = vpop.f32.mrb[5].mxu0 }
 0x2f3   : > { %v2053_v10 = vadd.f32 %v6748_v52, %v2052_v42 }
 0x2f4   : > { %v2196_v11 = vmax.f32 %v2058_v34, 0.0  ;;  %v6760_v44 = vld [vmem:[#allocation2 + $0x21] sm:$0xff] }
 0x2f5   : > { %v2195_v38 = vmax.f32 %v2053_v10, 0.0  ;;  %2624 = vrot.lane.b32.xlu1 %v6760_v44, %s4936_s28  ;;  %v6764_v41 = vld [vmem:[#allocation2 + $0x19] sm:$0xff] }
 0x2f6   : > { %2270 = vst.msk [vmem:[#allocation2 + $0x51] sm:$0xff] %vm1589_vm1, %v2196_v11  ;;  %2622 = vrot.lane.b32.xlu0 %v6764_v41, %s4936_s28 }
 0x2f7   : > { %2269 = vst.msk [vmem:[#allocation2 + $0x49] sm:$0xff] %vm1589_vm1, %v2195_v38 }
 0x2f8   : > { %v6770_v27 = vld [vmem:[#allocation2 + $0x39] sm:$0xff] }
 0x2f9   : > { %2628 = vrot.lane.b32.xlu1 %v6770_v27, %s4936_s28  ;;  %v4765_v13 = vpop.f32.mrb[6].mxu0  ;;  %v6774_v7 = vld [vmem:[#allocation2 + $0x31] sm:$0xff] }
 0x2fa   : > { %v2068_v50 = vadd.f32 %v4765_v13, %v6748_v52  ;;  %v2062_v26 = vpop.f32.mrb[7].mxu0  ;;  %2626 = vrot.lane.b32.xlu0 %v6774_v7, %s4936_s28 }
 0x2fb   : > { %v2063_v3 = vadd.f32 %v6748_v52, %v2062_v26 }
 0x2fc   : > { %v2198_v5 = vmax.f32 %v2068_v50, 0.0 }
 0x2fd   : > { %v2197_v63 = vmax.f32 %v2063_v3, 0.0  ;;  %v6780_v45 = vld [vmem:[#allocation2 + $0x51] sm:$0xff] }
 0x2fe   : > { %2272 = vst.msk [vmem:[#allocation2 + $0x69] sm:$0xff] %vm1589_vm1, %v2198_v5  ;;  %2632 = vrot.lane.b32.xlu1 %v6780_v45, %s4936_s28  ;;  %v6785_v6 = vld [vmem:[#allocation2 + $0x49] sm:$0xff] }
 0x2ff   : > { %2271 = vst.msk [vmem:[#allocation2 + $0x61] sm:$0xff] %vm1589_vm1, %v2197_v63  ;;  %2630 = vrot.lane.b32.xlu0 %v6785_v6, %s4936_s28 }
 0x301   : > { %v4768_v19 = vpop.f32.mrb[8].mxu0 }
 0x302   : > { %v2078_v43 = vadd.f32 %v4768_v19, %v6748_v52  ;;  %v2072_v12 = vpop.f32.mrb[9].mxu0 }
 0x303   : > { %v2073_v18 = vadd.f32 %v6748_v52, %v2072_v12 }
 0x304   : > { %v2200_v4 = vmax.f32 %v2078_v43, 0.0 }
 0x305   : > { %v2199_v8 = vmax.f32 %v2073_v18, 0.0  ;;  %v6792_v15 = vld [vmem:[#allocation2 + $0x69] sm:$0xff] }
 0x306   : > { %2274 = vst.msk [vmem:[#allocation2 + $0x81] sm:$0xff] %vm1589_vm1, %v2200_v4  ;;  %2636 = vrot.lane.b32.xlu1 %v6792_v15, %s4936_s28  ;;  %v6797_v48 = vld [vmem:[#allocation2 + $0x61] sm:$0xff] }
 0x307   : > { %2273 = vst.msk [vmem:[#allocation2 + $0x79] sm:$0xff] %vm1589_vm1, %v2199_v8  ;;  %2634 = vrot.lane.b32.xlu0 %v6797_v48, %s4936_s28 }
 0x309   : > { %v4771_v14 = vpop.f32.mrb[10].mxu0 }
 0x30a   : > { %v2088_v59 = vadd.f32 %v4771_v14, %v6748_v52  ;;  %v2082_v2 = vpop.f32.mrb[11].mxu0 }
 0x30b   : > { %v2083_v24 = vadd.f32 %v6748_v52, %v2082_v2 }
 0x30c   : > { %v2202_v0 = vmax.f32 %v2088_v59, 0.0 }
 0x30d   : > { %v2201_v46 = vmax.f32 %v2083_v24, 0.0  ;;  %v6804_v29 = vld [vmem:[#allocation2 + $0x81] sm:$0xff] }
 0x30e   : > { %2276 = vst.msk [vmem:[#allocation2 + $0x99] sm:$0xff] %vm1589_vm1, %v2202_v0  ;;  %2640 = vrot.lane.b32.xlu1 %v6804_v29, %s4936_s28  ;;  %v6809_v30 = vld [vmem:[#allocation2 + $0x79] sm:$0xff] }
 0x30f   : > { %2275 = vst.msk [vmem:[#allocation2 + $0x91] sm:$0xff] %vm1589_vm1, %v2201_v46  ;;  %2638 = vrot.lane.b32.xlu0 %v6809_v30, %s4936_s28 }
 0x311   : > { %v4774_v57 = vpop.f32.mrb[12].mxu0 }
 0x312   : > { %v2098_v1 = vadd.f32 %v4774_v57, %v6748_v52  ;;  %v2092_v56 = vpop.f32.mrb[13].mxu0 }
 0x313   : > { %v2093_v39 = vadd.f32 %v6748_v52, %v2092_v56 }
 0x314   : > { %v2204_v53 = vmax.f32 %v2098_v1, 0.0 }
 0x315   : > { %v2203_v58 = vmax.f32 %v2093_v39, 0.0  ;;  %v2342_v9 = vld [vmem:[#allocation2 + $0x99] sm:$0xff] }
 0x316   : > { %2278 = vst.msk [vmem:[#allocation2 + $0xb1] sm:$0xff] %vm1589_vm1, %v2204_v53  ;;  %2644 = vrot.lane.b32.xlu1 %v2342_v9, %s4936_s28  ;;  %v2341_v23 = vld [vmem:[#allocation2 + $0x91] sm:$0xff] }
 0x317   : > { %2277 = vst.msk [vmem:[#allocation2 + $0xa9] sm:$0xff] %vm1589_vm1, %v2203_v58  ;;  %2642 = vrot.lane.b32.xlu0 %v2341_v23, %s4936_s28 }
 0x319   : > { %v4777_v60 = vpop.f32.mrb[14].mxu0 }
 0x31a   : > { %v2108_v22 = vadd.f32 %v4777_v60, %v6748_v52  ;;  %v2102_v47 = vpop.f32.mrb[15].mxu0 }
 0x31b   : > { %v2103_v32 = vadd.f32 %v6748_v52, %v2102_v47 }
 0x31c   : > { %v2206_v61 = vmax.f32 %v2108_v22, 0.0 }
 0x31d   : > { %v2205_v25 = vmax.f32 %v2103_v32, 0.0  ;;  %v2344_v36 = vld [vmem:[#allocation2 + $0xb1] sm:$0xff] }
 0x31e   : > { %2280 = vst.msk [vmem:[#allocation2 + $0xc9] sm:$0xff] %vm1589_vm1, %v2206_v61  ;;  %2648 = vrot.lane.b32.xlu1 %v2344_v36, %s4936_s28  ;;  %v2343_v54 = vld [vmem:[#allocation2 + $0xa9] sm:$0xff] }
 0x31f   : > { %2279 = vst.msk [vmem:[#allocation2 + $0xc1] sm:$0xff] %vm1589_vm1, %v2205_v25  ;;  %2646 = vrot.lane.b32.xlu0 %v2343_v54, %s4936_s28 }
 0x321   : > { %v4780_v37 = vpop.f32.mrb[16].mxu0 }
 0x322   : > { %v2118_v21 = vadd.f32 %v4780_v37, %v6748_v52  ;;  %v2112_v33 = vpop.f32.mrb[17].mxu0 }
 0x323   : > { %v2113_v62 = vadd.f32 %v6748_v52, %v2112_v33 }
 0x324   : > { %v2208_v28 = vmax.f32 %v2118_v21, 0.0 }
 0x325   : > { %v2207_v31 = vmax.f32 %v2113_v62, 0.0  ;;  %v2346_v20 = vld [vmem:[#allocation2 + $0xc9] sm:$0xff] }
 0x326   : > { %2282 = vst.msk [vmem:[#allocation2 + $0xe1] sm:$0xff] %vm1589_vm1, %v2208_v28  ;;  %2652 = vrot.lane.b32.xlu1 %v2346_v20, %s4936_s28  ;;  %v2345_v35 = vld [vmem:[#allocation2 + $0xc1] sm:$0xff] }
 0x327   : > { %2281 = vst.msk [vmem:[#allocation2 + $0xd9] sm:$0xff] %vm1589_vm1, %v2207_v31  ;;  %2650 = vrot.lane.b32.xlu0 %v2345_v35, %s4936_s28 }
 0x329   : > { %v4783_v49 = vpop.f32.mrb[18].mxu0 }
 0x32a   : > { %v2128_v17 = vadd.f32 %v4783_v49, %v6748_v52  ;;  %v2122_v55 = vpop.f32.mrb[19].mxu0 }
 0x32b   : > { %v2123_v16 = vadd.f32 %v6748_v52, %v2122_v55 }
 0x32c   : > { %v2210_v51 = vmax.f32 %v2128_v17, 0.0 }
 0x32d   : > { %v2209_v40 = vmax.f32 %v2123_v16, 0.0  ;;  %v2348_v34 = vld [vmem:[#allocation2 + $0xe1] sm:$0xff]  ;;  %v2362_v16 = vld [vmem:[#allocation2 + $0xa] sm:$0xff] }
 0x32e   : > { %2284 = vst.msk [vmem:[#allocation2 + $0xf9] sm:$0xff] %vm1589_vm1, %v2210_v51  ;;  %2656 = vrot.lane.b32.xlu1 %v2348_v34, %s4936_s28  ;;  %v2347_v42 = vld [vmem:[#allocation2 + $0xd9] sm:$0xff]  ;;  %v2361_v51 = vld [vmem:[#allocation2 + $0x2] sm:$0xff] }
 0x32f   : > { %2283 = vst.msk [vmem:[#allocation2 + $0xf1] sm:$0xff] %vm1589_vm1, %v2209_v40  ;;  %2654 = vrot.lane.b32.xlu0 %v2347_v42, %s4936_s28  ;;  %v6876_v40 = vld [vmem:[#allocation2 + $0x22] sm:$0xff]  ;;  %v6884_v34 = vld [vmem:[#allocation2 + $0x3a] sm:$0xff]  ;;  %v6888_v42 = vld [vmem:[#allocation2 + $0x32] sm:$0xff] }
 0x331   : > { %v4786_v10 = vpop.f32.mrb[20].mxu0 }
 0x332   : > { %v2138_v11 = vadd.f32 %v4786_v10, %v6748_v52  ;;  %v2132_v38 = vpop.f32.mrb[21].mxu0  ;;  %v6892_v10 = vld [vmem:[#allocation2 + $0x52] sm:$0xff] }
 0x333   : > { %v2133_v13 = vadd.f32 %v6748_v52, %v2132_v38  ;;  %v6900_v38 = vld [vmem:[#allocation2 + $0x6a] sm:$0xff] }
 0x334   : > { %v2212_v50 = vmax.f32 %v2138_v11, 0.0  ;;  %v6896_v11 = vld [vmem:[#allocation2 + $0x4a] sm:$0xff] }
 0x335   : > { %v2211_v26 = vmax.f32 %v2133_v13, 0.0  ;;  %v2350_v3 = vld [vmem:[#allocation2 + $0xf9] sm:$0xff]  ;;  %v6904_v13 = vld [vmem:[#allocation2 + $0x62] sm:$0xff] }
 0x336   : > { %2286 = vst.msk [vmem:[#allocation2 + $0x111] sm:$0xff] %vm1589_vm1, %v2212_v50  ;;  %2660 = vrot.lane.b32.xlu1 %v2350_v3, %s4936_s28  ;;  %v2349_v5 = vld [vmem:[#allocation2 + $0xf1] sm:$0xff]  ;;  %v6908_v50 = vld [vmem:[#allocation2 + $0x82] sm:$0xff]  ;;  %v6916_v3 = vld [vmem:[#allocation2 + $0x9a] sm:$0xff] }
 0x337   : > { %2285 = vst.msk [vmem:[#allocation2 + $0x109] sm:$0xff] %vm1589_vm1, %v2211_v26  ;;  %2658 = vrot.lane.b32.xlu0 %v2349_v5, %s4936_s28  ;;  %v6912_v26 = vld [vmem:[#allocation2 + $0x7a] sm:$0xff]  ;;  %v6920_v5 = vld [vmem:[#allocation2 + $0x92] sm:$0xff] }
 0x339   : > { %v4789_v63 = vpop.f32.mrb[22].mxu0 }
 0x33a   : > { %v2148_v19 = vadd.f32 %v4789_v63, %v6748_v52  ;;  %v2142_v43 = vpop.f32.mrb[23].mxu0  ;;  %v6924_v63 = vld [vmem:[#allocation2 + $0xb2] sm:$0xff] }
 0x33b   : > { %v2143_v12 = vadd.f32 %v6748_v52, %v2142_v43  ;;  %v6932_v43 = vld [vmem:[#allocation2 + $0xca] sm:$0xff] }
 0x33c   : > { %v2214_v18 = vmax.f32 %v2148_v19, 0.0  ;;  %v6928_v19 = vld [vmem:[#allocation2 + $0xaa] sm:$0xff] }
 0x33d   : > { %v2213_v4 = vmax.f32 %v2143_v12, 0.0  ;;  %v2352_v8 = vld [vmem:[#allocation2 + $0x111] sm:$0xff]  ;;  %v6936_v12 = vld [vmem:[#allocation2 + $0xc2] sm:$0xff] }
 0x33e   : > { %2288 = vst.msk [vmem:[#allocation2 + $0x129] sm:$0xff] %vm1589_vm1, %v2214_v18  ;;  %2664 = vrot.lane.b32.xlu1 %v2352_v8, %s4936_s28  ;;  %v2351_v14 = vld [vmem:[#allocation2 + $0x109] sm:$0xff]  ;;  %v6948_v8 = vld [vmem:[#allocation2 + $0xfa] sm:$0xff] }
 0x33f   : > { %2287 = vst.msk [vmem:[#allocation2 + $0x121] sm:$0xff] %vm1589_vm1, %v2213_v4  ;;  %2662 = vrot.lane.b32.xlu0 %v2351_v14, %s4936_s28  ;;  %v6940_v18 = vld [vmem:[#allocation2 + $0xe2] sm:$0xff]  ;;  %v6944_v4 = vld [vmem:[#allocation2 + $0xda] sm:$0xff]  ;;  %v6952_v14 = vld [vmem:[#allocation2 + $0xf2] sm:$0xff] }
 0x341   : > { %v4792_v59 = vpop.f32.mrb[24].mxu0 }
 0x342   : > { %v2158_v2 = vadd.f32 %v4792_v59, %v6748_v52  ;;  %v2152_v24 = vpop.f32.mrb[25].mxu0  ;;  %v2384_v59 = vld [vmem:[#allocation2 + $0x112] sm:$0xff] }
 0x343   : > { %v2153_v0 = vadd.f32 %v6748_v52, %v2152_v24  ;;  %v2383_v24 = vld [vmem:[#allocation2 + $0x10a] sm:$0xff] }
 0x344   : > { %v2216_v46 = vmax.f32 %v2158_v2, 0.0  ;;  %v6956_v2 = vpop.permute.xlu1 %2620 }
 0x345   : > { %v2215_v57 = vmax.f32 %v2153_v0, 0.0  ;;  %v2354_v1 = vld [vmem:[#allocation2 + $0x129] sm:$0xff]  ;;  %v6959_v0 = vpop.permute.xlu0 %2618 }
 0x346   : > { %2290 = vst.msk [vmem:[#allocation2 + $0x141] sm:$0xff] %vm1589_vm1, %v2216_v46  ;;  %2668 = vrot.lane.b32.xlu1 %v2354_v1, %s4936_s28  ;;  %v2353_v56 = vld [vmem:[#allocation2 + $0x121] sm:$0xff]  ;;  %v2386_v46 = vld [vmem:[#allocation2 + $0x12a] sm:$0xff] }
 0x347   : > { %2289 = vst.msk [vmem:[#allocation2 + $0x139] sm:$0xff] %vm1589_vm1, %v2215_v57  ;;  %2666 = vrot.lane.b32.xlu0 %v2353_v56, %s4936_s28  ;;  %v2385_v57 = vld [vmem:[#allocation2 + $0x122] sm:$0xff] }
 0x349   : > { %v4795_v39 = vpop.f32.mrb[26].mxu0 }
 0x34a   : > { %v2168_v53 = vadd.f32 %v4795_v39, %v6748_v52  ;;  %v2162_v58 = vpop.f32.mrb[27].mxu0 }
 0x34b   : > { %v2163_v9 = vadd.f32 %v6748_v52, %v2162_v58 }
 0x34c   : > { %v2218_v23 = vmax.f32 %v2168_v53, 0.0 }
 0x34d   : > { %v2217_v60 = vmax.f32 %v2163_v9, 0.0  ;;  %v2356_v22 = vld [vmem:[#allocation2 + $0x141] sm:$0xff] }
 0x34e   : > { %2292 = vst.msk [vmem:[#allocation2 + $0x159] sm:$0xff] %vm1589_vm1, %v2218_v23  ;;  %2672 = vrot.lane.b32.xlu1 %v2356_v22, %s4936_s28  ;;  %v2355_v47 = vld [vmem:[#allocation2 + $0x139] sm:$0xff]  ;;  %v2388_v39 = vld [vmem:[#allocation2 + $0x142] sm:$0xff] }
 0x34f   : > { %2291 = vst.msk [vmem:[#allocation2 + $0x151] sm:$0xff] %vm1589_vm1, %v2217_v60  ;;  %2670 = vrot.lane.b32.xlu0 %v2355_v47, %s4936_s28  ;;  %v2387_v53 = vld [vmem:[#allocation2 + $0x13a] sm:$0xff] }
 0x351   : > { %v4798_v32 = vpop.f32.mrb[28].mxu0 }
 0x352   : > { %v2178_v61 = vadd.f32 %v4798_v32, %v6748_v52  ;;  %v2172_v25 = vpop.f32.mrb[29].mxu0 }
 0x353   : > { %v2173_v36 = vadd.f32 %v6748_v52, %v2172_v25 }
 0x354   : > { %v2220_v54 = vmax.f32 %v2178_v61, 0.0  ;;  %v6980_v61 = vld [vmem:[#allocation2 + $0x20] sm:$0xff] }
 0x355   : > { %v2219_v37 = vmax.f32 %v2173_v36, 0.0  ;;  %v2358_v21 = vld [vmem:[#allocation2 + $0x159] sm:$0xff] }
 0x356   : > { %2294 = vst.msk [vmem:[#allocation2 + $0x171] sm:$0xff] %vm1589_vm1, %v2220_v54  ;;  %2676 = vrot.lane.b32.xlu1 %v2358_v21, %s4936_s28  ;;  %v2357_v33 = vld [vmem:[#allocation2 + $0x151] sm:$0xff]  ;;  %v2390_v58 = vld [vmem:[#allocation2 + $0x15a] sm:$0xff] }
 0x357   : > { %2293 = vst.msk [vmem:[#allocation2 + $0x169] sm:$0xff] %vm1589_vm1, %v2219_v37  ;;  %2674 = vrot.lane.b32.xlu0 %v2357_v33, %s4936_s28  ;;  %v2389_v23 = vld [vmem:[#allocation2 + $0x152] sm:$0xff] }
 0x358   : > { %v6984_v36 = vld [vmem:[#allocation2 + $0x18] sm:$0xff]  ;;  %v6996_v33 = vld [vmem:[#allocation2 + $0x30] sm:$0xff] }
 0x359   : > { %v4801_v62 = vpop.f32.mrb[30].mxu0  ;;  %v6992_v37 = vld [vmem:[#allocation2 + $0x38] sm:$0xff] }
 0x35a   : > { %v2188_v28 = vadd.f32 %v4801_v62, %v6748_v52  ;;  %v2182_v31 = vpop.f32.mrb[31].mxu0 }
 0x35b   : > { %v2183_v20 = vadd.f32 %v6748_v52, %v2182_v31  ;;  %v6880_v52 = vld [vmem:[#allocation2 + $0x1a] sm:$0xff] }
 0x35c   : > { %v2222_v35 = vmax.f32 %v2188_v28, 0.0  ;;  %v7004_v28 = vld [vmem:[#allocation2 + $0x50] sm:$0xff] }
 0x35d   : > { %v2221_v49 = vmax.f32 %v2183_v20, 0.0  ;;  %v2360_v17 = vld [vmem:[#allocation2 + $0x171] sm:$0xff]  ;;  %v7008_v20 = vld [vmem:[#allocation2 + $0x48] sm:$0xff] }
 0x35e   : > { %2296 = vst.msk [vmem:[#allocation2 + $0x189] sm:$0xff] %vm1589_vm1, %v2222_v35  ;;  %2680 = vrot.lane.b32.xlu1 %v2360_v17, %s4936_s28  ;;  %v2359_v55 = vld [vmem:[#allocation2 + $0x169] sm:$0xff]  ;;  %v2392_v22 = vld [vmem:[#allocation2 + $0x172] sm:$0xff] }
 0x35f   : > { %2295 = vst.msk [vmem:[#allocation2 + $0x181] sm:$0xff] %vm1589_vm1, %v2221_v49  ;;  %2678 = vrot.lane.b32.xlu0 %v2359_v55, %s4936_s28  ;;  %v2391_v47 = vld [vmem:[#allocation2 + $0x16a] sm:$0xff]  ;;  %v7020_v55 = vld [vmem:[#allocation2 + $0x60] sm:$0xff] }
 0x360   : > { %v7016_v49 = vld [vmem:[#allocation2 + $0x68] sm:$0xff] }
 0x362   : > { %2748 = vrot.lane.b32.xlu1 %v2362_v16, %s4937_s29 }
 0x363   : > { %2746 = vrot.lane.b32.xlu0 %v2361_v51, %s4937_s29  ;;  %v7028_v51 = vld [vmem:[#allocation2 + $0x80] sm:$0xff] }
 0x364   : > { %8457 = vst [vmem:[#allocation68_spill] sm:$0xff] %v7028_v51 }
 0x366   : > { %2752 = vrot.lane.b32.xlu1 %v6876_v40, %s4937_s29 }
 0x367   : > { %2750 = vrot.lane.b32.xlu0 %v6880_v52, %s4937_s29  ;;  %v6964_v1 = vpop.permute.xlu1 %2624 }
 0x368   : > { %v6966_v56 = vpop.permute.xlu0 %2622 }
 0x36a   : > { %2756 = vrot.lane.b32.xlu1 %v6884_v34, %s4937_s29 }
 0x36b   : > { %2754 = vrot.lane.b32.xlu0 %v6888_v42, %s4937_s29  ;;  %v6970_v9 = vpop.permute.xlu1 %2628 }
 0x36c   : > { %v6973_v60 = vpop.permute.xlu0 %2626 }
 0x36e   : > { %2760 = vrot.lane.b32.xlu1 %v6892_v10, %s4937_s29 }
 0x36f   : > { %2758 = vrot.lane.b32.xlu0 %v6896_v11, %s4937_s29 }
 0x370   : > { %v6978_v32 = vpop.permute.xlu1 %2632 }
 0x371   : > { %8449 = vst [vmem:[#allocation4_spill] sm:$0xff] %v6978_v32  ;;  %v6982_v25 = vpop.permute.xlu0 %2630  ;;  %v3869_v32 = vld [vmem:[%s8058_s4 + $0x18] sm:$0xff] }
 0x372   : > { %2764 = vrot.lane.b32.xlu1 %v6900_v38, %s4937_s29 }
 0x373   : > { %2762 = vrot.lane.b32.xlu0 %v6904_v13, %s4937_s29 }
 0x376   : > { %2768 = vrot.lane.b32.xlu1 %v6908_v50, %s4937_s29 }
 0x377   : > { %2766 = vrot.lane.b32.xlu0 %v6912_v26, %s4937_s29 }
 0x378   : > { %v6990_v54 = vpop.permute.xlu1 %2636 }
 0x379   : > { %8450 = vst [vmem:[#allocation65_spill] sm:$0xff] %v6990_v54  ;;  %v6994_v21 = vpop.permute.xlu0 %2634  ;;  %v7102_v54 = vld [vmem:[#allocation2 + $0x108] sm:$0xff] }
 0x37a   : > { %2772 = vrot.lane.b32.xlu1 %v6916_v3, %s4937_s29  ;;  %8451 = vst [vmem:[#allocation3_spill] sm:$0xff] %v6994_v21 }
 0x37b   : > { %2770 = vrot.lane.b32.xlu0 %v6920_v5, %s4937_s29 }
 0x37e   : > { %2776 = vrot.lane.b32.xlu1 %v6924_v63, %s4937_s29 }
 0x37f   : > { %2774 = vrot.lane.b32.xlu0 %v6928_v19, %s4937_s29 }
 0x380   : > { %v7002_v62 = vpop.permute.xlu1 %2640 }
 0x381   : > { %8452 = vst [vmem:[#allocation15_spill] sm:$0xff] %v7002_v62  ;;  %v7006_v31 = vpop.permute.xlu0 %2638 }
 0x382   : > { %2780 = vrot.lane.b32.xlu1 %v6932_v43, %s4937_s29  ;;  %8453 = vst [vmem:[#allocation8_spill] sm:$0xff] %v7006_v31  ;;  %v7092_v31 = vld [vmem:[#allocation2 + $0xf0] sm:$0xff] }
 0x383   : > { %2778 = vrot.lane.b32.xlu0 %v6936_v12, %s4937_s29 }
 0x386   : > { %2784 = vrot.lane.b32.xlu1 %v6940_v18, %s4937_s29 }
 0x387   : > { %2782 = vrot.lane.b32.xlu0 %v6944_v4, %s4937_s29 }
 0x388   : > { %v7014_v35 = vpop.permute.xlu1 %2644 }
 0x389   : > { %8454 = vst [vmem:[#allocation64_spill] sm:$0xff] %v7014_v35  ;;  %v7018_v17 = vpop.permute.xlu0 %2642 }
 0x38a   : > { %2788 = vrot.lane.b32.xlu1 %v6948_v8, %s4937_s29  ;;  %8455 = vst [vmem:[#allocation69_spill] sm:$0xff] %v7018_v17  ;;  %v7080_v17 = vld [vmem:[#allocation2 + $0xd8] sm:$0xff] }
 0x38b   : > { %2786 = vrot.lane.b32.xlu0 %v6952_v14, %s4937_s29 }
 0x38e   : > { %2792 = vrot.lane.b32.xlu1 %v2384_v59, %s4937_s29 }
 0x38f   : > { %2790 = vrot.lane.b32.xlu0 %v2383_v24, %s4937_s29  ;;  %v7032_v24 = vld [vmem:[#allocation2 + $0x78] sm:$0xff] }
 0x390   : > { %v7026_v16 = vpop.permute.xlu1 %2648  ;;  %8459 = vst [vmem:[#allocation12_spill] sm:$0xff] %v7032_v24 }
 0x391   : > { %8456 = vst [vmem:[#allocation7_spill] sm:$0xff] %v7026_v16  ;;  %v7030_v59 = vpop.permute.xlu0 %2646 }
 0x392   : > { %2796 = vrot.lane.b32.xlu1 %v2386_v46, %s4937_s29  ;;  %8458 = vst [vmem:[#allocation11_spill] sm:$0xff] %v7030_v59  ;;  %v7068_v59 = vld [vmem:[#allocation2 + $0xc0] sm:$0xff] }
 0x393   : > { %2794 = vrot.lane.b32.xlu0 %v2385_v57, %s4937_s29  ;;  %v7040_v57 = vld [vmem:[#allocation2 + $0x98] sm:$0xff]  ;;  %8470 = vst [vmem:[#allocation50_spill] sm:$0xff] %v7068_v59 }
 0x394   : > { %8461 = vst [vmem:[#allocation71_spill] sm:$0xff] %v7040_v57 }
 0x396   : > { %2800 = vrot.lane.b32.xlu1 %v2388_v39, %s4937_s29 }
 0x397   : > { %2798 = vrot.lane.b32.xlu0 %v2387_v53, %s4937_s29  ;;  %v7044_v53 = vld [vmem:[#allocation2 + $0x90] sm:$0xff] }
 0x398   : > { %v7038_v46 = vpop.permute.xlu1 %2652  ;;  %8463 = vst [vmem:[#allocation14_spill] sm:$0xff] %v7044_v53 }
 0x399   : > { %8460 = vst [vmem:[#allocation70_spill] sm:$0xff] %v7038_v46  ;;  %v7042_v39 = vpop.permute.xlu0 %2650 }
 0x39a   : > { %2804 = vrot.lane.b32.xlu1 %v2390_v58, %s4937_s29  ;;  %8462 = vst [vmem:[#allocation13_spill] sm:$0xff] %v7042_v39  ;;  %v7064_v39 = vld [vmem:[#allocation2 + $0xc8] sm:$0xff] }
 0x39b   : > { %2802 = vrot.lane.b32.xlu0 %v2389_v23, %s4937_s29  ;;  %v7052_v23 = vld [vmem:[#allocation2 + $0xb0] sm:$0xff] }
 0x39c   : > { %8465 = vst [vmem:[#allocation73_spill] sm:$0xff] %v7052_v23 }
 0x39e   : > { %2808 = vrot.lane.b32.xlu1 %v2392_v22, %s4937_s29 }
 0x39f   : > { %2806 = vrot.lane.b32.xlu0 %v2391_v47, %s4937_s29  ;;  %v7056_v47 = vld [vmem:[#allocation2 + $0xa8] sm:$0xff] }
 0x3a0   : > { %v7050_v58 = vpop.permute.xlu1 %2656  ;;  %8467 = vst [vmem:[#allocation17_spill] sm:$0xff] %v7056_v47 }
 0x3a1   : > { %8464 = vst [vmem:[#allocation72_spill] sm:$0xff] %v7050_v58  ;;  %v7054_v22 = vpop.permute.xlu0 %2654 }
 0x3a2   : > { %2876 = vrot.lane.b32.xlu1 %v6980_v61, %s4938_s30  ;;  %8466 = vst [vmem:[#allocation16_spill] sm:$0xff] %v7054_v22  ;;  %v7076_v22 = vld [vmem:[#allocation2 + $0xe0] sm:$0xff] }
 0x3a3   : > { %2874 = vrot.lane.b32.xlu0 %v6984_v36, %s4938_s30 }
 0x3a6   : > { %2880 = vrot.lane.b32.xlu1 %v6992_v37, %s4938_s30 }
 0x3a7   : > { %2878 = vrot.lane.b32.xlu0 %v6996_v33, %s4938_s30 }
 0x3a8   : > { %v7062_v46 = vpop.permute.xlu1 %2660 }
 0x3a9   : > { %8468 = vst [vmem:[#allocation20_spill] sm:$0xff] %v7062_v46  ;;  %v7066_v16 = vpop.permute.xlu0 %2658 }
 0x3aa   : > { %2884 = vrot.lane.b32.xlu1 %v7004_v28, %s4938_s30  ;;  %8469 = vst [vmem:[#allocation21_spill] sm:$0xff] %v7066_v16  ;;  %v7088_v16 = vld [vmem:[#allocation2 + $0xf8] sm:$0xff] }
 0x3ab   : > { %2882 = vrot.lane.b32.xlu0 %v7008_v20, %s4938_s30 }
 0x3ae   : > { %2888 = vrot.lane.b32.xlu1 %v7016_v49, %s4938_s30 }
 0x3af   : > { %2886 = vrot.lane.b32.xlu0 %v7020_v55, %s4938_s30 }
 0x3b0   : > { %v7074_v58 = vpop.permute.xlu1 %2664 }
 0x3b1   : > { %8471 = vst [vmem:[#allocation51_spill] sm:$0xff] %v7074_v58  ;;  %v7078_v35 = vpop.permute.xlu0 %2662 }
 0x3b2   : > { %2892 = vrot.lane.b32.xlu1 %v7028_v51, %s4938_s30  ;;  %8472 = vst [vmem:[#allocation126_spill] sm:$0xff] %v7078_v35 }
 0x3b3   : > { %2890 = vrot.lane.b32.xlu0 %v7032_v24, %s4938_s30 }
 0x3b6   : > { %2896 = vrot.lane.b32.xlu1 %v7040_v57, %s4938_s30 }
 0x3b7   : > { %2894 = vrot.lane.b32.xlu0 %v7044_v53, %s4938_s30 }
 0x3b8   : > { %v7086_v46 = vpop.permute.xlu1 %2668 }
 0x3b9   : > { %8473 = vst [vmem:[#allocation127_spill] sm:$0xff] %v7086_v46  ;;  %v7090_v62 = vpop.permute.xlu0 %2666  ;;  %v3866_v46 = vld [vmem:[%s8058_s4] sm:$0xff] }
 0x3ba   : > { %2900 = vrot.lane.b32.xlu1 %v7052_v23, %s4938_s30  ;;  %8474 = vst [vmem:[#allocation24_spill] sm:$0xff] %v7090_v62  ;;  %v3867_v62 = vld [vmem:[%s8058_s4 + $0x8] sm:$0xff] }
 0x3bb   : > { %2898 = vrot.lane.b32.xlu0 %v7056_v47, %s4938_s30  ;;  %v4868_v21 = vpack.c.bf16 %v3867_v62, %v3866_v46 }
 0x3bd   : > { %4869 = vmatprep.subr.bf16.mxu1 %v4868_v21 }
 0x3be   : > { %2904 = vrot.lane.b32.xlu1 %v7064_v39, %s4938_s30  ;;  %4871 = vmatpush3.bf16.msra.mxu1 %v4868_v21 }
 0x3bf   : > { %2902 = vrot.lane.b32.xlu0 %v7068_v59, %s4938_s30 }
 0x3c0   : > { %v7098_v58 = vpop.permute.xlu1 %2672 }
 0x3c1   : > { %8475 = vst [vmem:[#allocation25_spill] sm:$0xff] %v7098_v58  ;;  %v7100_v35 = vpop.permute.xlu0 %2670 }
 0x3c2   : > { %2908 = vrot.lane.b32.xlu1 %v7076_v22, %s4938_s30  ;;  %8476 = vst [vmem:[#allocation74_spill] sm:$0xff] %v7100_v35 }
 0x3c3   : > { %2906 = vrot.lane.b32.xlu0 %v7080_v17, %s4938_s30 }
 0x3c6   : > { %2912 = vrot.lane.b32.xlu1 %v7088_v16, %s4938_s30 }
 0x3c7   : > { %2910 = vrot.lane.b32.xlu0 %v7092_v31, %s4938_s30 }
 0x3c8   : > { %v7114_v58 = vpop.permute.xlu1 %2676 }
 0x3c9   : > { %8477 = vst [vmem:[#allocation75_spill] sm:$0xff] %v7114_v58  ;;  %v7116_v35 = vpop.permute.xlu0 %2674 }
 0x3ca   : > { %3002 = vrot.lane.b32.xlu1 %v6764_v41, %s4939_s7  ;;  %8478 = vst [vmem:[#allocation94_spill] sm:$0xff] %v7116_v35  ;;  %v3868_v41 = vld [vmem:[%s8058_s4 + $0x10] sm:$0xff] }
 0x3cb   : > { %2914 = vrot.lane.b32.xlu0 %v7102_v54, %s4938_s30  ;;  %v4872_v62 = vpack.c.bf16 %v3869_v32, %v3868_v41 }
 0x3cd   : > { %4873 = vmatprep.subr.bf16.mxu1 %v4872_v62 }
 0x3ce   : > { %3130 = vrot.lane.b32.xlu1 %v6880_v52, %s4940_s8  ;;  %4875 = vmatpush3.bf16.msra.mxu1 %v4872_v62  ;;  %v3870_v52 = vld [vmem:[%s8058_s4 + $0x20] sm:$0xf] }
 0x3cf   : > { %3004 = vrot.lane.b32.xlu0 %v6760_v44, %s4939_s7  ;;  %4810 = vmatprep.subr.msk.mxu1 %vm1962_vm0, %v3870_v52 }
 0x3d0   : > { %v7128_v46 = vpop.permute.xlu1 %2680 }
 0x3d1   : > { %8479 = vst [vmem:[#allocation95_spill] sm:$0xff] %v7128_v46  ;;  %v7130_v58 = vpop.permute.xlu0 %2678 }
 0x3d2   : > { %8480 = vst [vmem:[#allocation5_spill] sm:$0xff] %v7130_v58  ;;  %3258 = vrot.lane.b32.xlu1 %v6996_v33, %s4941_s9  ;;  %4811 = vmatpush3.msk.msra.mxu1 %vm1962_vm0, %v3870_v52 }
 0x3d3   : > { %3132 = vrot.lane.b32.xlu0 %v6876_v40, %s4940_s8 }
 0x3d4   : > { %v7139_v21 = vpop.permute.xlu1 %2748 }
 0x3d5   : > { %v7142_v44 = vpop.permute.xlu0 %2746 }
 0x3d6   : > { %3386 = vrot.lane.b32.xlu1 %v6774_v7, %s4942_s20 }
 0x3d7   : > { %3260 = vrot.lane.b32.xlu0 %v6992_v37, %s4941_s9 }
 0x3d8   : > { %v7149_v32 = vpop.permute.xlu1 %2752 }
 0x3d9   : > { %v7151_v40 = vpop.permute.xlu0 %2750 }
 0x3da   : > { %3388 = vrot.lane.b32.xlu1 %v6770_v27, %s4942_s20 }
 0x3db   : > { %3006 = vrot.lane.b32.xlu0 %v6774_v7, %s4939_s7 }
 0x3dc   : > { %v7157_v41 = vpop.permute.xlu1 %2756 }
 0x3dd   : > { %v7159_v62 = vpop.permute.xlu0 %2754 }
 0x3de   : > { %3008 = vrot.lane.b32.xlu1 %v6770_v27, %s4939_s7 }
 0x3df   : > { %3514 = vrot.lane.b32.xlu0 %v6888_v42, %s4943_s23 }
 0x3e0   : > { %v7165_v52 = vpop.permute.xlu1 %2760 }
 0x3e1   : > { %v7167_v46 = vpop.permute.xlu0 %2758 }
 0x3e2   : > { %3516 = vrot.lane.b32.xlu1 %v6884_v34, %s4943_s23 }
 0x3e3   : > { %3134 = vrot.lane.b32.xlu0 %v6888_v42, %s4940_s8 }
 0x3e4   : > { %v7173_v7 = vpop.permute.xlu1 %2764 }
 0x3e5   : > { %8481 = vst [vmem:[#allocation6_spill] sm:$0xff] %v7173_v7  ;;  %v7175_v58 = vpop.permute.xlu0 %2762 }
 0x3e6   : > { %3262 = vrot.lane.b32.xlu1 %v7008_v20, %s4941_s9 }
 0x3e7   : > { %3136 = vrot.lane.b32.xlu0 %v6884_v34, %s4940_s8 }
 0x3e8   : > { %v7181_v27 = vpop.permute.xlu1 %2768 }
 0x3e9   : > { %8482 = vst [vmem:[#allocation54_spill] sm:$0xff] %v7181_v27  ;;  %v7183_v35 = vpop.permute.xlu0 %2766 }
 0x3ea   : > { %8483 = vst [vmem:[#allocation55_spill] sm:$0xff] %v7183_v35  ;;  %3390 = vrot.lane.b32.xlu1 %v6785_v6, %s4942_s20 }
 0x3eb   : > { %3264 = vrot.lane.b32.xlu0 %v7004_v28, %s4941_s9 }
 0x3ec   : > { %v7189_v42 = vpop.permute.xlu1 %2772 }
 0x3ed   : > { %8484 = vst [vmem:[#allocation128_spill] sm:$0xff] %v7189_v42  ;;  %v7191_v7 = vpop.permute.xlu0 %2770 }
 0x3ee   : > { %8485 = vst [vmem:[#allocation129_spill] sm:$0xff] %v7191_v7  ;;  %3392 = vrot.lane.b32.xlu1 %v6780_v45, %s4942_s20 }
 0x3ef   : > { %3010 = vrot.lane.b32.xlu0 %v6785_v6, %s4939_s7 }
 0x3f0   : > { %v7197_v34 = vpop.permute.xlu1 %2776 }
 0x3f1   : > { %8486 = vst [vmem:[#allocation28_spill] sm:$0xff] %v7197_v34  ;;  %v7199_v27 = vpop.permute.xlu0 %2774 }
 0x3f2   : > { %8487 = vst [vmem:[#allocation29_spill] sm:$0xff] %v7199_v27  ;;  %3012 = vrot.lane.b32.xlu1 %v6780_v45, %s4939_s7 }
 0x3f3   : > { %3518 = vrot.lane.b32.xlu0 %v6896_v11, %s4943_s23 }
 0x3f4   : > { %v7205_v35 = vpop.permute.xlu1 %2780 }
 0x3f5   : > { %8488 = vst [vmem:[#allocation76_spill] sm:$0xff] %v7205_v35  ;;  %v7207_v42 = vpop.permute.xlu0 %2778 }
 0x3f6   : > { %8489 = vst [vmem:[#allocation77_spill] sm:$0xff] %v7207_v42  ;;  %3520 = vrot.lane.b32.xlu1 %v6892_v10, %s4943_s23  ;;  %v2531_v42 = vld [vmem:[#allocation2 + $0x99] sm:$0xff] }
 0x3f7   : > { %3138 = vrot.lane.b32.xlu0 %v6896_v11, %s4940_s8 }
 0x3f8   : > { %v7213_v6 = vpop.permute.xlu1 %2784 }
 0x3f9   : > { %8490 = vst [vmem:[#allocation96_spill] sm:$0xff] %v7213_v6  ;;  %v7215_v34 = vpop.permute.xlu0 %2782 }
 0x3fa   : > { %8491 = vst [vmem:[#allocation97_spill] sm:$0xff] %v7215_v34  ;;  %3266 = vrot.lane.b32.xlu1 %v7020_v55, %s4941_s9 }
 0x3fb   : > { %3140 = vrot.lane.b32.xlu0 %v6892_v10, %s4940_s8 }
 0x3fc   : > { %v7221_v45 = vpop.permute.xlu1 %2788 }
 0x3fd   : > { %8492 = vst [vmem:[#allocation9_spill] sm:$0xff] %v7221_v45  ;;  %v7223_v35 = vpop.permute.xlu0 %2786 }
 0x3fe   : > { %8493 = vst [vmem:[#allocation10_spill] sm:$0xff] %v7223_v35  ;;  %3394 = vrot.lane.b32.xlu1 %v6797_v48, %s4942_s20 }
 0x3ff   : > { %3268 = vrot.lane.b32.xlu0 %v7016_v49, %s4941_s9 }
 0x400   : > { %v7229_v11 = vpop.permute.xlu1 %2792 }
 0x401   : > { %8494 = vst [vmem:[#allocation58_spill] sm:$0xff] %v7229_v11  ;;  %v7231_v6 = vpop.permute.xlu0 %2790 }
 0x402   : > { %8495 = vst [vmem:[#allocation59_spill] sm:$0xff] %v7231_v6  ;;  %3396 = vrot.lane.b32.xlu1 %v6792_v15, %s4942_s20  ;;  %v2530_v6 = vld [vmem:[#allocation2 + $0x91] sm:$0xff] }
 0x403   : > { %3014 = vrot.lane.b32.xlu0 %v6797_v48, %s4939_s7 }
 0x404   : > { %v7237_v10 = vpop.permute.xlu1 %2796 }
 0x405   : > { %8496 = vst [vmem:[#allocation130_spill] sm:$0xff] %v7237_v10  ;;  %v7239_v45 = vpop.permute.xlu0 %2794 }
 0x406   : > { %8497 = vst [vmem:[#allocation131_spill] sm:$0xff] %v7239_v45  ;;  %3016 = vrot.lane.b32.xlu1 %v6792_v15, %s4939_s7 }
 0x407   : > { %3522 = vrot.lane.b32.xlu0 %v6904_v13, %s4943_s23 }
 0x408   : > { %v7245_v35 = vpop.permute.xlu1 %2800 }
 0x409   : > { %8498 = vst [vmem:[#allocation32_spill] sm:$0xff] %v7245_v35  ;;  %v7247_v11 = vpop.permute.xlu0 %2798 }
 0x40a   : > { %8499 = vst [vmem:[#allocation33_spill] sm:$0xff] %v7247_v11  ;;  %3524 = vrot.lane.b32.xlu1 %v6900_v38, %s4943_s23 }
 0x40b   : > { %3142 = vrot.lane.b32.xlu0 %v6904_v13, %s4940_s8 }
 0x40c   : > { %v7253_v48 = vpop.permute.xlu1 %2804 }
 0x40d   : > { %8500 = vst [vmem:[#allocation78_spill] sm:$0xff] %v7253_v48  ;;  %v7255_v10 = vpop.permute.xlu0 %2802 }
 0x40e   : > { %8501 = vst [vmem:[#allocation79_spill] sm:$0xff] %v7255_v10  ;;  %3270 = vrot.lane.b32.xlu1 %v7032_v24, %s4941_s9 }
 0x40f   : > { %3144 = vrot.lane.b32.xlu0 %v6900_v38, %s4940_s8 }
 0x410   : > { %v7261_v15 = vpop.permute.xlu1 %2808 }
 0x411   : > { %8502 = vst [vmem:[#allocation98_spill] sm:$0xff] %v7261_v15  ;;  %v7263_v35 = vpop.permute.xlu0 %2806 }
 0x412   : > { %8503 = vst [vmem:[#allocation99_spill] sm:$0xff] %v7263_v35  ;;  %3398 = vrot.lane.b32.xlu1 %v6809_v30, %s4942_s20 }
 0x413   : > { %3272 = vrot.lane.b32.xlu0 %v7028_v51, %s4941_s9 }
 0x414   : > { %v7269_v13 = vpop.permute.xlu1 %2876 }
 0x415   : > { %v7271_v48 = vpop.permute.xlu0 %2874 }
 0x416   : > { %3400 = vrot.lane.b32.xlu1 %v6804_v29, %s4942_s20 }
 0x417   : > { %3018 = vrot.lane.b32.xlu0 %v6809_v30, %s4939_s7 }
 0x418   : > { %v7277_v38 = vpop.permute.xlu1 %2880 }
 0x419   : > { %v7279_v15 = vpop.permute.xlu0 %2878 }
 0x41a   : > { %3020 = vrot.lane.b32.xlu1 %v6804_v29, %s4939_s7 }
 0x41b   : > { %3526 = vrot.lane.b32.xlu0 %v6912_v26, %s4943_s23 }
 0x41c   : > { %v7285_v35 = vpop.permute.xlu1 %2884 }
 0x41d   : > { %v7287_v10 = vpop.permute.xlu0 %2882 }
 0x41e   : > { %3528 = vrot.lane.b32.xlu1 %v6908_v50, %s4943_s23 }
 0x41f   : > { %3146 = vrot.lane.b32.xlu0 %v6912_v26, %s4940_s8 }
 0x420   : > { %v7293_v30 = vpop.permute.xlu1 %2888 }
 0x421   : > { %v7295_v11 = vpop.permute.xlu0 %2886 }
 0x422   : > { %3274 = vrot.lane.b32.xlu1 %v7044_v53, %s4941_s9 }
 0x423   : > { %3148 = vrot.lane.b32.xlu0 %v6908_v50, %s4940_s8 }
 0x424   : > { %v7301_v29 = vpop.permute.xlu1 %2892 }
 0x425   : > { %v7303_v45 = vpop.permute.xlu0 %2890 }
 0x426   : > { %3402 = vrot.lane.b32.xlu1 %v2530_v6, %s4942_s20 }
 0x427   : > { %3276 = vrot.lane.b32.xlu0 %v7040_v57, %s4941_s9 }
 0x428   : > { %v7308_v26 = vpop.permute.xlu1 %2896 }
 0x429   : > { %8504 = vst [vmem:[#allocation18_spill] sm:$0xff] %v7308_v26  ;;  %v7310_v34 = vpop.permute.xlu0 %2894 }
 0x42a   : > { %8505 = vst [vmem:[#allocation19_spill] sm:$0xff] %v7310_v34  ;;  %3404 = vrot.lane.b32.xlu1 %v2531_v42, %s4942_s20  ;;  %v2534_v34 = vld [vmem:[#allocation2 + $0xc1] sm:$0xff] }
 0x42b   : > { %3022 = vrot.lane.b32.xlu0 %v2530_v6, %s4939_s7 }
 0x42c   : > { %v7314_v50 = vpop.permute.xlu1 %2900 }
 0x42d   : > { %8506 = vst [vmem:[#allocation62_spill] sm:$0xff] %v7314_v50  ;;  %v7316_v27 = vpop.permute.xlu0 %2898 }
 0x42e   : > { %8507 = vst [vmem:[#allocation63_spill] sm:$0xff] %v7316_v27  ;;  %3024 = vrot.lane.b32.xlu1 %v2531_v42, %s4939_s7 }
 0x42f   : > { %3530 = vrot.lane.b32.xlu0 %v6920_v5, %s4943_s23 }
 0x430   : > { %v7321_v7 = vpop.permute.xlu1 %2904 }
 0x431   : > { %8508 = vst [vmem:[#allocation132_spill] sm:$0xff] %v7321_v7  ;;  %v7323_v57 = vpop.permute.xlu0 %2902 }
 0x432   : > { %8509 = vst [vmem:[#allocation133_spill] sm:$0xff] %v7323_v57  ;;  %3532 = vrot.lane.b32.xlu1 %v6916_v3, %s4943_s23  ;;  %v2532_v57 = vld [vmem:[#allocation2 + $0xa9] sm:$0xff] }
 0x433   : > { %3150 = vrot.lane.b32.xlu0 %v6920_v5, %s4940_s8 }
 0x434   : > { %v7329_v6 = vpop.permute.xlu1 %2908 }
 0x435   : > { %8510 = vst [vmem:[#allocation36_spill] sm:$0xff] %v7329_v6  ;;  %v7331_v50 = vpop.permute.xlu0 %2906 }
 0x436   : > { %8511 = vst [vmem:[#allocation37_spill] sm:$0xff] %v7331_v50  ;;  %3278 = vrot.lane.b32.xlu1 %v7056_v47, %s4941_s9  ;;  %v2533_v50 = vld [vmem:[#allocation2 + $0xb1] sm:$0xff] }
 0x437   : > { %3152 = vrot.lane.b32.xlu0 %v6916_v3, %s4940_s8 }
 0x438   : > { %v7337_v42 = vpop.permute.xlu1 %2912 }
 0x439   : > { %8512 = vst [vmem:[#allocation80_spill] sm:$0xff] %v7337_v42  ;;  %v7339_v7 = vpop.permute.xlu0 %2910 }
 0x43a   : > { %8513 = vst [vmem:[#allocation81_spill] sm:$0xff] %v7339_v7  ;;  %3406 = vrot.lane.b32.xlu1 %v2532_v57, %s4942_s20 }
 0x43b   : > { %3280 = vrot.lane.b32.xlu0 %v7052_v23, %s4941_s9 }
 0x43c   : > { %v3003_v5 = vpop.permute.xlu1 %3002 }
 0x43d   : > { %v7344_v6 = vpop.permute.xlu0 %2914 }
 0x43e   : > { %8514 = vst [vmem:[#allocation100_spill] sm:$0xff] %v7344_v6  ;;  %3408 = vrot.lane.b32.xlu1 %v2533_v50, %s4942_s20  ;;  %v2297_v6 = vld [vmem:[#allocation2] sm:$0xff] }
 0x43f   : > { %3026 = vrot.lane.b32.xlu0 %v2532_v57, %s4939_s7  ;;  %v2298_v57 = vld [vmem:[#allocation2 + $0x8] sm:$0xff] }
 0x440   : > { %v3131_v47 = vpop.permute.xlu1 %3130  ;;  %v3611_v24 = vsel %vm1589_vm1, %v2298_v57, %v6956_v2  ;;  %v2535_v57 = vld [vmem:[#allocation2 + $0xc9] sm:$0xff] }
 0x441   : > { %v3005_v3 = vpop.permute.xlu0 %3004 }
 0x442   : > { %3028 = vrot.lane.b32.xlu1 %v2533_v50, %s4939_s7  ;;  %v3610_v50 = vsel %vm1589_vm1, %v2297_v6, %v6959_v0  ;;  %v3643_v0 = vsel %vm1622_vm2, %v3611_v24, %v7139_v21 }
 0x443   : > { %3534 = vrot.lane.b32.xlu0 %v6928_v19, %s4943_s23  ;;  %v3642_v53 = vsel %vm1622_vm2, %v3610_v50, %v7142_v44 }
 0x444   : > { %v3259_v42 = vpop.permute.xlu1 %3258 }
 0x445   : > { %v3133_v7 = vpop.permute.xlu0 %3132 }
 0x446   : > { %3536 = vrot.lane.b32.xlu1 %v6924_v63, %s4943_s23 }
 0x447   : > { %3154 = vrot.lane.b32.xlu0 %v6928_v19, %s4940_s8  ;;  %v3674_v19 = vsel %vm1655_vm3, %v3642_v53, %v7271_v48  ;;  %v3675_v53 = vsel %vm1655_vm3, %v3643_v0, %v7269_v13 }
 0x448   : > { %v3387_v23 = vpop.permute.xlu1 %3386  ;;  %v3707_v2 = vsel %vm1688_vm4, %v3675_v53, %v3005_v3 }
 0x449   : > { %v3261_v27 = vpop.permute.xlu0 %3260  ;;  %v3739_v50 = vsel %vm1721_vm5, %v3707_v2, %v3133_v7 }
 0x44a   : > { %3282 = vrot.lane.b32.xlu1 %v7068_v59, %s4941_s9  ;;  %v3706_v59 = vsel %vm1688_vm4, %v3674_v19, %v3003_v5  ;;  %v3771_v24 = vsel %vm1754_vm6, %v3739_v50, %v3261_v27 }
 0x44b   : > { %3156 = vrot.lane.b32.xlu0 %v6924_v63, %s4940_s8  ;;  %v3738_v63 = vsel %vm1721_vm5, %v3706_v59, %v3131_v47 }
 0x44c   : > { %v3389_v26 = vpop.permute.xlu1 %3388  ;;  %v3770_v44 = vsel %vm1754_vm6, %v3738_v63, %v3259_v42  ;;  %v2536_v63 = vld [vmem:[#allocation2 + $0xd9] sm:$0xff] }
 0x44d   : > { %v3007_v51 = vpop.permute.xlu0 %3006  ;;  %v3802_v6 = vsel %vm1787_vm7, %v3770_v44, %v3387_v23  ;;  %v3803_v47 = vsel %vm1787_vm7, %v3771_v24, %v3389_v26  ;;  %v3612_v26 = vsel %vm1589_vm1, %v6984_v36, %v6966_v56  ;;  %v2537_v44 = vld [vmem:[#allocation2 + $0xe1] sm:$0xff] }
 0x44e   : > { %3410 = vrot.lane.b32.xlu1 %v2534_v34, %s4942_s20  ;;  %v3644_v3 = vsel %vm1622_vm2, %v3612_v26, %v7151_v40 }
 0x44f   : > { %3284 = vrot.lane.b32.xlu0 %v7064_v39, %s4941_s9  ;;  %v3676_v0 = vsel %vm1655_vm3, %v3644_v3, %v7279_v15 }
 0x450   : > { %v3009_v48 = vpop.permute.xlu1 %3008  ;;  %v3708_v53 = vsel %vm1688_vm4, %v3676_v0, %v3007_v51 }
 0x451   : > { %v3515_v5 = vpop.permute.xlu0 %3514 }
 0x452   : > { %3412 = vrot.lane.b32.xlu1 %v2535_v57, %s4942_s20  ;;  %v3834_v59 = vsel %vm1820_vm8, %v3802_v6, %v3515_v5 }
 0x453   : > { %3030 = vrot.lane.b32.xlu0 %v2534_v34, %s4939_s7  ;;  %4812 = vmatprep.mubr.msk.f32.mxu1 %vm1865_vm9, %v3834_v59 }
 0x454   : > { %v3517_v21 = vpop.permute.xlu1 %3516 }
 0x455   : > { %v3835_v13 = vsel %vm1820_vm8, %v3803_v47, %v3517_v21  ;;  %v3135_v23 = vpop.permute.xlu0 %3134  ;;  %v3614_v47 = vsel %vm1589_vm1, %v6996_v33, %v6973_v60 }
 0x456   : > { %3032 = vrot.lane.b32.xlu1 %v2535_v57, %s4939_s7  ;;  %4813 = vmatmul.mubr.msk.f32.vlgmr.msra.gmra.mrb[0].mxu1 %vm1865_vm9, %v3835_v13  ;;  %v3740_v56 = vsel %vm1721_vm5, %v3708_v53, %v3135_v23  ;;  %v3646_v21 = vsel %vm1622_vm2, %v3614_v47, %v7159_v62 }
 0x457   : > { %3538 = vrot.lane.b32.xlu0 %v6936_v12, %s4943_s23  ;;  %v3678_v23 = vsel %vm1655_vm3, %v3646_v21, %v7287_v10  ;;  %v2478_v21 = vld [vmem:[#allocation2 + $0x112] sm:$0xff] }
 0x458   : > { %v3263_v7 = vpop.permute.xlu1 %3262 }
 0x459   : > { %v3137_v42 = vpop.permute.xlu0 %3136  ;;  %v3772_v40 = vsel %vm1754_vm6, %v3740_v56, %v3263_v7  ;;  %v2538_v7 = vld [vmem:[#allocation2 + $0xf1] sm:$0xff] }
 0x45a   : > { %3540 = vrot.lane.b32.xlu1 %v6932_v43, %s4943_s23 }
 0x45b   : > { %3158 = vrot.lane.b32.xlu0 %v6936_v12, %s4940_s8 }
 0x45c   : > { %v3391_v27 = vpop.permute.xlu1 %3390 }
 0x45d   : > { %v3265_v34 = vpop.permute.xlu0 %3264 }
 0x45e   : > { %3286 = vrot.lane.b32.xlu1 %v7080_v17, %s4941_s9  ;;  %v3613_v17 = vsel %vm1589_vm1, %v6980_v61, %v6964_v1  ;;  %v3804_v61 = vsel %vm1787_vm7, %v3772_v40, %v3391_v27 }
 0x45f   : > { %3160 = vrot.lane.b32.xlu0 %v6932_v43, %s4940_s8  ;;  %v3645_v43 = vsel %vm1622_vm2, %v3613_v17, %v7149_v32 }
 0x460   : > { %v3393_v19 = vpop.permute.xlu1 %3392  ;;  %v3677_v36 = vsel %vm1655_vm3, %v3645_v43, %v7277_v38  ;;  %v3616_v43 = vsel %vm1589_vm1, %v7008_v20, %v6982_v25 }
 0x461   : > { %v3011_v12 = vpop.permute.xlu0 %3010  ;;  %v3709_v1 = vsel %vm1688_vm4, %v3677_v36, %v3009_v48  ;;  %v3648_v56 = vsel %vm1622_vm2, %v3616_v43, %v7167_v46  ;;  %v2543_v43 = vld [vmem:[#allocation2 + $0x129] sm:$0xff] }
 0x462   : > { %3414 = vrot.lane.b32.xlu1 %v2536_v63, %s4942_s20  ;;  %v3741_v2 = vsel %vm1721_vm5, %v3709_v1, %v3137_v42  ;;  %v3710_v42 = vsel %vm1688_vm4, %v3678_v23, %v3011_v12  ;;  %v3680_v40 = vsel %vm1655_vm3, %v3648_v56, %v7295_v11  ;;  %v8515_v1 = vld [vmem:[#allocation4_spill] sm:$0xff] }
 0x463   : > { %3288 = vrot.lane.b32.xlu0 %v7076_v22, %s4941_s9  ;;  %v3773_v22 = vsel %vm1754_vm6, %v3741_v2, %v3265_v34  ;;  %v2539_v34 = vld [vmem:[#allocation2 + $0xf9] sm:$0xff] }
 0x464   : > { %v3013_v15 = vpop.permute.xlu1 %3012  ;;  %v3805_v38 = vsel %vm1787_vm7, %v3773_v22, %v3393_v19 }
 0x465   : > { %v3519_v51 = vpop.permute.xlu0 %3518 }
 0x466   : > { %v3836_v32 = vsel %vm1820_vm8, %v3804_v61, %v3519_v51  ;;  %3416 = vrot.lane.b32.xlu1 %v2537_v44, %s4942_s20  ;;  %v7493_v61 = vld [vmem:[#allocation2 + $0x110] sm:$0xff] }
 0x467   : > { %3034 = vrot.lane.b32.xlu0 %v2536_v63, %s4939_s7  ;;  %4815 = vmatprep.mubr.msk.f32.mxu1 %vm1865_vm9, %v3836_v32 }
 0x468   : > { %v3521_v6 = vpop.permute.xlu1 %3520 }
 0x469   : > { %v3837_v48 = vsel %vm1820_vm8, %v3805_v38, %v3521_v6  ;;  %v3139_v5 = vpop.permute.xlu0 %3138 }
 0x46a   : > { %3036 = vrot.lane.b32.xlu1 %v2537_v44, %s4939_s7  ;;  %4816 = vmatmul.mubr.msk.f32.gmra.mrb[2].mxu1 %vm1865_vm9, %v3837_v48  ;;  %v3742_v60 = vsel %vm1721_vm5, %v3710_v42, %v3139_v5  ;;  %v2572_v5 = vld [vmem:[#allocation2 + $0x10a] sm:$0xff] }
 0x46b   : > { %3542 = vrot.lane.b32.xlu0 %v6944_v4, %s4943_s23 }
 0x46c   : > { %v3267_v57 = vpop.permute.xlu1 %3266 }
 0x46d   : > { %v3141_v50 = vpop.permute.xlu0 %3140  ;;  %v3774_v62 = vsel %vm1754_vm6, %v3742_v60, %v3267_v57  ;;  %v2541_v57 = vld [vmem:[#allocation2 + $0x111] sm:$0xff]  ;;  %v8517_v60 = vld [vmem:[#allocation65_spill] sm:$0xff] }
 0x46e   : > { %3544 = vrot.lane.b32.xlu1 %v6940_v18, %s4943_s23 }
 0x46f   : > { %3162 = vrot.lane.b32.xlu0 %v6944_v4, %s4940_s8 }
 0x470   : > { %v3395_v59 = vpop.permute.xlu1 %3394 }
 0x471   : > { %v3269_v24 = vpop.permute.xlu0 %3268 }
 0x472   : > { %3290 = vrot.lane.b32.xlu1 %v7092_v31, %s4941_s9  ;;  %v3615_v31 = vsel %vm1589_vm1, %v6992_v37, %v6970_v9  ;;  %v3806_v37 = vsel %vm1787_vm7, %v3774_v62, %v3395_v59 }
 0x473   : > { %3164 = vrot.lane.b32.xlu0 %v6940_v18, %s4940_s8  ;;  %v3647_v18 = vsel %vm1622_vm2, %v3615_v31, %v7157_v41  ;;  %v7528_v31 = vld [vmem:[#allocation2 + $0x120] sm:$0xff] }
 0x474   : > { %v3397_v13 = vpop.permute.xlu1 %3396  ;;  %v3679_v33 = vsel %vm1655_vm3, %v3647_v18, %v7285_v35 }
 0x475   : > { %v3015_v4 = vpop.permute.xlu0 %3014  ;;  %v3711_v9 = vsel %vm1688_vm4, %v3679_v33, %v3013_v15  ;;  %v2540_v15 = vld [vmem:[#allocation2 + $0x109] sm:$0xff]  ;;  %v3619_v33 = vsel %vm1589_vm1, %v7016_v49, %v8517_v60 }
 0x476   : > { %3418 = vrot.lane.b32.xlu1 %v2538_v7, %s4942_s20  ;;  %v3743_v26 = vsel %vm1721_vm5, %v3711_v9, %v3141_v50  ;;  %v3712_v25 = vsel %vm1688_vm4, %v3680_v40, %v3015_v4  ;;  %v8519_v40 = vld [vmem:[#allocation8_spill] sm:$0xff] }
 0x477   : > { %3292 = vrot.lane.b32.xlu0 %v7088_v16, %s4941_s9  ;;  %v3775_v16 = vsel %vm1754_vm6, %v3743_v26, %v3269_v24  ;;  %v2542_v26 = vld [vmem:[#allocation2 + $0x121] sm:$0xff] }
 0x478   : > { %v3017_v10 = vpop.permute.xlu1 %3016  ;;  %v3807_v35 = vsel %vm1787_vm7, %v3775_v16, %v3397_v13  ;;  %v8516_v13 = vld [vmem:[#allocation3_spill] sm:$0xff] }
 0x479   : > { %v3523_v27 = vpop.permute.xlu0 %3522  ;;  %v3618_v23 = vsel %vm1589_vm1, %v7020_v55, %v8516_v13  ;;  %v8518_v55 = vld [vmem:[#allocation6_spill] sm:$0xff] }
 0x47a   : > { %v3838_v41 = vsel %vm1820_vm8, %v3806_v37, %v3523_v27  ;;  %3420 = vrot.lane.b32.xlu1 %v2539_v34, %s4942_s20  ;;  %v3650_v4 = vsel %vm1622_vm2, %v3618_v23, %v7175_v58 }
 0x47b   : > { %3038 = vrot.lane.b32.xlu0 %v2538_v7, %s4939_s7  ;;  %4818 = vmatprep.mubr.msk.f32.mxu1 %vm1865_vm9, %v3838_v41  ;;  %v3682_v42 = vsel %vm1655_vm3, %v3650_v4, %v7303_v45  ;;  %v7548_v41 = vld [vmem:[#allocation2 + $0x128] sm:$0xff] }
 0x47c   : > { %v3525_v3 = vpop.permute.xlu1 %3524 }
 0x47d   : > { %v3839_v19 = vsel %vm1820_vm8, %v3807_v35, %v3525_v3  ;;  %v3143_v0 = vpop.permute.xlu0 %3142 }
 0x47e   : > { %3040 = vrot.lane.b32.xlu1 %v2539_v34, %s4939_s7  ;;  %4819 = vmatmul.mubr.msk.f32.gmra.mrb[4].mxu1 %vm1865_vm9, %v3839_v19  ;;  %v3744_v20 = vsel %vm1721_vm5, %v3712_v25, %v3143_v0 }
 0x47f   : > { %3546 = vrot.lane.b32.xlu0 %v6952_v14, %s4943_s23 }
 0x480   : > { %v3271_v12 = vpop.permute.xlu1 %3270 }
 0x481   : > { %v3145_v63 = vpop.permute.xlu0 %3144  ;;  %v3776_v11 = vsel %vm1754_vm6, %v3744_v20, %v3271_v12 }
 0x482   : > { %3548 = vrot.lane.b32.xlu1 %v6948_v8, %s4943_s23 }
 0x483   : > { %3166 = vrot.lane.b32.xlu0 %v6952_v14, %s4940_s8 }
 0x484   : > { %v3399_v17 = vpop.permute.xlu1 %3398 }
 0x485   : > { %v3273_v53 = vpop.permute.xlu0 %3272  ;;  %v3808_v44 = vsel %vm1787_vm7, %v3776_v11, %v3399_v17  ;;  %v2480_v11 = vld [vmem:[#allocation2 + $0x12a] sm:$0xff] }
 0x486   : > { %3294 = vrot.lane.b32.xlu1 %v7102_v54, %s4941_s9  ;;  %v3617_v54 = vsel %vm1589_vm1, %v7004_v28, %v8515_v1  ;;  %v8521_v1 = vld [vmem:[#allocation55_spill] sm:$0xff] }
 0x487   : > { %3168 = vrot.lane.b32.xlu0 %v6948_v8, %s4940_s8  ;;  %v3649_v8 = vsel %vm1622_vm2, %v3617_v54, %v7165_v52 }
 0x488   : > { %v3401_v36 = vpop.permute.xlu1 %3400  ;;  %v3681_v46 = vsel %vm1655_vm3, %v3649_v8, %v7293_v30  ;;  %v8522_v8 = vld [vmem:[#allocation19_spill] sm:$0xff] }
 0x489   : > { %v3019_v14 = vpop.permute.xlu0 %3018  ;;  %v3713_v51 = vsel %vm1688_vm4, %v3681_v46, %v3017_v10  ;;  %v3651_v10 = vsel %vm1622_vm2, %v3619_v33, %v8518_v55 }
 0x48a   : > { %3422 = vrot.lane.b32.xlu1 %v2540_v15, %s4942_s20  ;;  %v3745_v32 = vsel %vm1721_vm5, %v3713_v51, %v3145_v63  ;;  %v3714_v62 = vsel %vm1688_vm4, %v3682_v42, %v3019_v14  ;;  %v3683_v45 = vsel %vm1655_vm3, %v3651_v10, %v7301_v29  ;;  %v8520_v14 = vld [vmem:[#allocation12_spill] sm:$0xff] }
 0x48b   : > { %3296 = vrot.lane.b32.xlu0 %v7493_v61, %s4941_s9  ;;  %v3777_v22 = vsel %vm1754_vm6, %v3745_v32, %v3273_v53  ;;  %v2574_v53 = vld [vmem:[#allocation2 + $0x122] sm:$0xff]  ;;  %v8524_v51 = vld [vmem:[#allocation68_spill] sm:$0xff] }
 0x48c   : > { %v3021_v28 = vpop.permute.xlu1 %3020  ;;  %v3809_v30 = vsel %vm1787_vm7, %v3777_v22, %v3401_v36  ;;  %v8525_v32 = vld [vmem:[#allocation54_spill] sm:$0xff]  ;;  %v2544_v42 = vld [vmem:[#allocation2 + $0x139] sm:$0xff] }
 0x48d   : > { %v3527_v2 = vpop.permute.xlu0 %3526  ;;  %v3715_v49 = vsel %vm1688_vm4, %v3683_v45, %v3021_v28  ;;  %v8523_v28 = vld [vmem:[#allocation15_spill] sm:$0xff]  ;;  %v2576_v10 = vld [vmem:[#allocation2 + $0x13a] sm:$0xff] }
 0x48e   : > { %v3840_v52 = vsel %vm1820_vm8, %v3808_v44, %v3527_v2  ;;  %3042 = vrot.lane.b32.xlu1 %v2540_v15, %s4939_s7  ;;  %v3620_v15 = vsel %vm1589_vm1, %v8520_v14, %v8519_v40  ;;  %v3621_v44 = vsel %vm1589_vm1, %v8524_v51, %v8523_v28  ;;  %v8527_v45 = vld [vmem:[#allocation69_spill] sm:$0xff]  ;;  %v2419_v51 = vld [vmem:[#allocation2 + $0x150] sm:$0xff] }
 0x48f   : > { %2916 = vrot.lane.b32.xlu0 %v7493_v61, %s4938_s30  ;;  %4821 = vmatprep.mubr.msk.f32.mxu1 %vm1865_vm9, %v3840_v52  ;;  %v3652_v54 = vsel %vm1622_vm2, %v3620_v15, %v8521_v1  ;;  %v3653_v52 = vsel %vm1622_vm2, %v3621_v44, %v8525_v32  ;;  %v2482_v1 = vld [vmem:[#allocation2 + $0x142] sm:$0xff]  ;;  %v2546_v32 = vld [vmem:[#allocation2 + $0x151] sm:$0xff] }
 0x490   : > { %v3529_v38 = vpop.permute.xlu1 %3528  ;;  %v3684_v20 = vsel %vm1655_vm3, %v3652_v54, %v8522_v8 }
 0x491   : > { %v3841_v6 = vsel %vm1820_vm8, %v3809_v30, %v3529_v38  ;;  %v3147_v48 = vpop.permute.xlu0 %3146  ;;  %v8526_v30 = vld [vmem:[#allocation18_spill] sm:$0xff] }
 0x492   : > { %3550 = vrot.lane.b32.xlu1 %v2572_v5, %s4943_s23  ;;  %4822 = vmatmul.mubr.msk.f32.gmra.mrb[6].mxu1 %vm1865_vm9, %v3841_v6  ;;  %v3746_v58 = vsel %vm1721_vm5, %v3714_v62, %v3147_v48  ;;  %v3685_v38 = vsel %vm1655_vm3, %v3653_v52, %v8526_v30  ;;  %v2515_v52 = vld [vmem:[#allocation2 + $0x158] sm:$0xff] }
 0x493   : > { %3424 = vrot.lane.b32.xlu0 %v2541_v57, %s4942_s20 }
 0x494   : > { %v3275_v50 = vpop.permute.xlu1 %3274 }
 0x495   : > { %v3149_v59 = vpop.permute.xlu0 %3148  ;;  %v3778_v9 = vsel %vm1754_vm6, %v3746_v58, %v3275_v50  ;;  %v2545_v58 = vld [vmem:[#allocation2 + $0x141] sm:$0xff] }
 0x496   : > { %3170 = vrot.lane.b32.xlu1 %v2572_v5, %s4940_s8  ;;  %v3747_v16 = vsel %vm1721_vm5, %v3715_v49, %v3149_v59  ;;  %v7586_v5 = vld [vmem:[#allocation2 + $0x138] sm:$0xff]  ;;  %v8529_v49 = vld [vmem:[#allocation129_spill] sm:$0xff] }
 0x497   : > { %3044 = vrot.lane.b32.xlu0 %v2541_v57, %s4939_s7 }
 0x498   : > { %v3403_v24 = vpop.permute.xlu1 %3402 }
 0x499   : > { %v3277_v47 = vpop.permute.xlu0 %3276  ;;  %v3810_v27 = vsel %vm1787_vm7, %v3778_v9, %v3403_v24  ;;  %v8528_v9 = vld [vmem:[#allocation14_spill] sm:$0xff] }
 0x49a   : > { %3172 = vrot.lane.b32.xlu1 %v2478_v21, %s4940_s8  ;;  %v3779_v3 = vsel %vm1754_vm6, %v3747_v16, %v3277_v47 }
 0x49b   : > { %3552 = vrot.lane.b32.xlu0 %v2478_v21, %s4943_s23 }
 0x49c   : > { %v3405_v7 = vpop.permute.xlu1 %3404 }
 0x49d   : > { %v3023_v18 = vpop.permute.xlu0 %3022  ;;  %v3811_v29 = vsel %vm1787_vm7, %v3779_v3, %v3405_v7  ;;  %v8531_v3 = vld [vmem:[#allocation64_spill] sm:$0xff] }
 0x49e   : > { %2918 = vrot.lane.b32.xlu1 %v7528_v31, %s4938_s30  ;;  %v3716_v2 = vsel %vm1688_vm4, %v3684_v20, %v3023_v18  ;;  %v2513_v18 = vld [vmem:[#allocation2 + $0x140] sm:$0xff] }
 0x49f   : > { %3298 = vrot.lane.b32.xlu0 %v7528_v31, %s4941_s9 }
 0x4a0   : > { %v3025_v37 = vpop.permute.xlu1 %3024 }
 0x4a1   : > { %v3531_v34 = vpop.permute.xlu0 %3530  ;;  %v3717_v57 = vsel %vm1688_vm4, %v3685_v38, %v3025_v37  ;;  %v3622_v37 = vsel %vm1589_vm1, %v8528_v9, %v8527_v45  ;;  %v8535_v38 = vld [vmem:[#allocation11_spill] sm:$0xff] }
 0x4a2   : > { %v3842_v35 = vsel %vm1820_vm8, %v3810_v27, %v3531_v34  ;;  %3426 = vrot.lane.b32.xlu1 %v2542_v26, %s4942_s20  ;;  %v3654_v27 = vsel %vm1622_vm2, %v3622_v37, %v8529_v49 }
 0x4a3   : > { %3300 = vrot.lane.b32.xlu0 %v7548_v41, %s4941_s9  ;;  %4824 = vmatprep.mubr.msk.f32.mxu1 %vm1865_vm9, %v3842_v35 }
 0x4a4   : > { %v3533_v19 = vpop.permute.xlu1 %3532 }
 0x4a5   : > { %v3843_v0 = vsel %vm1820_vm8, %v3811_v29, %v3533_v19  ;;  %v3151_v12 = vpop.permute.xlu0 %3150  ;;  %v8532_v29 = vld [vmem:[#allocation71_spill] sm:$0xff] }
 0x4a6   : > { %3046 = vrot.lane.b32.xlu1 %v2542_v26, %s4939_s7  ;;  %4825 = vmatmul.mubr.msk.f32.gmra.mrb[8].mxu1 %vm1865_vm9, %v3843_v0  ;;  %v3748_v22 = vsel %vm1721_vm5, %v3716_v2, %v3151_v12  ;;  %v8530_v26 = vld [vmem:[#allocation63_spill] sm:$0xff]  ;;  %v3623_v19 = vsel %vm1589_vm1, %v8532_v29, %v8531_v3  ;;  %v8533_v12 = vld [vmem:[#allocation128_spill] sm:$0xff] }
 0x4a7   : > { %2920 = vrot.lane.b32.xlu0 %v7548_v41, %s4938_s30  ;;  %v3686_v16 = vsel %vm1655_vm3, %v3654_v27, %v8530_v26 }
 0x4a8   : > { %v3279_v63 = vpop.permute.xlu1 %3278 }
 0x4a9   : > { %v3153_v17 = vpop.permute.xlu0 %3152  ;;  %v3780_v6 = vsel %vm1754_vm6, %v3748_v22, %v3279_v63  ;;  %v3655_v63 = vsel %vm1622_vm2, %v3623_v19, %v8533_v12  ;;  %v2484_v19 = vld [vmem:[#allocation2 + $0x15a] sm:$0xff] }
 0x4aa   : > { %3554 = vrot.lane.b32.xlu1 %v2574_v53, %s4943_s23  ;;  %v3749_v24 = vsel %vm1721_vm5, %v3717_v57, %v3153_v17  ;;  %v8537_v57 = vld [vmem:[#allocation29_spill] sm:$0xff] }
 0x4ab   : > { %3428 = vrot.lane.b32.xlu0 %v2543_v43, %s4942_s20 }
 0x4ac   : > { %v3407_v56 = vpop.permute.xlu1 %3406 }
 0x4ad   : > { %v3281_v36 = vpop.permute.xlu0 %3280  ;;  %v3812_v50 = vsel %vm1787_vm7, %v3780_v6, %v3407_v56  ;;  %v8536_v6 = vld [vmem:[#allocation17_spill] sm:$0xff] }
 0x4ae   : > { %3174 = vrot.lane.b32.xlu1 %v2574_v53, %s4940_s8  ;;  %v3781_v21 = vsel %vm1754_vm6, %v3749_v24, %v3281_v36  ;;  %v8534_v53 = vld [vmem:[#allocation62_spill] sm:$0xff]  ;;  %v8538_v24 = vld [vmem:[#allocation133_spill] sm:$0xff] }
 0x4af   : > { %3048 = vrot.lane.b32.xlu0 %v2543_v43, %s4939_s7  ;;  %v3687_v43 = vsel %vm1655_vm3, %v3655_v63, %v8534_v53  ;;  %v2421_v63 = vld [vmem:[#allocation2 + $0x168] sm:$0xff] }
 0x4b0   : > { %v3409_v25 = vpop.permute.xlu1 %3408 }
 0x4b1   : > { %v3027_v46 = vpop.permute.xlu0 %3026  ;;  %v3813_v13 = vsel %vm1787_vm7, %v3781_v21, %v3409_v25 }
 0x4b2   : > { %3176 = vrot.lane.b32.xlu1 %v2480_v11, %s4940_s8  ;;  %v3718_v0 = vsel %vm1688_vm4, %v3686_v16, %v3027_v46 }
 0x4b3   : > { %3556 = vrot.lane.b32.xlu0 %v2480_v11, %s4943_s23 }
 0x4b4   : > { %v3029_v48 = vpop.permute.xlu1 %3028 }
 0x4b5   : > { %v3535_v59 = vpop.permute.xlu0 %3534  ;;  %v3719_v40 = vsel %vm1688_vm4, %v3687_v43, %v3029_v48  ;;  %v3624_v48 = vsel %vm1589_vm1, %v8536_v6, %v8535_v38  ;;  %v2548_v43 = vld [vmem:[#allocation2 + $0x169] sm:$0xff] }
 0x4b6   : > { %v3844_v47 = vsel %vm1820_vm8, %v3812_v50, %v3535_v59  ;;  %2922 = vrot.lane.b32.xlu1 %v7586_v5, %s4938_s30  ;;  %v3656_v50 = vsel %vm1622_vm2, %v3624_v48, %v8537_v57  ;;  %v2580_v48 = vld [vmem:[#allocation2 + $0x16a] sm:$0xff] }
 0x4b7   : > { %3302 = vrot.lane.b32.xlu0 %v7586_v5, %s4941_s9  ;;  %4827 = vmatprep.mubr.msk.f32.mxu1 %vm1865_vm9, %v3844_v47  ;;  %v3688_v47 = vsel %vm1655_vm3, %v3656_v50, %v8538_v24 }
 0x4b8   : > { %v3537_v23 = vpop.permute.xlu1 %3536 }
 0x4b9   : > { %v3845_v4 = vsel %vm1820_vm8, %v3813_v13, %v3537_v23  ;;  %v3155_v7 = vpop.permute.xlu0 %3154  ;;  %v2578_v13 = vld [vmem:[#allocation2 + $0x152] sm:$0xff] }
 0x4ba   : > { %3430 = vrot.lane.b32.xlu1 %v2544_v42, %s4942_s20  ;;  %4828 = vmatmul.mubr.msk.f32.gmra.mrb[10].mxu1 %vm1865_vm9, %v3845_v4  ;;  %v3750_v17 = vsel %vm1721_vm5, %v3718_v0, %v3155_v7  ;;  %v8539_v23 = vld [vmem:[#allocation7_spill] sm:$0xff]  ;;  %v8540_v4 = vld [vmem:[#allocation73_spill] sm:$0xff] }
 0x4bb   : > { %3304 = vrot.lane.b32.xlu0 %v2513_v18, %s4941_s9  ;;  %v3625_v7 = vsel %vm1589_vm1, %v8540_v4, %v8539_v23 }
 0x4bc   : > { %v3283_v60 = vpop.permute.xlu1 %3282 }
 0x4bd   : > { %v3157_v33 = vpop.permute.xlu0 %3156  ;;  %v3782_v56 = vsel %vm1754_vm6, %v3750_v17, %v3283_v60  ;;  %v8541_v60 = vld [vmem:[#allocation28_spill] sm:$0xff] }
 0x4be   : > { %3050 = vrot.lane.b32.xlu1 %v2544_v42, %s4939_s7  ;;  %v3751_v54 = vsel %vm1721_vm5, %v3719_v40, %v3157_v33  ;;  %v3657_v33 = vsel %vm1622_vm2, %v3625_v7, %v8541_v60  ;;  %v8544_v40 = vld [vmem:[#allocation50_spill] sm:$0xff] }
 0x4bf   : > { %2924 = vrot.lane.b32.xlu0 %v2513_v18, %s4938_s30  ;;  %v2547_v18 = vld [vmem:[#allocation2 + $0x159] sm:$0xff] }
 0x4c0   : > { %v3411_v62 = vpop.permute.xlu1 %3410 }
 0x4c1   : > { %v3285_v55 = vpop.permute.xlu0 %3284  ;;  %v3814_v14 = vsel %vm1787_vm7, %v3782_v56, %v3411_v62  ;;  %v2517_v56 = vld [vmem:[#allocation2 + $0x170] sm:$0xff] }
 0x4c2   : > { %3558 = vrot.lane.b32.xlu1 %v2576_v10, %s4943_s23  ;;  %v3783_v8 = vsel %vm1754_vm6, %v3751_v54, %v3285_v55  ;;  %v8542_v55 = vld [vmem:[#allocation132_spill] sm:$0xff] }
 0x4c3   : > { %3432 = vrot.lane.b32.xlu0 %v2545_v58, %s4942_s20 }
 0x4c4   : > { %v3413_v34 = vpop.permute.xlu1 %3412 }
 0x4c5   : > { %v3031_v35 = vpop.permute.xlu0 %3030  ;;  %v3815_v20 = vsel %vm1787_vm7, %v3783_v8, %v3413_v34 }
 0x4c6   : > { %3178 = vrot.lane.b32.xlu1 %v2576_v10, %s4940_s8  ;;  %v3720_v42 = vsel %vm1688_vm4, %v3688_v47, %v3031_v35  ;;  %v3689_v10 = vsel %vm1655_vm3, %v3657_v33, %v8542_v55  ;;  %v2423_v33 = vld [vmem:[#allocation2 + $0x180] sm:$0xff]  ;;  %v8550_v55 = vld [vmem:[#allocation16_spill] sm:$0xff] }
 0x4c7   : > { %3052 = vrot.lane.b32.xlu0 %v2545_v58, %s4939_s7 }
 0x4c8   : > { %v3033_v36 = vpop.permute.xlu1 %3032 }
 0x4c9   : > { %v3539_v15 = vpop.permute.xlu0 %3538  ;;  %v3721_v9 = vsel %vm1688_vm4, %v3689_v10, %v3033_v36  ;;  %v8543_v36 = vld [vmem:[#allocation13_spill] sm:$0xff] }
 0x4ca   : > { %v3846_v25 = vsel %vm1820_vm8, %v3814_v14, %v3539_v15  ;;  %3180 = vrot.lane.b32.xlu1 %v2482_v1, %s4940_s8  ;;  %v3626_v14 = vsel %vm1589_vm1, %v8544_v40, %v8543_v36  ;;  %v8545_v15 = vld [vmem:[#allocation77_spill] sm:$0xff]  ;;  %v8555_v40 = vld [vmem:[#allocation80_spill] sm:$0xff] }
 0x4cb   : > { %3560 = vrot.lane.b32.xlu0 %v2482_v1, %s4943_s23  ;;  %4830 = vmatprep.mubr.msk.f32.mxu1 %vm1865_vm9, %v3846_v25  ;;  %v3658_v1 = vsel %vm1622_vm2, %v3626_v14, %v8545_v15  ;;  %v8546_v25 = vld [vmem:[#allocation37_spill] sm:$0xff] }
 0x4cc   : > { %v3541_v46 = vpop.permute.xlu1 %3540  ;;  %v3690_v8 = vsel %vm1655_vm3, %v3658_v1, %v8546_v25  ;;  %v2582_v1 = vld [vmem:[#allocation2 + $0x182] sm:$0xff] }
 0x4cd   : > { %v3847_v11 = vsel %vm1820_vm8, %v3815_v20, %v3541_v46  ;;  %v3159_v28 = vpop.permute.xlu0 %3158  ;;  %v8547_v46 = vld [vmem:[#allocation70_spill] sm:$0xff] }
 0x4ce   : > { %2926 = vrot.lane.b32.xlu1 %v2419_v51, %s4938_s30  ;;  %4831 = vmatmul.mubr.msk.f32.gmra.mrb[12].mxu1 %vm1865_vm9, %v3847_v11  ;;  %v3752_v62 = vsel %vm1721_vm5, %v3720_v42, %v3159_v28  ;;  %v3627_v11 = vsel %vm1589_vm1, %v7064_v39, %v8547_v46  ;;  %v2486_v42 = vld [vmem:[#allocation2 + $0x172] sm:$0xff]  ;;  %v2551_v25 = vld [vmem:[#allocation2 + $0x189] sm:$0xff] }
 0x4cf   : > { %3306 = vrot.lane.b32.xlu0 %v2419_v51, %s4941_s9  ;;  %v8548_v51 = vld [vmem:[#allocation76_spill] sm:$0xff] }
 0x4d0   : > { %v3287_v44 = vpop.permute.xlu1 %3286 }
 0x4d1   : > { %v3161_v2 = vpop.permute.xlu0 %3160  ;;  %v3784_v58 = vsel %vm1754_vm6, %v3752_v62, %v3287_v44  ;;  %v3659_v44 = vsel %vm1622_vm2, %v3627_v11, %v8548_v51  ;;  %v4923_v62 = vld [vmem:[#allocation2 + $0xd8] sm:$0xff] }
 0x4d2   : > { %3434 = vrot.lane.b32.xlu1 %v2546_v32, %s4942_s20  ;;  %v3753_v27 = vsel %vm1721_vm5, %v3721_v9, %v3161_v2  ;;  %v3628_v10 = vsel %vm1589_vm1, %v4923_v62, %v8550_v55  ;;  %v8552_v9 = vld [vmem:[#allocation81_spill] sm:$0xff] }
 0x4d3   : > { %3308 = vrot.lane.b32.xlu0 %v2515_v52, %s4941_s9  ;;  %v2584_v62 = vld [vmem:[#allocation2 + $0x19a] sm:$0xff] }
 0x4d4   : > { %v3415_v22 = vpop.permute.xlu1 %3414 }
 0x4d5   : > { %v3289_v30 = vpop.permute.xlu0 %3288  ;;  %v3816_v37 = vsel %vm1787_vm7, %v3784_v58, %v3415_v22  ;;  %v8551_v58 = vld [vmem:[#allocation97_spill] sm:$0xff] }
 0x4d6   : > { %3054 = vrot.lane.b32.xlu1 %v2546_v32, %s4939_s7  ;;  %v3785_v26 = vsel %vm1754_vm6, %v3753_v27, %v3289_v30  ;;  %v8549_v32 = vld [vmem:[#allocation36_spill] sm:$0xff] }
 0x4d7   : > { %2928 = vrot.lane.b32.xlu0 %v2515_v52, %s4938_s30  ;;  %v3691_v52 = vsel %vm1655_vm3, %v3659_v44, %v8549_v32  ;;  %v2488_v32 = vld [vmem:[#allocation2 + $0x18a] sm:$0xff] }
 0x4d8   : > { %v3417_v59 = vpop.permute.xlu1 %3416 }
 0x4d9   : > { %v3035_v21 = vpop.permute.xlu0 %3034  ;;  %v3817_v16 = vsel %vm1787_vm7, %v3785_v26, %v3417_v59  ;;  %v2549_v59 = vld [vmem:[#allocation2 + $0x171] sm:$0xff]  ;;  %v2550_v26 = vld [vmem:[#allocation2 + $0x181] sm:$0xff] }
 0x4da   : > { %3562 = vrot.lane.b32.xlu1 %v2578_v13, %s4943_s23  ;;  %v3722_v28 = vsel %vm1688_vm4, %v3690_v8, %v3035_v21 }
 0x4db   : > { %3436 = vrot.lane.b32.xlu0 %v2547_v18, %s4942_s20 }
 0x4dc   : > { %v3037_v45 = vpop.permute.xlu1 %3036 }
 0x4dd   : > { %v3543_v49 = vpop.permute.xlu0 %3542  ;;  %v3723_v38 = vsel %vm1688_vm4, %v3691_v52, %v3037_v45  ;;  %v3660_v45 = vsel %vm1622_vm2, %v3628_v10, %v8551_v58  ;;  %v2521_v52 = vld [vmem:[#allocation2 + $0x1a0] sm:$0xff]  ;;  %v4926_v58 = vld [vmem:[#allocation2 + $0xf8] sm:$0xff] }
 0x4de   : > { %v3848_v34 = vsel %vm1820_vm8, %v3816_v37, %v3543_v49  ;;  %3182 = vrot.lane.b32.xlu1 %v2578_v13, %s4940_s8  ;;  %v3692_v37 = vsel %vm1655_vm3, %v3660_v45, %v8552_v9  ;;  %v8559_v45 = vld [vmem:[#allocation20_spill] sm:$0xff] }
 0x4df   : > { %3056 = vrot.lane.b32.xlu0 %v2547_v18, %s4939_s7  ;;  %4833 = vmatprep.mubr.msk.f32.mxu1 %vm1865_vm9, %v3848_v34  ;;  %v3631_v9 = vsel %vm1589_vm1, %v4926_v58, %v8559_v45 }
 0x4e0   : > { %v3545_v35 = vpop.permute.xlu1 %3544 }
 0x4e1   : > { %v3849_v3 = vsel %vm1820_vm8, %v3817_v16, %v3545_v35  ;;  %v3163_v29 = vpop.permute.xlu0 %3162  ;;  %v2519_v35 = vld [vmem:[#allocation2 + $0x188] sm:$0xff] }
 0x4e2   : > { %3184 = vrot.lane.b32.xlu1 %v2484_v19, %s4940_s8  ;;  %4834 = vmatmul.mubr.msk.f32.gmra.mrb[14].mxu1 %vm1865_vm9, %v3849_v3  ;;  %v3754_v2 = vsel %vm1721_vm5, %v3722_v28, %v3163_v29 }
 0x4e3   : > { %3564 = vrot.lane.b32.xlu0 %v2484_v19, %s4943_s23 }
 0x4e4   : > { %v3291_v0 = vpop.permute.xlu1 %3290 }
 0x4e5   : > { %v3165_v12 = vpop.permute.xlu0 %3164  ;;  %v3786_v22 = vsel %vm1754_vm6, %v3754_v2, %v3291_v0 }
 0x4e6   : > { %2930 = vrot.lane.b32.xlu1 %v2421_v63, %s4938_s30  ;;  %v3755_v57 = vsel %vm1721_vm5, %v3723_v38, %v3165_v12 }
 0x4e7   : > { %3310 = vrot.lane.b32.xlu0 %v2421_v63, %s4941_s9  ;;  %v4924_v63 = vld [vmem:[#allocation2 + $0xe0] sm:$0xff] }
 0x4e8   : > { %v3419_v17 = vpop.permute.xlu1 %3418 }
 0x4e9   : > { %v3293_v53 = vpop.permute.xlu0 %3292  ;;  %v3818_v39 = vsel %vm1787_vm7, %v3786_v22, %v3419_v17  ;;  %v8553_v17 = vld [vmem:[#allocation72_spill] sm:$0xff] }
 0x4ea   : > { %3438 = vrot.lane.b32.xlu1 %v2548_v43, %s4942_s20  ;;  %v3787_v24 = vsel %vm1754_vm6, %v3755_v57, %v3293_v53  ;;  %v3629_v53 = vsel %vm1589_vm1, %v4924_v63, %v8553_v17  ;;  %v8557_v57 = vld [vmem:[#allocation10_spill] sm:$0xff] }
 0x4eb   : > { %3312 = vrot.lane.b32.xlu0 %v2517_v56, %s4941_s9 }
 0x4ec   : > { %v3421_v54 = vpop.permute.xlu1 %3420 }
 0x4ed   : > { %v3039_v20 = vpop.permute.xlu0 %3038  ;;  %v3819_v47 = vsel %vm1787_vm7, %v3787_v24, %v3421_v54  ;;  %v8558_v24 = vld [vmem:[#allocation100_spill] sm:$0xff] }
 0x4ee   : > { %3058 = vrot.lane.b32.xlu1 %v2548_v43, %s4939_s7  ;;  %v3724_v27 = vsel %vm1688_vm4, %v3692_v37, %v3039_v20  ;;  %v8554_v43 = vld [vmem:[#allocation96_spill] sm:$0xff]  ;;  %v8560_v37 = vld [vmem:[#allocation9_spill] sm:$0xff] }
 0x4ef   : > { %2932 = vrot.lane.b32.xlu0 %v2517_v56, %s4938_s30  ;;  %v3661_v56 = vsel %vm1622_vm2, %v3629_v53, %v8554_v43 }
 0x4f0   : > { %v3041_v30 = vpop.permute.xlu1 %3040  ;;  %v3693_v14 = vsel %vm1655_vm3, %v3661_v56, %v8555_v40 }
 0x4f1   : > { %v3547_v6 = vpop.permute.xlu0 %3546  ;;  %v3725_v54 = vsel %vm1688_vm4, %v3693_v14, %v3041_v30  ;;  %v2520_v30 = vld [vmem:[#allocation2 + $0x198] sm:$0xff] }
 0x4f2   : > { %v3850_v50 = vsel %vm1820_vm8, %v3818_v39, %v3547_v6  ;;  %3566 = vrot.lane.b32.xlu1 %v2580_v48, %s4943_s23  ;;  %v4925_v39 = vld [vmem:[#allocation2 + $0xf0] sm:$0xff]  ;;  %v8556_v6 = vld [vmem:[#allocation21_spill] sm:$0xff] }
 0x4f3   : > { %3440 = vrot.lane.b32.xlu0 %v2549_v59, %s4942_s20  ;;  %4836 = vmatprep.mubr.msk.f32.mxu1 %vm1865_vm9, %v3850_v50 }
 0x4f4   : > { %v3549_v21 = vpop.permute.xlu1 %3548 }
 0x4f5   : > { %v3851_v13 = vsel %vm1820_vm8, %v3819_v47, %v3549_v21  ;;  %v3167_v23 = vpop.permute.xlu0 %3166 }
 0x4f6   : > { %3186 = vrot.lane.b32.xlu1 %v2580_v48, %s4940_s8  ;;  %4837 = vmatmul.mubr.msk.f32.gmra.mrb[16].mxu1 %vm1865_vm9, %v3851_v13  ;;  %v3756_v16 = vsel %vm1721_vm5, %v3724_v27, %v3167_v23  ;;  %v3630_v48 = vsel %vm1589_vm1, %v4925_v39, %v8556_v6  ;;  %v2552_v13 = vld [vmem:[#allocation2 + $0x199] sm:$0xff] }
 0x4f7   : > { %3060 = vrot.lane.b32.xlu0 %v2549_v59, %s4939_s7  ;;  %v3662_v50 = vsel %vm1622_vm2, %v3630_v48, %v8557_v57  ;;  %v2553_v59 = vld [vmem:[#allocation2 + $0x1a1] sm:$0xff] }
 0x4f8   : > { %v3295_v4 = vpop.permute.xlu1 %3294  ;;  %v3694_v47 = vsel %vm1655_vm3, %v3662_v50, %v8558_v24 }
 0x4f9   : > { %v3169_v7 = vpop.permute.xlu0 %3168  ;;  %v3788_v3 = vsel %vm1754_vm6, %v3756_v16, %v3295_v4 }
 0x4fa   : > { %3188 = vrot.lane.b32.xlu1 %v2486_v42, %s4940_s8  ;;  %v3757_v8 = vsel %vm1721_vm5, %v3725_v54, %v3169_v7 }
 0x4fb   : > { %3568 = vrot.lane.b32.xlu0 %v2486_v42, %s4943_s23 }
 0x4fc   : > { %v3423_v18 = vpop.permute.xlu1 %3422 }
 0x4fd   : > { %v3297_v60 = vpop.permute.xlu0 %3296  ;;  %v3820_v29 = vsel %vm1787_vm7, %v3788_v3, %v3423_v18  ;;  %v2585_v18 = vld [vmem:[#allocation2 + $0x1a2] sm:$0xff] }
 0x4fe   : > { %2934 = vrot.lane.b32.xlu1 %v2423_v33, %s4938_s30  ;;  %v3789_v20 = vsel %vm1754_vm6, %v3757_v8, %v3297_v60 }
 0x4ff   : > { %3314 = vrot.lane.b32.xlu0 %v2423_v33, %s4941_s9 }
 0x500   : > { %v3043_v49 = vpop.permute.xlu1 %3042 }
 0x501   : > { %v7722_v34 = vpop.permute.xlu0 %2916  ;;  %v3726_v23 = vsel %vm1688_vm4, %v3694_v47, %v3043_v49  ;;  %v3663_v49 = vsel %vm1622_vm2, %v3631_v9, %v8560_v37  ;;  %v8564_v47 = vld [vmem:[#allocation58_spill] sm:$0xff] }
 0x502   : > { %3442 = vrot.lane.b32.xlu1 %v2550_v26, %s4942_s20 }
 0x503   : > { %3316 = vrot.lane.b32.xlu0 %v2519_v35, %s4941_s9 }
 0x504   : > { %v3551_v19 = vpop.permute.xlu1 %3550 }
 0x505   : > { %v3852_v0 = vsel %vm1820_vm8, %v3820_v29, %v3551_v19  ;;  %v3425_v12 = vpop.permute.xlu0 %3424 }
 0x506   : > { %3062 = vrot.lane.b32.xlu1 %v2550_v26, %s4939_s7  ;;  %4839 = vmatprep.mubr.msk.f32.mxu1 %vm1865_vm9, %v3852_v0  ;;  %v3821_v11 = vsel %vm1787_vm7, %v3789_v20, %v3425_v12  ;;  %v3695_v26 = vsel %vm1655_vm3, %v3663_v49, %v7722_v34  ;;  %v7794_v34 = vld [vmem:[%s8059_s5] ss:$0 sm:$0xff]  ;;  %v4927_v20 = vld [vmem:[#allocation2 + $0x108] sm:$0xff] }
 0x507   : > { %2936 = vrot.lane.b32.xlu0 %v2519_v35, %s4938_s30  ;;  %s4404_s30 = sshll.u32 %s4986_s22, 5 }
 0x508   : > { %v3171_v36 = vpop.permute.xlu1 %3170  ;;  %p264_p4 = scmp.lt.s32.totalorder %s4404_s30, 63 }
 0x509   : > { %v3045_v15 = vpop.permute.xlu0 %3044  ;;  %v3758_v7 = vsel %vm1721_vm5, %v3726_v23, %v3171_v36 }
 0x50a   : > { %3570 = vrot.lane.b32.xlu1 %v2582_v1, %s4943_s23  ;;  %s8582_s30 = smov (!%p264_p4, %s4404_s30), 63  ;;  %v3727_v35 = vsel %vm1688_vm4, %v3695_v26, %v3045_v15 }
 0x50b   : > { %3444 = vrot.lane.b32.xlu0 %v2551_v25, %s4942_s20  ;;  %s4405_s22 = sshll.u32 %s8582_s30, 3 }
 0x50c   : > { %v3173_v46 = vpop.permute.xlu1 %3172 }
 0x50d   : > { %v3553_v28 = vpop.permute.xlu0 %3552  ;;  %v3759_v3 = vsel %vm1721_vm5, %v3727_v35, %v3173_v46  ;;  %v8561_v46 = vld [vmem:[#allocation126_spill] sm:$0xff] }
 0x50e   : > { %v3853_v51 = vsel %vm1820_vm8, %v3821_v11, %v3553_v28  ;;  %3190 = vrot.lane.b32.xlu1 %v2582_v1, %s4940_s8  ;;  %v3632_v11 = vsel %vm1589_vm1, %v4927_v20, %v8561_v46  ;;  %v8568_v20 = vld [vmem:[#allocation130_spill] sm:$0xff] }
 0x50f   : > { %3064 = vrot.lane.b32.xlu0 %v2551_v25, %s4939_s7  ;;  %4840 = vmatmul.mubr.msk.f32.gmra.mrb[18].mxu1 %vm1865_vm9, %v3853_v51  ;;  %v8562_v51 = vld [vmem:[#allocation59_spill] sm:$0xff] }
 0x510   : > { %v7749_v44 = vpop.permute.xlu1 %2918 }
 0x511   : > { %v3299_v2 = vpop.permute.xlu0 %3298 }
 0x512   : > { %3192 = vrot.lane.b32.xlu1 %v2488_v32, %s4940_s8  ;;  %v3790_v42 = vsel %vm1754_vm6, %v3758_v7, %v3299_v2  ;;  %v3664_v2 = vsel %vm1622_vm2, %v3632_v11, %v8562_v51 }
 0x513   : > { %3572 = vrot.lane.b32.xlu0 %v2488_v32, %s4943_s23 }
 0x514   : > { %v3427_v22 = vpop.permute.xlu1 %3426 }
 0x515   : > { %v3301_v38 = vpop.permute.xlu0 %3300  ;;  %v3822_v60 = vsel %vm1787_vm7, %v3790_v42, %v3427_v22 }
 0x516   : > { %3320 = vrot.lane.b32.xlu1 %v2521_v52, %s4941_s9  ;;  %v3791_v29 = vsel %vm1754_vm6, %v3759_v3, %v3301_v38  ;;  %v3696_v52 = vsel %vm1655_vm3, %v3664_v2, %v7749_v44  ;;  %v8563_v44 = vld [vmem:[#allocation51_spill] sm:$0xff] }
 0x517   : > { %3318 = vrot.lane.b32.xlu0 %v2520_v30, %s4941_s9  ;;  %s7788_s9 = scalar_lea.vmem %s8055_s1, %s4405_s22  ;;  %v3633_v24 = vsel %vm1589_vm1, %v7493_v61, %v8563_v44 }
 0x518   : > { %v3047_v21 = vpop.permute.xlu1 %3046  ;;  %v4203_v43 = vld [vmem:[%s7788_s9 + $0x8] sm:$0xff]  ;;  %v4202_v14 = vld [vmem:[%s7788_s9] sm:$0xff]  ;;  %v4204_v9 = vld [vmem:[%s7788_s9 + $0x10] sm:$0xff] }
 0x519   : > { %v7763_v4 = vpop.permute.xlu0 %2920  ;;  %v3728_v30 = vsel %vm1688_vm4, %v3696_v52, %v3047_v21  ;;  %v3665_v21 = vsel %vm1622_vm2, %v3633_v24, %v8564_v47 }
 0x51a   : > { %3448 = vrot.lane.b32.xlu1 %v2553_v59, %s4942_s20  ;;  %v3697_v23 = vsel %vm1655_vm3, %v3665_v21, %v7763_v4 }
 0x51b   : > { %3446 = vrot.lane.b32.xlu0 %v2552_v13, %s4942_s20  ;;  %s7805_s20 = scalar_lea.vmem %s8060_s6, %s4405_s22 }
 0x51c   : > { %v3555_v33 = vpop.permute.xlu1 %3554 }
 0x51d   : > { %v3854_v55 = vsel %vm1820_vm8, %v3822_v60, %v3555_v33  ;;  %v3429_v10 = vpop.permute.xlu0 %3428 }
 0x51e   : > { %3576 = vrot.lane.b32.xlu1 %v2585_v18, %s4943_s23  ;;  %4842 = vmatprep.mubr.msk.f32.mxu1 %vm1865_vm9, %v3854_v55  ;;  %v3823_v0 = vsel %vm1787_vm7, %v3791_v29, %v3429_v10  ;;  %v4205_v10 = vld [vmem:[%s7788_s9 + $0x18] sm:$0xff] }
 0x51f   : > { %3574 = vrot.lane.b32.xlu0 %v2584_v62, %s4943_s23 }
 0x520   : > { %v3175_v27 = vpop.permute.xlu1 %3174 }
 0x521   : > { %v3049_v16 = vpop.permute.xlu0 %3048  ;;  %v3760_v39 = vsel %vm1721_vm5, %v3728_v30, %v3175_v27 }
 0x522   : > { %v3729_v42 = vsel %vm1688_vm4, %v3697_v23, %v3049_v16 }
 0x524   : > { %v3177_v19 = vpop.permute.xlu1 %3176 }
 0x525   : > { %v3557_v12 = vpop.permute.xlu0 %3556  ;;  %v3761_v18 = vsel %vm1721_vm5, %v3729_v42, %v3177_v19 }
 0x526   : > { %v3855_v63 = vsel %vm1820_vm8, %v3823_v0, %v3557_v12  ;;  %v8565_v0 = vld [vmem:[#allocation24_spill] sm:$0xff] }
 0x527   : > { %4843 = vmatmul.mubr.msk.f32.gmra.mrb[20].mxu1 %vm1865_vm9, %v3855_v63  ;;  %v3634_v12 = vsel %vm1589_vm1, %v7528_v31, %v8565_v0  ;;  %v8566_v63 = vld [vmem:[#allocation131_spill] sm:$0xff] }
 0x528   : > { %v7796_v17 = vpop.permute.xlu1 %2922 }
 0x529   : > { %v4814_v53 = vpop.f32.mrb[0].mxu1  ;;  %v3303_v56 = vpop.permute.xlu0 %3302 }
 0x52a   : > { %v4049_v36 = vadd.f32 %v4814_v53, %v7794_v34  ;;  %v4043_v40 = vpop.f32.mrb[1].mxu1  ;;  %v3792_v6 = vsel %vm1754_vm6, %v3760_v39, %v3303_v56  ;;  %v3666_v53 = vsel %vm1622_vm2, %v3634_v12, %v8566_v63  ;;  %v4206_v39 = vld [vmem:[%s7788_s9 + $0x20] sm:$0xff]  ;;  %v8572_v63 = vld [vmem:[#allocation32_spill] sm:$0xff] }
 0x52b   : > { %v4044_v15 = vadd.f32 %v7794_v34, %v4043_v40 }
 0x52c   : > { %v4235_v1 = vadd.f32 %v4203_v43, %v4049_v36  ;;  %v3431_v54 = vpop.permute.xlu1 %3430  ;;  %v3698_v43 = vsel %vm1655_vm3, %v3666_v53, %v7796_v17 }
 0x52d   : > { %v4234_v25 = vadd.f32 %v4202_v14, %v4044_v15  ;;  %v3305_v8 = vpop.permute.xlu0 %3304  ;;  %v3824_v48 = vsel %vm1787_vm7, %v3792_v6, %v3431_v54 }
 0x52e   : > { %v4267_v28 = vmax.f32 %v4235_v1, 0.0  ;;  %v3793_v60 = vsel %vm1754_vm6, %v3761_v18, %v3305_v8  ;;  %v8567_v8 = vld [vmem:[#allocation127_spill] sm:$0xff]  ;;  %v8569_v18 = vld [vmem:[#allocation74_spill] sm:$0xff] }
 0x52f   : > { %v4266_v32 = vmax.f32 %v4234_v25, 0.0  ;;  %v3635_v17 = vsel %vm1589_vm1, %v7548_v41, %v8567_v8 }
 0x530   : > { %4299 = vst.msk [vmem:[%s7805_s20 + $0x8] sm:$0xff] %vm1589_vm1, %v4267_v28  ;;  %v3051_v22 = vpop.permute.xlu1 %3050  ;;  %v3667_v46 = vsel %vm1622_vm2, %v3635_v17, %v8568_v20 }
 0x531   : > { %4298 = vst.msk [vmem:[%s7805_s20] sm:$0xff] %vm1589_vm1, %v4266_v32  ;;  %v2925_v38 = vpop.permute.xlu0 %2924  ;;  %v3730_v36 = vsel %vm1688_vm4, %v3698_v43, %v3051_v22  ;;  %v4207_v32 = vld [vmem:[%s7788_s9 + $0x28] sm:$0xff] }
 0x532   : > { %v3699_v28 = vsel %vm1655_vm3, %v3667_v46, %v2925_v38 }
 0x534   : > { %v3559_v57 = vpop.permute.xlu1 %3558 }
 0x535   : > { %v3856_v50 = vsel %vm1820_vm8, %v3824_v48, %v3559_v57  ;;  %v3433_v59 = vpop.permute.xlu0 %3432 }
 0x536   : > { %4845 = vmatprep.mubr.msk.f32.mxu1 %vm1865_vm9, %v3856_v50  ;;  %v3825_v62 = vsel %vm1787_vm7, %v3793_v60, %v3433_v59  ;;  %v3636_v60 = vsel %vm1589_vm1, %v7586_v5, %v8569_v18 }
 0x538   : > { %v3179_v13 = vpop.permute.xlu1 %3178 }
 0x539   : > { %v3053_v7 = vpop.permute.xlu0 %3052  ;;  %v3762_v14 = vsel %vm1721_vm5, %v3730_v36, %v3179_v13 }
 0x53a   : > { %v3731_v52 = vsel %vm1688_vm4, %v3699_v28, %v3053_v7 }
 0x53c   : > { %v3181_v33 = vpop.permute.xlu1 %3180 }
 0x53d   : > { %v3561_v61 = vpop.permute.xlu0 %3560  ;;  %v4817_v55 = vpop.f32.mrb[2].mxu1  ;;  %v3763_v6 = vsel %vm1721_vm5, %v3731_v52, %v3181_v33  ;;  %v8570_v33 = vld [vmem:[#allocation33_spill] sm:$0xff]  ;;  %v8573_v52 = vld [vmem:[#allocation94_spill] sm:$0xff] }
 0x53e   : > { %v3857_v58 = vsel %vm1820_vm8, %v3825_v62, %v3561_v61  ;;  %v4059_v45 = vadd.f32 %v4817_v55, %v7794_v34  ;;  %v4053_v4 = vpop.f32.mrb[3].mxu1  ;;  %v3668_v62 = vsel %vm1622_vm2, %v3636_v60, %v8570_v33 }
 0x53f   : > { %v4054_v37 = vadd.f32 %v7794_v34, %v4053_v4  ;;  %4846 = vmatmul.mubr.msk.f32.gmra.mrb[22].mxu1 %vm1865_vm9, %v3857_v58 }
 0x540   : > { %v4237_v49 = vadd.f32 %v4205_v10, %v4059_v45  ;;  %v2927_v27 = vpop.permute.xlu1 %2926 }
 0x541   : > { %v4236_v26 = vadd.f32 %v4204_v9, %v4054_v37  ;;  %v3307_v16 = vpop.permute.xlu0 %3306  ;;  %v3700_v61 = vsel %vm1655_vm3, %v3668_v62, %v2927_v27  ;;  %v2326_v62 = vld [vmem:[#allocation2 + $0x158] sm:$0xff] }
 0x542   : > { %v4269_v35 = vmax.f32 %v4237_v49, 0.0  ;;  %v3794_v15 = vsel %vm1754_vm6, %v3762_v14, %v3307_v16  ;;  %v4209_v16 = vld [vmem:[%s7788_s9 + $0x38] sm:$0xff] }
 0x543   : > { %v4268_v3 = vmax.f32 %v4236_v26, 0.0 }
 0x544   : > { %4301 = vst.msk [vmem:[%s7805_s20 + $0x18] sm:$0xff] %vm1589_vm1, %v4269_v35  ;;  %v3435_v29 = vpop.permute.xlu1 %3434  ;;  %v2324_v35 = vld [vmem:[#allocation2 + $0x140] sm:$0xff] }
 0x545   : > { %4300 = vst.msk [vmem:[%s7805_s20 + $0x10] sm:$0xff] %vm1589_vm1, %v4268_v3  ;;  %v3309_v19 = vpop.permute.xlu0 %3308  ;;  %v3826_v1 = vsel %vm1787_vm7, %v3794_v15, %v3435_v29  ;;  %v4208_v29 = vld [vmem:[%s7788_s9 + $0x30] sm:$0xff] }
 0x546   : > { %v3795_v48 = vsel %vm1754_vm6, %v3763_v6, %v3309_v19  ;;  %v8571_v19 = vld [vmem:[#allocation25_spill] sm:$0xff] }
 0x547   : > { %v3637_v0 = vsel %vm1589_vm1, %v2324_v35, %v8571_v19 }
 0x548   : > { %v3055_v56 = vpop.permute.xlu1 %3054  ;;  %v3669_v53 = vsel %vm1622_vm2, %v3637_v0, %v8572_v63  ;;  %v2328_v63 = vld [vmem:[#allocation2 + $0x170] sm:$0xff] }
 0x549   : > { %v2929_v40 = vpop.permute.xlu0 %2928  ;;  %v3732_v10 = vsel %vm1688_vm4, %v3700_v61, %v3055_v56 }
 0x54a   : > { %v3701_v36 = vsel %vm1655_vm3, %v3669_v53, %v2929_v40  ;;  %v8577_v53 = vld [vmem:[#allocation5_spill] sm:$0xff] }
 0x54c   : > { %v3563_v54 = vpop.permute.xlu1 %3562 }
 0x54d   : > { %v3858_v31 = vsel %vm1820_vm8, %v3826_v1, %v3563_v54  ;;  %v3437_v25 = vpop.permute.xlu0 %3436 }
 0x54e   : > { %4848 = vmatprep.mubr.msk.f32.mxu1 %vm1865_vm9, %v3858_v31  ;;  %v3827_v38 = vsel %vm1787_vm7, %v3795_v48, %v3437_v25 }
 0x550   : > { %v3183_v11 = vpop.permute.xlu1 %3182 }
 0x551   : > { %v3057_v51 = vpop.permute.xlu0 %3056  ;;  %v4820_v2 = vpop.f32.mrb[4].mxu1  ;;  %v3764_v45 = vsel %vm1721_vm5, %v3732_v10, %v3183_v11 }
 0x552   : > { %v4069_v22 = vadd.f32 %v4820_v2, %v7794_v34  ;;  %v4063_v30 = vpop.f32.mrb[5].mxu1  ;;  %v3733_v1 = vsel %vm1688_vm4, %v3701_v36, %v3057_v51  ;;  %v2325_v2 = vld [vmem:[#allocation2 + $0x150] sm:$0xff] }
 0x553   : > { %v4064_v41 = vadd.f32 %v7794_v34, %v4063_v30  ;;  %v8574_v30 = vld [vmem:[#allocation79_spill] sm:$0xff] }
 0x554   : > { %v4239_v57 = vadd.f32 %v4207_v32, %v4069_v22  ;;  %v3185_v50 = vpop.permute.xlu1 %3184  ;;  %v3638_v22 = vsel %vm1589_vm1, %v2325_v2, %v8573_v52  ;;  %v4212_v2 = vld [vmem:[%s7788_s9 + $0x50] sm:$0xff] }
 0x555   : > { %v4238_v59 = vadd.f32 %v4206_v39, %v4064_v41  ;;  %v3565_v44 = vpop.permute.xlu0 %3564  ;;  %v3765_v31 = vsel %vm1721_vm5, %v3733_v1, %v3185_v50  ;;  %v3670_v39 = vsel %vm1622_vm2, %v3638_v22, %v8574_v30 }
 0x556   : > { %v4271_v24 = vmax.f32 %v4239_v57, 0.0  ;;  %v3859_v47 = vsel %vm1820_vm8, %v3827_v38, %v3565_v44  ;;  %v4211_v38 = vld [vmem:[%s7788_s9 + $0x48] sm:$0xff] }
 0x557   : > { %v4270_v21 = vmax.f32 %v4238_v59, 0.0  ;;  %4849 = vmatmul.mubr.msk.f32.gmra.mrb[24].mxu1 %vm1865_vm9, %v3859_v47  ;;  %v4210_v47 = vld [vmem:[%s7788_s9 + $0x40] sm:$0xff] }
 0x558   : > { %4303 = vst.msk [vmem:[%s7805_s20 + $0x28] sm:$0xff] %vm1589_vm1, %v4271_v24  ;;  %v2931_v13 = vpop.permute.xlu1 %2930 }
 0x559   : > { %4302 = vst.msk [vmem:[%s7805_s20 + $0x20] sm:$0xff] %vm1589_vm1, %v4270_v21  ;;  %v3311_v23 = vpop.permute.xlu0 %3310  ;;  %v3702_v6 = vsel %vm1655_vm3, %v3670_v39, %v2931_v13 }
 0x55a   : > { %v3796_v4 = vsel %vm1754_vm6, %v3764_v45, %v3311_v23 }
 0x55c   : > { %v3439_v7 = vpop.permute.xlu1 %3438 }
 0x55d   : > { %v3313_v42 = vpop.permute.xlu0 %3312  ;;  %v3828_v9 = vsel %vm1787_vm7, %v3796_v4, %v3439_v7  ;;  %v8576_v4 = vld [vmem:[#allocation78_spill] sm:$0xff] }
 0x55e   : > { %v3797_v8 = vsel %vm1754_vm6, %v3765_v31, %v3313_v42 }
 0x560   : > { %v3059_v55 = vpop.permute.xlu1 %3058 }
 0x561   : > { %v7884_v58 = vpop.permute.xlu0 %2932  ;;  %v3734_v48 = vsel %vm1688_vm4, %v3702_v6, %v3059_v55  ;;  %v8575_v55 = vld [vmem:[#allocation75_spill] sm:$0xff] }
 0x562   : > { %v3639_v10 = vsel %vm1589_vm1, %v2326_v62, %v8575_v55 }
 0x564   : > { %v3567_v37 = vpop.permute.xlu1 %3566 }
 0x565   : > { %v3860_v5 = vsel %vm1820_vm8, %v3828_v9, %v3567_v37  ;;  %v3441_v49 = vpop.permute.xlu0 %3440  ;;  %v4823_v26 = vpop.f32.mrb[6].mxu1  ;;  %v3671_v9 = vsel %vm1622_vm2, %v3639_v10, %v8576_v4  ;;  %v4217_v10 = vld [vmem:[%s7788_s9 + $0x78] sm:$0xff] }
 0x566   : > { %v4079_v27 = vadd.f32 %v4823_v26, %v7794_v34  ;;  %v4073_v3 = vpop.f32.mrb[7].mxu1  ;;  %4851 = vmatprep.mubr.msk.f32.mxu1 %vm1865_vm9, %v3860_v5  ;;  %v3829_v20 = vsel %vm1787_vm7, %v3797_v8, %v3441_v49  ;;  %v3703_v5 = vsel %vm1655_vm3, %v3671_v9, %v7884_v58  ;;  %v4216_v9 = vld [vmem:[%s7788_s9 + $0x70] sm:$0xff] }
 0x567   : > { %v4074_v12 = vadd.f32 %v7794_v34, %v4073_v3 }
 0x568   : > { %v4241_v43 = vadd.f32 %v4209_v16, %v4079_v27  ;;  %v3187_v56 = vpop.permute.xlu1 %3186 }
 0x569   : > { %v4240_v14 = vadd.f32 %v4208_v29, %v4074_v12  ;;  %v3061_v15 = vpop.permute.xlu0 %3060  ;;  %v3766_v59 = vsel %vm1721_vm5, %v3734_v48, %v3187_v56  ;;  %v2327_v12 = vld [vmem:[#allocation2 + $0x168] sm:$0xff]  ;;  %v8578_v56 = vld [vmem:[#allocation95_spill] sm:$0xff] }
 0x56a   : > { %v4273_v54 = vmax.f32 %v4241_v43, 0.0  ;;  %v3735_v26 = vsel %vm1688_vm4, %v3703_v5, %v3061_v15  ;;  %v3640_v43 = vsel %vm1589_vm1, %v2327_v12, %v8577_v53  ;;  %v3641_v36 = vsel %vm1589_vm1, %v2328_v63, %v8578_v56  ;;  %v4221_v56 = vld [vmem:[%s7788_s9 + $0x98] sm:$0xff] }
 0x56b   : > { %v4272_v25 = vmax.f32 %v4240_v14, 0.0  ;;  %v8579_v14 = vld [vmem:[#allocation99_spill] sm:$0xff] }
 0x56c   : > { %4305 = vst.msk [vmem:[%s7805_s20 + $0x38] sm:$0xff] %vm1589_vm1, %v4273_v54  ;;  %v3189_v17 = vpop.permute.xlu1 %3188  ;;  %v3672_v15 = vsel %vm1622_vm2, %v3640_v43, %v8579_v14  ;;  %v8580_v54 = vld [vmem:[#allocation98_spill] sm:$0xff] }
 0x56d   : > { %4304 = vst.msk [vmem:[%s7805_s20 + $0x30] sm:$0xff] %vm1589_vm1, %v4272_v25  ;;  %v3569_v46 = vpop.permute.xlu0 %3568  ;;  %v3767_v16 = vsel %vm1721_vm5, %v3735_v26, %v3189_v17  ;;  %v3673_v31 = vsel %vm1622_vm2, %v3641_v36, %v8580_v54 }
 0x56e   : > { %v3861_v40 = vsel %vm1820_vm8, %v3829_v20, %v3569_v46  ;;  %v4213_v20 = vld [vmem:[%s7788_s9 + $0x58] sm:$0xff] }
 0x56f   : > { %4852 = vmatmul.mubr.msk.f32.gmra.mrb[26].mxu1 %vm1865_vm9, %v3861_v40 }
 0x570   : > { %v2935_v11 = vpop.permute.xlu1 %2934 }
 0x571   : > { %v3315_v28 = vpop.permute.xlu0 %3314  ;;  %v3704_v25 = vsel %vm1655_vm3, %v3672_v15, %v2935_v11  ;;  %v4220_v15 = vld [vmem:[%s7788_s9 + $0x90] sm:$0xff] }
 0x572   : > { %v3798_v21 = vsel %vm1754_vm6, %v3766_v59, %v3315_v28 }
 0x574   : > { %v3443_v51 = vpop.permute.xlu1 %3442 }
 0x575   : > { %v3317_v32 = vpop.permute.xlu0 %3316  ;;  %v3830_v13 = vsel %vm1787_vm7, %v3798_v21, %v3443_v51 }
 0x576   : > { %v3799_v35 = vsel %vm1754_vm6, %v3767_v16, %v3317_v32 }
 0x578   : > { %v3063_v41 = vpop.permute.xlu1 %3062 }
 0x579   : > { %v2937_v57 = vpop.permute.xlu0 %2936  ;;  %v4826_v50 = vpop.f32.mrb[8].mxu1  ;;  %v3736_v46 = vsel %vm1688_vm4, %v3704_v25, %v3063_v41 }
 0x57a   : > { %v4089_v44 = vadd.f32 %v4826_v50, %v7794_v34  ;;  %v4083_v24 = vpop.f32.mrb[9].mxu1  ;;  %v3705_v40 = vsel %vm1655_vm3, %v3673_v31, %v2937_v57 }
 0x57b   : > { %v4084_v23 = vadd.f32 %v7794_v34, %v4083_v24 }
 0x57c   : > { %v4243_v7 = vadd.f32 %v4211_v38, %v4089_v44  ;;  %v3571_v42 = vpop.permute.xlu1 %3570 }
 0x57d   : > { %v4242_v18 = vadd.f32 %v4210_v47, %v4084_v23  ;;  %v3862_v60 = vsel %vm1820_vm8, %v3830_v13, %v3571_v42  ;;  %v3445_v33 = vpop.permute.xlu0 %3444  ;;  %v4215_v23 = vld [vmem:[%s7788_s9 + $0x68] sm:$0xff]  ;;  %v4214_v42 = vld [vmem:[%s7788_s9 + $0x60] sm:$0xff] }
 0x57e   : > { %v4275_v61 = vmax.f32 %v4243_v7, 0.0  ;;  %4854 = vmatprep.mubr.msk.f32.mxu1 %vm1865_vm9, %v3862_v60  ;;  %v3831_v3 = vsel %vm1787_vm7, %v3799_v35, %v3445_v33 }
 0x57f   : > { %v4274_v45 = vmax.f32 %v4242_v18, 0.0 }
 0x580   : > { %4307 = vst.msk [vmem:[%s7805_s20 + $0x48] sm:$0xff] %vm1589_vm1, %v4275_v61  ;;  %v3191_v37 = vpop.permute.xlu1 %3190 }
 0x581   : > { %4306 = vst.msk [vmem:[%s7805_s20 + $0x40] sm:$0xff] %vm1589_vm1, %v4274_v45  ;;  %v3065_v49 = vpop.permute.xlu0 %3064  ;;  %v3768_v32 = vsel %vm1721_vm5, %v3736_v46, %v3191_v37 }
 0x582   : > { %v3737_v52 = vsel %vm1688_vm4, %v3705_v40, %v3065_v49 }
 0x584   : > { %v3193_v27 = vpop.permute.xlu1 %3192 }
 0x585   : > { %v3573_v29 = vpop.permute.xlu0 %3572  ;;  %v3769_v11 = vsel %vm1721_vm5, %v3737_v52, %v3193_v27  ;;  %v4219_v27 = vld [vmem:[%s7788_s9 + $0x88] sm:$0xff] }
 0x586   : > { %v3863_v19 = vsel %vm1820_vm8, %v3831_v3, %v3573_v29 }
 0x587   : > { %4855 = vmatmul.mubr.msk.f32.gmra.mrb[28].mxu1 %vm1865_vm9, %v3863_v19  ;;  %v4218_v19 = vld [vmem:[%s7788_s9 + $0x80] sm:$0xff] }
 0x588   : > { %v3321_v0 = vpop.permute.xlu1 %3320 }
 0x589   : > { %v3319_v58 = vpop.permute.xlu0 %3318  ;;  %v3801_v41 = vsel %vm1754_vm6, %v3769_v11, %v3321_v0 }
 0x58a   : > { %v3800_v30 = vsel %vm1754_vm6, %v3768_v32, %v3319_v58 }
 0x58c   : > { %v3449_v1 = vpop.permute.xlu1 %3448 }
 0x58d   : > { %v3447_v8 = vpop.permute.xlu0 %3446  ;;  %v4829_v17 = vpop.f32.mrb[10].mxu1  ;;  %v3833_v38 = vsel %vm1787_vm7, %v3801_v41, %v3449_v1  ;;  %v4224_v41 = vld [vmem:[%s7788_s9 + $0xb0] sm:$0xff] }
 0x58e   : > { %v4099_v28 = vadd.f32 %v4829_v17, %v7794_v34  ;;  %v4093_v51 = vpop.f32.mrb[11].mxu1  ;;  %v3832_v48 = vsel %vm1787_vm7, %v3800_v30, %v3447_v8  ;;  %v4225_v30 = vld [vmem:[%s7788_s9 + $0xb8] sm:$0xff] }
 0x58f   : > { %v4094_v22 = vadd.f32 %v7794_v34, %v4093_v51 }
 0x590   : > { %v4245_v39 = vadd.f32 %v4213_v20, %v4099_v28  ;;  %v3577_v6 = vpop.permute.xlu1 %3576  ;;  %v4223_v20 = vld [vmem:[%s7788_s9 + $0xa8] sm:$0xff]  ;;  %v4222_v28 = vld [vmem:[%s7788_s9 + $0xa0] sm:$0xff] }
 0x591   : > { %v4244_v57 = vadd.f32 %v4212_v2, %v4094_v22  ;;  %v3575_v50 = vpop.permute.xlu0 %3574  ;;  %v3865_v47 = vsel %vm1820_vm8, %v3833_v38, %v3577_v6 }
 0x592   : > { %v4277_v59 = vmax.f32 %v4245_v39, 0.0  ;;  %v3864_v44 = vsel %vm1820_vm8, %v3832_v48, %v3575_v50 }
 0x593   : > { %v4276_v24 = vmax.f32 %v4244_v57, 0.0  ;;  %4857 = vmatprep.mubr.msk.f32.mxu1 %vm1865_vm9, %v3864_v44 }
 0x594   : > { %4309 = vst.msk [vmem:[%s7805_s20 + $0x58] sm:$0xff] %vm1589_vm1, %v4277_v59  ;;  %4858 = vmatmul.mubr.msk.f32.gmra.mrb[30].mxu1 %vm1865_vm9, %v3865_v47 }
 0x595   : > { %4308 = vst.msk [vmem:[%s7805_s20 + $0x50] sm:$0xff] %vm1589_vm1, %v4276_v24  ;;  %v4227_v24 = vld [vmem:[%s7788_s9 + $0xc8] sm:$0xff] }
 0x5a1   : > { %v4832_v21 = vpop.f32.mrb[12].mxu1 }
 0x5a2   : > { %v4109_v13 = vadd.f32 %v4832_v21, %v7794_v34  ;;  %v4103_v7 = vpop.f32.mrb[13].mxu1 }
 0x5a3   : > { %v4104_v18 = vadd.f32 %v7794_v34, %v4103_v7 }
 0x5a4   : > { %v4247_v60 = vadd.f32 %v4215_v23, %v4109_v13  ;;  %v4226_v23 = vld [vmem:[%s7788_s9 + $0xc0] sm:$0xff] }
 0x5a5   : > { %v4246_v33 = vadd.f32 %v4214_v42, %v4104_v18 }
 0x5a6   : > { %v4279_v62 = vmax.f32 %v4247_v60, 0.0 }
 0x5a7   : > { %v4278_v61 = vmax.f32 %v4246_v33, 0.0 }
 0x5a8   : > { %4311 = vst.msk [vmem:[%s7805_s20 + $0x68] sm:$0xff] %vm1589_vm1, %v4279_v62  ;;  %v4229_v62 = vld [vmem:[%s7788_s9 + $0xd8] sm:$0xff] }
 0x5a9   : > { %4310 = vst.msk [vmem:[%s7805_s20 + $0x60] sm:$0xff] %vm1589_vm1, %v4278_v61 }
 0x5b5   : > { %v4835_v55 = vpop.f32.mrb[14].mxu1 }
 0x5b6   : > { %v4119_v45 = vadd.f32 %v4835_v55, %v7794_v34  ;;  %v4113_v4 = vpop.f32.mrb[15].mxu1 }
 0x5b7   : > { %v4114_v37 = vadd.f32 %v7794_v34, %v4113_v4 }
 0x5b8   : > { %v4249_v5 = vadd.f32 %v4217_v10, %v4119_v45  ;;  %v4228_v10 = vld [vmem:[%s7788_s9 + $0xd0] sm:$0xff] }
 0x5b9   : > { %v4248_v49 = vadd.f32 %v4216_v9, %v4114_v37 }
 0x5ba   : > { %v4281_v26 = vmax.f32 %v4249_v5, 0.0 }
 0x5bb   : > { %v4280_v16 = vmax.f32 %v4248_v49, 0.0 }
 0x5bc   : > { %4313 = vst.msk [vmem:[%s7805_s20 + $0x78] sm:$0xff] %vm1589_vm1, %v4281_v26  ;;  %v4231_v26 = vld [vmem:[%s7788_s9 + $0xe8] sm:$0xff] }
 0x5bd   : > { %4312 = vst.msk [vmem:[%s7805_s20 + $0x70] sm:$0xff] %vm1589_vm1, %v4280_v16 }
 0x5c9   : > { %v4838_v35 = vpop.f32.mrb[16].mxu1 }
 0x5ca   : > { %v4129_v3 = vadd.f32 %v4838_v35, %v7794_v34  ;;  %v4123_v29 = vpop.f32.mrb[17].mxu1 }
 0x5cb   : > { %v4124_v0 = vadd.f32 %v7794_v34, %v4123_v29 }
 0x5cc   : > { %v4251_v58 = vadd.f32 %v4219_v27, %v4129_v3  ;;  %v4230_v27 = vld [vmem:[%s7788_s9 + $0xe0] sm:$0xff] }
 0x5cd   : > { %v4250_v12 = vadd.f32 %v4218_v19, %v4124_v0 }
 0x5ce   : > { %v4283_v63 = vmax.f32 %v4251_v58, 0.0 }
 0x5cf   : > { %v4282_v53 = vmax.f32 %v4250_v12, 0.0 }
 0x5d0   : > { %4315 = vst.msk [vmem:[%s7805_s20 + $0x88] sm:$0xff] %vm1589_vm1, %v4283_v63  ;;  %v4233_v63 = vld [vmem:[%s7788_s9 + $0xf8] sm:$0xff] }
 0x5d1   : > { %4314 = vst.msk [vmem:[%s7805_s20 + $0x80] sm:$0xff] %vm1589_vm1, %v4282_v53 }
 0x5e2   : > { %v4841_v43 = vpop.f32.mrb[18].mxu1 }
 0x5e3   : > { %v4139_v36 = vadd.f32 %v4841_v43, %v7794_v34  ;;  %v4133_v14 = vpop.f32.mrb[19].mxu1 }
 0x5e4   : > { %v4134_v1 = vadd.f32 %v7794_v34, %v4133_v14 }
 0x5e5   : > { %v4253_v54 = vadd.f32 %v4221_v56, %v4139_v36  ;;  %v4232_v56 = vld [vmem:[%s7788_s9 + $0xf0] sm:$0xff] }
 0x5e6   : > { %v4252_v31 = vadd.f32 %v4220_v15, %v4134_v1 }
 0x5e7   : > { %v4285_v25 = vmax.f32 %v4253_v54, 0.0 }
 0x5e8   : > { %v4284_v8 = vmax.f32 %v4252_v31, 0.0 }
 0x5e9   : > { %4317 = vst.msk [vmem:[%s7805_s20 + $0x98] sm:$0xff] %vm1589_vm1, %v4285_v25 }
 0x5ea   : > { %4316 = vst.msk [vmem:[%s7805_s20 + $0x90] sm:$0xff] %vm1589_vm1, %v4284_v8 }
 0x5fa   : > { %v4844_v17 = vpop.f32.mrb[20].mxu1 }
 0x5fb   : > { %v4149_v46 = vadd.f32 %v4844_v17, %v7794_v34  ;;  %v4143_v40 = vpop.f32.mrb[21].mxu1 }
 0x5fc   : > { %v4144_v51 = vadd.f32 %v7794_v34, %v4143_v40 }
 0x5fd   : > { %v4255_v2 = vadd.f32 %v4223_v20, %v4149_v46 }
 0x5fe   : > { %v4254_v32 = vadd.f32 %v4222_v28, %v4144_v51 }
 0x5ff   : > { %v4287_v52 = vmax.f32 %v4255_v2, 0.0 }
 0x600   : > { %v4286_v22 = vmax.f32 %v4254_v32, 0.0 }
 0x601   : > { %4319 = vst.msk [vmem:[%s7805_s20 + $0xa8] sm:$0xff] %vm1589_vm1, %v4287_v52 }
 0x602   : > { %4318 = vst.msk [vmem:[%s7805_s20 + $0xa0] sm:$0xff] %vm1589_vm1, %v4286_v22 }
 0x612   : > { %v4847_v11 = vpop.f32.mrb[22].mxu1 }
 0x613   : > { %v4159_v39 = vadd.f32 %v4847_v11, %v7794_v34  ;;  %v4153_v6 = vpop.f32.mrb[23].mxu1 }
 0x614   : > { %v4154_v48 = vadd.f32 %v7794_v34, %v4153_v6 }
 0x615   : > { %v4257_v57 = vadd.f32 %v4225_v30, %v4159_v39 }
 0x616   : > { %v4256_v50 = vadd.f32 %v4224_v41, %v4154_v48 }
 0x617   : > { %v4289_v38 = vmax.f32 %v4257_v57, 0.0 }
 0x618   : > { %v4288_v59 = vmax.f32 %v4256_v50, 0.0 }
 0x619   : > { %4321 = vst.msk [vmem:[%s7805_s20 + $0xb8] sm:$0xff] %vm1589_vm1, %v4289_v38 }
 0x61a   : > { %4320 = vst.msk [vmem:[%s7805_s20 + $0xb0] sm:$0xff] %vm1589_vm1, %v4288_v59 }
 0x62a   : > { %v4850_v44 = vpop.f32.mrb[24].mxu1 }
 0x62b   : > { %v4169_v47 = vadd.f32 %v4850_v44, %v7794_v34  ;;  %v4163_v21 = vpop.f32.mrb[25].mxu1 }
 0x62c   : > { %v4164_v13 = vadd.f32 %v7794_v34, %v4163_v21 }
 0x62d   : > { %v4259_v7 = vadd.f32 %v4227_v24, %v4169_v47 }
 0x62e   : > { %v4258_v42 = vadd.f32 %v4226_v23, %v4164_v13 }
 0x62f   : > { %v4291_v18 = vmax.f32 %v4259_v7, 0.0 }
 0x630   : > { %v4290_v60 = vmax.f32 %v4258_v42, 0.0 }
 0x631   : > { %4323 = vst.msk [vmem:[%s7805_s20 + $0xc8] sm:$0xff] %vm1589_vm1, %v4291_v18 }
 0x632   : > { %4322 = vst.msk [vmem:[%s7805_s20 + $0xc0] sm:$0xff] %vm1589_vm1, %v4290_v60 }
 0x642   : > { %v4853_v33 = vpop.f32.mrb[26].mxu1 }
 0x643   : > { %v4179_v61 = vadd.f32 %v4853_v33, %v7794_v34  ;;  %v4173_v55 = vpop.f32.mrb[27].mxu1 }
 0x644   : > { %v4174_v45 = vadd.f32 %v7794_v34, %v4173_v55 }
 0x645   : > { %v4261_v4 = vadd.f32 %v4229_v62, %v4179_v61 }
 0x646   : > { %v4260_v9 = vadd.f32 %v4228_v10, %v4174_v45 }
 0x647   : > { %v4293_v37 = vmax.f32 %v4261_v4, 0.0 }
 0x648   : > { %v4292_v5 = vmax.f32 %v4260_v9, 0.0 }
 0x649   : > { %4325 = vst.msk [vmem:[%s7805_s20 + $0xd8] sm:$0xff] %vm1589_vm1, %v4293_v37 }
 0x64a   : > { %4324 = vst.msk [vmem:[%s7805_s20 + $0xd0] sm:$0xff] %vm1589_vm1, %v4292_v5 }
 0x65a   : > { %v4856_v49 = vpop.f32.mrb[28].mxu1 }
 0x65b   : > { %v4189_v16 = vadd.f32 %v4856_v49, %v7794_v34  ;;  %v4183_v35 = vpop.f32.mrb[29].mxu1 }
 0x65c   : > { %v4184_v3 = vadd.f32 %v7794_v34, %v4183_v35 }
 0x65d   : > { %v4263_v29 = vadd.f32 %v4231_v26, %v4189_v16 }
 0x65e   : > { %v4262_v19 = vadd.f32 %v4230_v27, %v4184_v3 }
 0x65f   : > { %v4295_v0 = vmax.f32 %v4263_v29, 0.0 }
 0x660   : > { %v4294_v58 = vmax.f32 %v4262_v19, 0.0 }
 0x661   : > { %4327 = vst.msk [vmem:[%s7805_s20 + $0xe8] sm:$0xff] %vm1589_vm1, %v4295_v0 }
 0x662   : > { %4326 = vst.msk [vmem:[%s7805_s20 + $0xe0] sm:$0xff] %vm1589_vm1, %v4294_v58 }
 0x667   : > { %v4859_v12 = vpop.f32.mrb[30].mxu1 }
 0x668   : > { %v4199_v53 = vadd.f32 %v4859_v12, %v7794_v34  ;;  %v4193_v43 = vpop.f32.mrb[31].mxu1 }
 0x669   : > { %v4194_v36 = vadd.f32 %v7794_v34, %v4193_v43 }
 0x66a   : > { %v4265_v14 = vadd.f32 %v4233_v63, %v4199_v53 }
 0x66b   : > { %v4264_v15 = vadd.f32 %v4232_v56, %v4194_v36 }
 0x66c   : > { %v4297_v1 = vmax.f32 %v4265_v14, 0.0 }
 0x66d   : > { %v4296_v54 = vmax.f32 %v4264_v15, 0.0 }
 0x66e   : > { %4329 = vst.msk [vmem:[%s7805_s20 + $0xf8] sm:$0xff] %vm1589_vm1, %v4297_v1 }
 0x66f   : > { %4328 = vst.msk [vmem:[%s7805_s20 + $0xf0] sm:$0xff] %vm1589_vm1, %v4296_v54 }
 0x670 PF: > { %s16_s21 = sadd.s32 1, %s4934_s21  }
 0x671   : > { %p13_p5 = scmp.ge.s32.totalorder %s16_s21, 4  }
 0x673   :  { %15 = sbr.rel (!%p13_p5) target bundleno = 1 (0x1), region = 82 }

</bundles_post_ra>
